<compile_context>
chip_gen: v6e
topology: v6e:2x2x1
jax: 0.10.0
libtpu: 0.0.40
codegen_flags: <defaults>
</compile_context>

<pallas_src>
import math

import jax
import jax.numpy as jnp
from jax import lax
from jax.experimental import pallas as pl
from jax.experimental.pallas import tpu as pltpu

d_model = 512
n_heads = 8
d_k = d_v = d_model // n_heads      # 64 -- the PyTorch module scales by sqrt(d_k)

# Finite "minus infinity": exp underflows to exactly 0 for any realistic row max,
# but fully-masked rows stay NaN-free (they come out as a uniform 1/S row).
_MASK_FILL = -1e30


# --------------------------------------------------------------------------- #
# Best-effort hardware introspection (safe fallbacks if the query fails).      #
# --------------------------------------------------------------------------- #
def _device_kind():
    try:
        return jax.devices()[0].device_kind.lower()
    except Exception:
        return ""


def _vmem_capacity_bytes():
    try:
        return int(pltpu.get_tpu_info().vmem_capacity_bytes)
    except Exception:
        return (64 << 20) if "v7" in _device_kind() else (128 << 20)


def _default_bf16_mxu():
    # bf16 operands are the MXU fast path on v6e/v7x; keep f32 on older parts
    # so the default numerics there stay closest to the PyTorch f32 module.
    kind = _device_kind()
    return not any(v in kind for v in ("v2", "v3", "v4", "v5"))


# --------------------------------------------------------------------------- #
# Kernel body.                                                                 #
# --------------------------------------------------------------------------- #
def _make_kernel(*, scale, mxu_dtype, mask_mode):
    """mask_mode in {"none", "causal", "shared", "per_bh"}."""

    def kernel(*refs):
        if mask_mode in ("shared", "per_bh"):
            mask_ref, q_ref, k_ref, v_ref, ctx_ref, attn_ref = refs
        else:
            q_ref, k_ref, v_ref, ctx_ref, attn_ref = refs

        # Fold 1/sqrt(d_k) into the small (Hblk, tq, D) q tile instead of the
        # (Hblk, tq, S) scores: S/D-times fewer VPU multiplies per step.
        q = (q_ref[0] * scale).astype(mxu_dtype)     # (Hblk, tq, D)
        k = k_ref[0].astype(mxu_dtype)               # (Hblk, S,  D)
        v = v_ref[0].astype(mxu_dtype)               # (Hblk, S,  D)

        # QK^T: contract the last dims directly (no explicit k.T relayout).
        scores = jnp.einsum("hqd,hkd->hqk", q, k,
                            preferred_element_type=jnp.float32)
        _, tq, S = scores.shape

        if mask_mode == "causal":
            # Mask generated in-kernel from iota: zero mask bytes DMA'd per step.
            row = lax.broadcasted_iota(jnp.int32, (tq, S), 0) + pl.program_id(2) * tq
            col = lax.broadcasted_iota(jnp.int32, (tq, S), 1)
            scores = jnp.where(col > row, _MASK_FILL, scores)
        elif mask_mode == "shared":
            # (tq, S) int8 block, shared by every (b, head-group) step.
            scores = jnp.where(mask_ref[...] != 0, _MASK_FILL, scores)
        elif mask_mode == "per_bh":
            # (Hblk, tq, S) int8 block; additive f32 fill applied in-kernel.
            scores = jnp.where(mask_ref[0] != 0, _MASK_FILL, scores)

        m = jnp.max(scores, axis=-1, keepdims=True)
        e = jnp.exp(scores - m)
        s = jnp.sum(e, axis=-1, keepdims=True)
        attn = e * pl.reciprocal(s, approx=True)     # EUP vrcp slot, ~free

        # dropout_p = 0.0 -> identity.
        # TODO(synk): pltpu.prng_seed/prng_random_bits based dropout for p > 0.
        ctx = jnp.einsum("hqk,hkd->hqd", attn.astype(mxu_dtype), v,
                         preferred_element_type=jnp.float32)

        attn_ref[0] = attn.astype(attn_ref.dtype)    # lane-dense (last dim S)
        # TODO(synk): ctx store has only D=64 lanes (masked vst); a lane-dense
        # [B, S, H*D] slab would fix that but costs an extra HBM round trip to
        # unpack in the wrapper, and the lane-dense attn store dominates bytes.
        ctx_ref[0] = ctx.astype(ctx_ref.dtype)

    return kernel


# --------------------------------------------------------------------------- #
# Tiling / VMEM budgeting.                                                     #
# --------------------------------------------------------------------------- #
def _step_bytes(hblk, tq, S, D, in_elt, out_elt, mask_mode):
    """Per-grid-step VMEM estimate: double-buffered blocks + live f32 temps."""
    pipelined = (hblk * tq * D * in_elt            # Q block
                 + 2 * hblk * S * D * in_elt       # K + V blocks
                 + hblk * tq * D * out_elt         # ctx block
                 + hblk * tq * S * out_elt)        # attn block
    if mask_mode == "shared":
        pipelined += tq * S                        # int8 shared mask block
    elif mask_mode == "per_bh":
        pipelined += hblk * tq * S                 # int8 per-(b,h) mask block
    temps = 3 * hblk * tq * S * 4                  # scores / e / attn f32 temporaries
    return 2 * pipelined + temps


def _pick_tiles(B, H, S, D, in_elt, out_elt, mask_mode, budget):
    """Pick (head_block, q_block).

    Shrink tq before hblk (total K/V DMA is independent of hblk, so head
    packing is preserved); keep the parallel (batch, head-group) axes at >= 2
    steps so a v7x megacore split never lands on the K/V-revisiting qi axis.
    """
    if S <= 512:
        tq_cands = [S]
    else:
        tq_cands = [t for t in (512, 256, 128) if S % t == 0] or [S]

    hblk, tq = H, None
    while True:
        tq = next((t for t in tq_cands
                   if _step_bytes(hblk, t, S, D, in_elt, out_elt, mask_mode) <= budget),
                  None)
        if tq is not None or hblk == 1:
            break
        hblk -= 1
        while hblk > 1 and H % hblk:
            hblk -= 1
    if tq is None:
        tq = tq_cands[-1]

    while hblk > 1 and B * (H // hblk) < 2:        # steer megacore split off qi
        hblk -= 1
        while hblk > 1 and H % hblk:
            hblk -= 1
    return hblk, tq


def _vmem_limit_bytes(step_bytes, vmem_cap):
    # v7x has only 64 MiB physical VMEM: cap well below it (Mosaic needs its own
    # internal scratch).  128 MiB parts (v5e/v6e) can safely go to 64 MiB.
    hard_cap = (44 << 20) if vmem_cap <= (64 << 20) else (64 << 20)
    want = int(step_bytes * 1.5) + (4 << 20)       # headroom for internal scratch
    return max(32 << 20, min(want, hard_cap))


# --------------------------------------------------------------------------- #
# Public wrapper (mirrors ScaleDotProductAttention.forward, dropout_p = 0.0).  #
# --------------------------------------------------------------------------- #
def scale_dot_product_attention(Q, K, V, attn_mask=None, *, causal=False,
                                use_bf16_mxu=None, out_dtype=None,
                                head_block=None, q_block=None):
    """Pallas version of ScaleDotProductAttention.forward (dropout_p = 0.0).

    Q, K, V: [B, H, S, d_k].  attn_mask: None or an array broadcastable to
    [B, H, S, S] (True / nonzero = masked out).  causal=True generates the
    causal mask in-kernel (no mask operand / DMA).  Returns (context, attn).

    use_bf16_mxu: feed the MXU bf16 operands (f32 accumulate) -- the v6e/v7x
    fast path; default is chosen from the attached TPU generation.
    out_dtype: dtype of the returned (context, attn); default Q.dtype.  Passing
    jnp.bfloat16 halves the dominant O(S^2) attn writeback.

    Note: like the PyTorch module, the score scale uses the *module-level*
    d_k (= d_model / n_heads), not the runtime head dim.
    """
    B, H, S, D = Q.shape
    assert K.shape == (B, H, S, D) and V.shape == (B, H, S, D)
    assert not (causal and attn_mask is not None), "pass either causal=True or attn_mask"

    if use_bf16_mxu is None:
        use_bf16_mxu = _default_bf16_mxu()
    mxu_dtype = jnp.bfloat16 if use_bf16_mxu else jnp.float32
    out_dt = jnp.dtype(out_dtype) if out_dtype is not None else jnp.dtype(Q.dtype)
    scale = 1.0 / math.sqrt(d_k)                   # module-level d_k, as in PyTorch

    if causal:
        mask_mode = "causal"
    elif attn_mask is None:
        mask_mode = "none"
    else:
        m = jnp.asarray(attn_mask)
        shared = (m.ndim <= 2) or all(int(d) == 1 for d in m.shape[:-2])
        mask_mode = "shared" if shared else "per_bh"

    in_elt = jnp.dtype(mxu_dtype).itemsize
    out_elt = out_dt.itemsize
    vmem_cap = _vmem_capacity_bytes()
    # Bigger per-step budget on 128 MiB-VMEM parts (v5e/v6e); conservative on v7x.
    budget = (20 << 20) if vmem_cap >= (96 << 20) else (8 << 20)

    hblk, tq = _pick_tiles(B, H, S, D, in_elt, out_elt, mask_mode, budget)
    if head_block is not None:
        hblk = head_block
    if q_block is not None:
        tq = q_block
    assert H % hblk == 0 and S % tq == 0

    # bf16 MXU path: convert Q/K/V wrapper-side so the kernel DMAs half the
    # bytes and skips three in-kernel cast passes.
    if use_bf16_mxu:
        Qo, Ko, Vo = (x.astype(jnp.bfloat16) for x in (Q, K, V))
    else:
        Qo, Ko, Vo = Q, K, V

    grid = (B, H // hblk, S // tq)
    q_spec = pl.BlockSpec((1, hblk, tq, D), lambda b, h, qi: (b, h, qi, 0))
    kv_spec = pl.BlockSpec((1, hblk, S, D), lambda b, h, qi: (b, h, 0, 0))
    ctx_spec = pl.BlockSpec((1, hblk, tq, D), lambda b, h, qi: (b, h, qi, 0))
    attn_spec = pl.BlockSpec((1, hblk, tq, S), lambda b, h, qi: (b, h, qi, 0))

    in_specs = [q_spec, kv_spec, kv_spec]
    operands = [Qo, Ko, Vo]
    if mask_mode == "shared":
        m = jnp.asarray(attn_mask)
        m2 = m.reshape(m.shape[-2:]) if m.ndim >= 2 else m
        mask_i8 = jnp.broadcast_to(m2 != 0, (S, S)).astype(jnp.int8)   # int8, not f32
        in_specs = [pl.BlockSpec((tq, S), lambda b, h, qi: (qi, 0))] + in_specs
        operands = [mask_i8] + operands
    elif mask_mode == "per_bh":
        m = jnp.asarray(attn_mask)
        mask_i8 = jnp.broadcast_to(m != 0, (B, H, S, S)).astype(jnp.int8)
        in_specs = [pl.BlockSpec((1, hblk, tq, S),
                                 lambda b, h, qi: (b, h, qi, 0))] + in_specs
        operands = [mask_i8] + operands

    kernel = _make_kernel(scale=scale, mxu_dtype=mxu_dtype, mask_mode=mask_mode)

    step_bytes = _step_bytes(hblk, tq, S, D, in_elt, out_elt, mask_mode)
    cparams = pltpu.CompilerParams(
        # qi revisits the same K/V block: keep it "arbitrary" so any v7x
        # megacore split lands on the batch / head-group axes (no duplicate
        # K/V fetch).  No effect on single-TC v5e/v6e.
        dimension_semantics=("parallel", "parallel", "arbitrary"),
        vmem_limit_bytes=_vmem_limit_bytes(step_bytes, vmem_cap),
    )

    ctx, attn = pl.pallas_call(
        kernel,
        out_shape=(
            jax.ShapeDtypeStruct((B, H, S, D), out_dt),    # context
            jax.ShapeDtypeStruct((B, H, S, S), out_dt),    # attn
        ),
        grid_spec=pltpu.PrefetchScalarGridSpec(
            num_scalar_prefetch=0,
            grid=grid,
            in_specs=in_specs,
            out_specs=[ctx_spec, attn_spec],
        ),
        compiler_params=cparams,
    )(*operands)

    # TODO(synk): flash-style (online-softmax over K/V tiles) context-only
    # variant for callers that don't need the O(S^2) attn output at all.
    return ctx, attn


if __name__ == "__main__":
    # Shapes consistent with the module: d_k = d_model / n_heads = 64.
    B, H, S = 2, n_heads, 128
    key = jax.random.PRNGKey(0)
    kq, kk, kv = jax.random.split(key, 3)
    Q = jax.random.normal(kq, (B, H, S, d_k), dtype=jnp.float32)
    K = jax.random.normal(kk, (B, H, S, d_k), dtype=jnp.float32)
    V = jax.random.normal(kv, (B, H, S, d_k), dtype=jnp.float32)

    scores_ref = jnp.einsum("bhqd,bhkd->bhqk", Q, K) / math.sqrt(d_k)
    attn_ref = jax.nn.softmax(scores_ref, axis=-1)
    ctx_ref = jnp.einsum("bhqk,bhkd->bhqd", attn_ref, V)

    # --- 1) unmasked, f32 MXU operands, f32 outputs (module-exact path) ---
    ctx, attn = scale_dot_product_attention(Q, K, V, use_bf16_mxu=False)
    jax.block_until_ready((ctx, attn))
    # approx reciprocal in the softmax -> relative tolerance instead of 1e-5 abs.
    assert jnp.allclose(attn, attn_ref, rtol=2e-2, atol=1e-4), "attn mismatch"
    assert jnp.allclose(ctx, ctx_ref, rtol=2e-2, atol=1e-2), "context mismatch"

    # --- 2) causal mask generated in-kernel (multi q-tile: q_block=64) ---
    causal_mask = jnp.triu(jnp.ones((S, S), dtype=jnp.bool_), k=1)
    scores_c_ref = jnp.where(causal_mask, _MASK_FILL, scores_ref)
    attn_c_ref = jax.nn.softmax(scores_c_ref, axis=-1)
    ctx_c_ref = jnp.einsum("bhqk,bhkd->bhqd", attn_c_ref, V)

    ctx_c, attn_c = scale_dot_product_attention(Q, K, V, causal=True,
                                                use_bf16_mxu=False, q_block=64)
    jax.block_until_ready((ctx_c, attn_c))
    assert jnp.allclose(attn_c, attn_c_ref, rtol=2e-2, atol=1e-4), "causal attn mismatch"
    assert jnp.allclose(ctx_c, ctx_c_ref, rtol=2e-2, atol=1e-2), "causal ctx mismatch"

    # --- 3) same causal mask passed explicitly (shared int8 mask DMA path) ---
    ctx_s, attn_s = scale_dot_product_attention(Q, K, V, attn_mask=causal_mask,
                                                use_bf16_mxu=False)
    jax.block_until_ready((ctx_s, attn_s))
    assert jnp.allclose(attn_s, attn_c_ref, rtol=2e-2, atol=1e-4), "shared-mask attn mismatch"
    assert jnp.allclose(ctx_s, ctx_c_ref, rtol=2e-2, atol=1e-2), "shared-mask ctx mismatch"

    # --- 4) per-(b,h)-broadcast padding mask (int8, additive fill in-kernel) ---
    pad = jnp.arange(S) >= (S - 32)                    # batch 1 masks last 32 keys
    bh_mask = jnp.array([False, True])[:, None, None, None] & pad[None, None, None, :]
    scores_p_ref = jnp.where(jnp.broadcast_to(bh_mask, (B, H, S, S)),
                             _MASK_FILL, scores_ref)
    attn_p_ref = jax.nn.softmax(scores_p_ref, axis=-1)
    ctx_p_ref = jnp.einsum("bhqk,bhkd->bhqd", attn_p_ref, V)

    ctx_p, attn_p = scale_dot_product_attention(Q, K, V, attn_mask=bh_mask,
                                                use_bf16_mxu=False)
    jax.block_until_ready((ctx_p, attn_p))
    assert jnp.allclose(attn_p, attn_p_ref, rtol=2e-2, atol=1e-4), "per-bh attn mismatch"
    assert jnp.allclose(ctx_p, ctx_p_ref, rtol=2e-2, atol=1e-2), "per-bh ctx mismatch"

    # --- 5) bf16 MXU operands + bf16 outputs (v6e/v7x fast path) ---
    ctx_b, attn_b = scale_dot_product_attention(Q, K, V, causal=True,
                                                use_bf16_mxu=True,
                                                out_dtype=jnp.bfloat16)
    jax.block_until_ready((ctx_b, attn_b))
    assert attn_b.dtype == jnp.bfloat16 and ctx_b.dtype == jnp.bfloat16
    assert jnp.allclose(attn_b.astype(jnp.float32), attn_c_ref, atol=3e-2), "bf16 attn mismatch"
    assert jnp.allclose(ctx_b.astype(jnp.float32), ctx_c_ref, atol=8e-2), "bf16 ctx mismatch"

    print("KERNEL_OK")
</pallas_src>

<mosaic_0001>
module attributes {stable_mosaic.version = 11 : i64} {
  func.func @kernel(%arg0: i32, %arg1: i32, %arg2: i32, %arg3: memref<1x8x128x64xf32, #tpu.memory_space<vmem>>, %arg4: memref<1x8x128x64xf32, #tpu.memory_space<vmem>>, %arg5: memref<1x8x128x64xf32, #tpu.memory_space<vmem>>, %arg6: memref<1x8x128x64xf32, #tpu.memory_space<vmem>>, %arg7: memref<1x8x128x128xf32, #tpu.memory_space<vmem>>) attributes {dimension_semantics = [#tpu.dimension_semantics<parallel>, #tpu.dimension_semantics<parallel>, #tpu.dimension_semantics<arbitrary>], iteration_bounds = array<i64: 2, 1, 1>, scalar_prefetch = 0 : i64, scratch_operands = 0 : i64, tpu.core_type = #tpu.core_type<tc>, window_params = [{transform_indices = @transform_0, window_bounds = array<i64: 1, 8, 128, 64>}, {transform_indices = @transform_1, window_bounds = array<i64: 1, 8, 128, 64>}, {transform_indices = @transform_2, window_bounds = array<i64: 1, 8, 128, 64>}, {transform_indices = @transform_3, window_bounds = array<i64: 1, 8, 128, 64>}, {transform_indices = @transform_4, window_bounds = array<i64: 1, 8, 128, 128>}]} {
    %c0 = arith.constant 0 : index
    %c0_0 = arith.constant 0 : index
    %c0_1 = arith.constant 0 : index
    %c0_2 = arith.constant 0 : index
    %0 = vector.load %arg3[%c0, %c0_0, %c0_1, %c0_2] : memref<1x8x128x64xf32, #tpu.memory_space<vmem>>, vector<1x8x128x64xf32>
    %1 = vector.shape_cast %0 : vector<1x8x128x64xf32> to vector<8x128x64xf32>
    %cst = arith.constant 1.250000e-01 : f32
    %2 = vector.broadcast %cst : f32 to vector<8x128x64xf32>
    %3 = arith.mulf %1, %2 : vector<8x128x64xf32>
    %c0_3 = arith.constant 0 : index
    %c0_4 = arith.constant 0 : index
    %c0_5 = arith.constant 0 : index
    %c0_6 = arith.constant 0 : index
    %4 = vector.load %arg4[%c0_3, %c0_4, %c0_5, %c0_6] : memref<1x8x128x64xf32, #tpu.memory_space<vmem>>, vector<1x8x128x64xf32>
    %5 = vector.shape_cast %4 : vector<1x8x128x64xf32> to vector<8x128x64xf32>
    %c0_7 = arith.constant 0 : index
    %c0_8 = arith.constant 0 : index
    %c0_9 = arith.constant 0 : index
    %c0_10 = arith.constant 0 : index
    %6 = vector.load %arg5[%c0_7, %c0_8, %c0_9, %c0_10] : memref<1x8x128x64xf32, #tpu.memory_space<vmem>>, vector<1x8x128x64xf32>
    %7 = vector.shape_cast %6 : vector<1x8x128x64xf32> to vector<8x128x64xf32>
    "tpu.trace_start"() <{level = 10 : i32, message = "hqd,hkd->hqk"}> : () -> ()
    %cst_11 = arith.constant dense<0.000000e+00> : vector<8x128x128xf32>
    %8 = tpu.matmul %3, %5, %cst_11 {dimension_numbers = #tpu.dot_dimension_numbers<[2], [2], [1], [1], [0, 0, 0, 1, 1, 1], [0], [0]>} : vector<8x128x64xf32>, vector<8x128x64xf32>, vector<8x128x128xf32> -> vector<8x128x128xf32>
    "tpu.trace_stop"() : () -> ()
    %cst_12 = arith.constant dense<0xFF800000> : vector<8x128xf32>
    %9 = vector.multi_reduction <maximumf>, %8, %cst_12 [2] : vector<8x128x128xf32> to vector<8x128xf32>
    %10 = vector.shape_cast %9 : vector<8x128xf32> to vector<8x128x1xf32>
    %11 = vector.broadcast %10 : vector<8x128x1xf32> to vector<8x128x128xf32>
    %12 = arith.subf %8, %11 : vector<8x128x128xf32>
    %13 = math.exp %12 : vector<8x128x128xf32>
    %cst_13 = arith.constant dense<0.000000e+00> : vector<8x128xf32>
    %14 = vector.multi_reduction <add>, %13, %cst_13 [2] : vector<8x128x128xf32> to vector<8x128xf32>
    %15 = vector.shape_cast %14 : vector<8x128xf32> to vector<8x128x1xf32>
    %16 = tpu.reciprocal %15 {approx = true} : vector<8x128x1xf32> -> vector<8x128x1xf32>
    %17 = vector.broadcast %16 : vector<8x128x1xf32> to vector<8x128x128xf32>
    %18 = arith.mulf %13, %17 : vector<8x128x128xf32>
    "tpu.trace_start"() <{level = 10 : i32, message = "hqk,hkd->hqd"}> : () -> ()
    %cst_14 = arith.constant dense<0.000000e+00> : vector<8x128x64xf32>
    %19 = tpu.matmul %18, %7, %cst_14 {dimension_numbers = #tpu.dot_dimension_numbers<[2], [1], [1], [2], [0, 0, 0, 1, 1, 2], [0], [0]>} : vector<8x128x128xf32>, vector<8x128x64xf32>, vector<8x128x64xf32> -> vector<8x128x64xf32>
    "tpu.trace_stop"() : () -> ()
    %c0_15 = arith.constant 0 : index
    %c0_16 = arith.constant 0 : index
    %c0_17 = arith.constant 0 : index
    %c0_18 = arith.constant 0 : index
    %20 = vector.load %arg7[%c0_15, %c0_16, %c0_17, %c0_18] : memref<1x8x128x128xf32, #tpu.memory_space<vmem>>, vector<1x8x128x128xf32>
    %21 = vector.shape_cast %20 : vector<1x8x128x128xf32> to vector<8x128x128xf32>
    %22 = vector.shape_cast %18 : vector<8x128x128xf32> to vector<1x8x128x128xf32>
    tpu.vector_store %arg7[%c0_15, %c0_16, %c0_17, %c0_18], %22 {strides = array<i32>} : memref<1x8x128x128xf32, #tpu.memory_space<vmem>>, vector<1x8x128x128xf32>,
    %c0_19 = arith.constant 0 : index
    %c0_20 = arith.constant 0 : index
    %c0_21 = arith.constant 0 : index
    %c0_22 = arith.constant 0 : index
    %23 = vector.load %arg6[%c0_19, %c0_20, %c0_21, %c0_22] : memref<1x8x128x64xf32, #tpu.memory_space<vmem>>, vector<1x8x128x64xf32>
    %24 = vector.shape_cast %23 : vector<1x8x128x64xf32> to vector<8x128x64xf32>
    %25 = vector.shape_cast %19 : vector<8x128x64xf32> to vector<1x8x128x64xf32>
    tpu.vector_store %arg6[%c0_19, %c0_20, %c0_21, %c0_22], %25 {strides = array<i32>} : memref<1x8x128x64xf32, #tpu.memory_space<vmem>>, vector<1x8x128x64xf32>,
    return
  }
  func.func @transform_0(%arg0: i32, %arg1: i32, %arg2: i32) -> (i32, i32, i32, i32) {
    %c0_i32 = arith.constant 0 : i32
    %c0_i32_0 = arith.constant 0 : i32
    return %arg0, %arg1, %arg2, %c0_i32 : i32, i32, i32, i32
  }
  func.func @transform_1(%arg0: i32, %arg1: i32, %arg2: i32) -> (i32, i32, i32, i32) {
    %c0_i32 = arith.constant 0 : i32
    %c0_i32_0 = arith.constant 0 : i32
    %c0_i32_1 = arith.constant 0 : i32
    return %arg0, %arg1, %c0_i32, %c0_i32_0 : i32, i32, i32, i32
  }
  func.func @transform_2(%arg0: i32, %arg1: i32, %arg2: i32) -> (i32, i32, i32, i32) {
    %c0_i32 = arith.constant 0 : i32
    %c0_i32_0 = arith.constant 0 : i32
    %c0_i32_1 = arith.constant 0 : i32
    return %arg0, %arg1, %c0_i32, %c0_i32_0 : i32, i32, i32, i32
  }
  func.func @transform_3(%arg0: i32, %arg1: i32, %arg2: i32) -> (i32, i32, i32, i32) {
    %c0_i32 = arith.constant 0 : i32
    %c0_i32_0 = arith.constant 0 : i32
    return %arg0, %arg1, %arg2, %c0_i32 : i32, i32, i32, i32
  }
  func.func @transform_4(%arg0: i32, %arg1: i32, %arg2: i32) -> (i32, i32, i32, i32) {
    %c0_i32 = arith.constant 0 : i32
    %c0_i32_0 = arith.constant 0 : i32
    return %arg0, %arg1, %arg2, %c0_i32 : i32, i32, i32, i32
  }
}

</mosaic_0001>

<bundles_post_ra>
// kernel: tpu_custom_call.1
= control target key start
LH: loop header
LB: loop body
LE: loop exit
PB: predicated region body
PF: predicated region fallthrough
CT: control target
= control target key end

     0   :  { %10 = vsyncpa [#allocation3], 0  ;;  %s10682_s0 = inlined_call_operand.vmem [shape: f32[2,8,128,64], index: 0, kind: input, shape index: {}]   ;;  %s10683_s1 = inlined_call_operand.vmem [shape: f32[2,8,128,64], index: 1, kind: input, shape index: {}]   ;;  %s10684_s2 = inlined_call_operand.vmem [shape: f32[2,8,128,64], index: 2, kind: input, shape index: {}]   ;;  %s10685_s3 = inlined_call_operand.vmem [shape: f32[2,8,128,64], index: 3, kind: output, shape index: {0}]   ;;  %s10686_s4 = inlined_call_operand.hbm [shape: f32[2,8,128,128], index: 4, kind: output, shape index: {1}]  }
   0x1   :  { %12 = vsyncpa [#allocation3 + $0x1], 0  ;;  %s7963_s15 = smov 0   ;;  %s7965_s16 = smov 0  }
   0x2   :  { %s7967_s17 = smov 0   ;;  %s7969_s18 = smov 0  }
   0x3   :  { %s7971_s19 = smov 0   ;;  %s7973_s20 = smov 0  }
   0x4 LB: > { %s5600_s21 = sadd.s32 4294967295, %s7933_s20   ;;  %s5601_s22 = sadd.s32 4294967294, %s7933_s20   ;;  %s7933_s20 = sphi %s7973_s20, %s18_s20   ;;  %s7929_s19 = sphi %s7971_s19, %s11164_s19   ;;  %s7925_s18 = sphi %s7969_s18, %s11163_s18   ;;  %s7921_s17 = sphi %s7967_s17, %s11162_s17   ;;  %s7917_s16 = sphi %s7965_s16, %s11161_s16   ;;  %s7913_s15 = sphi %s7963_s15, %s11160_s15  }
   0x5   : > { %s37_s23 = sadd.s32 1, %s7929_s19  ;;  %s164_s24 = sadd.s32 1, %s7921_s17 }
   0x6   : > { %p39_p0 = scmp.ge.s32.totalorder %s37_s23, 2  ;;  %p174_p1 = scmp.ne.s32.totalorder %s7921_s17, %s7917_s16 }
   0x7   : > { %p175_p2 = scmp.eq.s32.totalorder %s5600_s21, 1  ;;  %p180_p3 = scmp.ne.s32.totalorder %s7917_s16, %s7913_s15 }
   0x8   : > { %s11166_s23 = smov (%p39_p0, %s37_s23), 0  ;;  %p181_p5 = scmp.eq.s32.totalorder %s5601_s22, 1 }
   0x9   : > { %p8003_p4 = por %p175_p2, %p174_p1  ;;  %s157_s26 = ssub.s32 %s7929_s19, %s11166_s23 }
   0xa   : > { %p5604_p6 = scmp.ge.s32.totalorder %s7933_s20, 1  ;;  %p162_p7 = scmp.eq.s32.totalorder %s157_s26, 0 }
   0xb   : > { %p8010_p8 = por %p181_p5, %p180_p3  ;;  %p246_p9 = scmp.lt.s32.totalorder %s7933_s20, 3 }
   0xc   : > { %s8016_s28 = scalar_select %p162_p7, %s7921_s17, %s164_s24  }
   0xd   : > { %p247_p10 = pnand %p5604_p6, %p246_p9 }
   0xf   : > { %250 = sbr.rel (%p247_p10) target bundleno = 1145 (0x479), region = 32 }
  0x14   : > { %p317_p11 = scmp.lt.s32.totalorder %s7925_s18, 1  ;;  %vm883_vm0 = vcmask 523264   ;;  %s312_s14 = sand.u32 1, %s7917_s16  }
  0x15   : > { %s5605_s21 = sshll.u32 %s312_s14, 10  ;;  %s10509_s9 = scalar_lea.sflag [#allocation3], %s312_s14 }
  0x16   : > { %s318_s29 = scalar_select %p317_p11, %s7925_s18, 1 }
  0x17   : > { %s9527_s22 = scalar_lea.vmem [#allocation2], %s5605_s21 }
  0x18   : > { %s8020_s30 = sshll.u32 %s318_s29, 10  ;;  %s5418_s5 = sshll.u32 %s9527_s22, 4  ;;  %s10505_s5 = int_to_ptr.vmem [resolvable:$true] %s5418_s5 }
  0x19   : > { %s8026_s7 = scalar_lea.vmem %s10683_s1, %s8020_s30  ;;  %s8048_s10 = scalar_lea.vmem %s10682_s0, %s8020_s30 }
  0x1a   : > { %v642_v0 = vld [vmem:[%s8026_s7 + $0x78] sm:$0xff]  ;;  %v641_v2 = vld [vmem:[%s8026_s7 + $0x70] sm:$0xff]  ;;  %v640_v4 = vld [vmem:[%s8026_s7 + $0x68] sm:$0xff]  ;;  %s9018_s13 = scalar_lea.vmem %s10684_s2, %s8020_s30  ;;  %s10209_s29 = scalar_lea.vmem %s10685_s3, %s8020_s30 }
  0x1b   : > { %v658_v1 = vld [vmem:[%s8026_s7 + $0xf8] sm:$0xff]  ;;  %6392 = vmatprep.subr.msk.mxu0 %vm883_vm0, %v642_v0  ;;  %v657_v3 = vld [vmem:[%s8026_s7 + $0xf0] sm:$0xff]  ;;  %v656_v5 = vld [vmem:[%s8026_s7 + $0xe8] sm:$0xff]  ;;  %s5879_s30 = sshll.u32 %s7925_s18, 14  ;;  %s7935_s18 = smov [#allocation2]  }
  0x1c   : > { %6448 = vmatprep.subr.msk.mxu1 %vm883_vm0, %v658_v1  ;;  %6393 = vmatpush3.xpose.msk.msra.mxu0 %vm883_vm0, %v642_v0  ;;  %v639_v6 = vld [vmem:[%s8026_s7 + $0x60] sm:$0xff]  ;;  %v638_v11 = vld [vmem:[%s8026_s7 + $0x58] sm:$0xff]  ;;  %v637_v14 = vld [vmem:[%s8026_s7 + $0x50] sm:$0xff]  ;;  %s10501_s8 = scalar_lea.hbm %s10686_s4, %s5879_s30  ;;  %s7861_s11 = sshll.u32 %s7935_s18, 4  ;;  %s7862_s11 = int_to_ptr.vmem [resolvable:$false] %s7861_s11 }
  0x1d   : > { %6449 = vmatpush3.xpose.msk.msra.mxu1 %vm883_vm0, %v658_v1  ;;  %6394 = vmatprep.subr.msk.mxu0 %vm883_vm0, %v641_v2  ;;  %v655_v7 = vld [vmem:[%s8026_s7 + $0xe0] sm:$0xff]  ;;  %v654_v12 = vld [vmem:[%s8026_s7 + $0xd8] sm:$0xff]  ;;  %v653_v15 = vld [vmem:[%s8026_s7 + $0xd0] sm:$0xff]  ;;  %s7863_s12 = scalar_lea.vmem %s7862_s11, 32768  ;;  %p7864_p1 = scmp.lt.s32.totalorder %s10505_s5, %s7862_s11 }
  0x1e   : > { %6450 = vmatprep.subr.msk.mxu1 %vm883_vm0, %v657_v3  ;;  %v371_v8 = vld [vmem:[%s8048_s10] sm:$0xff]  ;;  %v636_v16 = vld [vmem:[%s8026_s7 + $0x48] sm:$0xff]  ;;  %v634_v20 = vld [vmem:[%s8026_s7 + $0x38] sm:$0xff] }
  0x1f   : > { %v499_v9 = vmul.f32 0.125, %v371_v8  ;;  %v387_v10 = vld [vmem:[%s8048_s10 + $0x80] sm:$0xff]  ;;  %v652_v17 = vld [vmem:[%s8026_s7 + $0xc8] sm:$0xff]  ;;  %v650_v21 = vld [vmem:[%s8026_s7 + $0xb8] sm:$0xff] }
  0x20   : > { %6395 = vmatpush3.xpose.msk.msra.mxu0 %vm883_vm0, %v641_v2  ;;  %v515_v13 = vmul.f32 0.125, %v387_v10  ;;  %v635_v18 = vld [vmem:[%s8026_s7 + $0x40] sm:$0xff]  ;;  %v633_v22 = vld [vmem:[%s8026_s7 + $0x30] sm:$0xff]  ;;  %v632_v24 = vld [vmem:[%s8026_s7 + $0x28] sm:$0xff] }
  0x21   : > { %6451 = vmatpush3.xpose.msk.msra.mxu1 %vm883_vm0, %v657_v3  ;;  %6396 = vmatprep.subr.msk.mxu0 %vm883_vm0, %v640_v4  ;;  %v651_v19 = vld [vmem:[%s8026_s7 + $0xc0] sm:$0xff]  ;;  %v649_v23 = vld [vmem:[%s8026_s7 + $0xb0] sm:$0xff]  ;;  %v648_v25 = vld [vmem:[%s8026_s7 + $0xa8] sm:$0xff] }
  0x22   : > { %6452 = vmatprep.subr.msk.mxu1 %vm883_vm0, %v656_v5  ;;  %6424 = vmatprep.mubr.msk.f32.mxu0 %vm883_vm0, %v499_v9  ;;  %v631_v26 = vld [vmem:[%s8026_s7 + $0x20] sm:$0xff]  ;;  %v630_v28 = vld [vmem:[%s8026_s7 + $0x18] sm:$0xff]  ;;  %v629_v30 = vld [vmem:[%s8026_s7 + $0x10] sm:$0xff] }
  0x23   : > { %6480 = vmatprep.mubr.msk.f32.mxu1 %vm883_vm0, %v515_v13  ;;  %v647_v27 = vld [vmem:[%s8026_s7 + $0xa0] sm:$0xff]  ;;  %v646_v29 = vld [vmem:[%s8026_s7 + $0x98] sm:$0xff]  ;;  %v645_v31 = vld [vmem:[%s8026_s7 + $0x90] sm:$0xff] }
  0x24   : > { %6397 = vmatpush3.xpose.msk.msra.mxu0 %vm883_vm0, %v640_v4  ;;  %v628_v32 = vld [vmem:[%s8026_s7 + $0x8] sm:$0xff]  ;;  %v627_v34 = vld [vmem:[%s8026_s7] sm:$0xff]  ;;  %v674_v38 = vld [vmem:[%s8026_s7 + $0x178] sm:$0xff] }
  0x25   : > { %6453 = vmatpush3.xpose.msk.msra.mxu1 %vm883_vm0, %v656_v5  ;;  %6398 = vmatprep.subr.msk.mxu0 %vm883_vm0, %v639_v6  ;;  %v644_v33 = vld [vmem:[%s8026_s7 + $0x88] sm:$0xff]  ;;  %v643_v35 = vld [vmem:[%s8026_s7 + $0x80] sm:$0xff]  ;;  %v690_v39 = vld [vmem:[%s8026_s7 + $0x1f8] sm:$0xff] }
  0x26   : > { %6454 = vmatprep.subr.msk.mxu1 %vm883_vm0, %v655_v7  ;;  %v372_v36 = vld [vmem:[%s8048_s10 + $0x8] sm:$0xff]  ;;  %v373_v40 = vld [vmem:[%s8048_s10 + $0x10] sm:$0xff]  ;;  %v374_v44 = vld [vmem:[%s8048_s10 + $0x18] sm:$0xff] }
  0x27   : > { %v388_v37 = vld [vmem:[%s8048_s10 + $0x88] sm:$0xff]  ;;  %v500_v41 = vmul.f32 0.125, %v372_v36  ;;  %v389_v43 = vld [vmem:[%s8048_s10 + $0x90] sm:$0xff]  ;;  %v390_v45 = vld [vmem:[%s8048_s10 + $0x98] sm:$0xff]  ;;  %v501_v46 = vmul.f32 0.125, %v373_v40  ;;  %v502_v49 = vmul.f32 0.125, %v374_v44 }
  0x28   : > { %6399 = vmatpush3.xpose.msk.msra.mxu0 %vm883_vm0, %v639_v6  ;;  %v516_v42 = vmul.f32 0.125, %v388_v37  ;;  %v673_v47 = vld [vmem:[%s8026_s7 + $0x170] sm:$0xff]  ;;  %v517_v48 = vmul.f32 0.125, %v389_v43  ;;  %v518_v51 = vmul.f32 0.125, %v390_v45  ;;  %v375_v52 = vld [vmem:[%s8048_s10 + $0x20] sm:$0xff]  ;;  %v376_v54 = vld [vmem:[%s8048_s10 + $0x28] sm:$0xff] }
  0x29   : > { %6455 = vmatpush3.xpose.msk.msra.mxu1 %vm883_vm0, %v655_v7  ;;  %6400 = vmatprep.subr.msk.mxu0 %vm883_vm0, %v638_v11  ;;  %v689_v50 = vld [vmem:[%s8026_s7 + $0x1f0] sm:$0xff]  ;;  %v391_v53 = vld [vmem:[%s8048_s10 + $0xa0] sm:$0xff]  ;;  %v392_v55 = vld [vmem:[%s8048_s10 + $0xa8] sm:$0xff]  ;;  %v503_v58 = vmul.f32 0.125, %v375_v52  ;;  %v504_v60 = vmul.f32 0.125, %v376_v54 }
  0x2a   : > { %6456 = vmatprep.subr.msk.mxu1 %vm883_vm0, %v654_v12  ;;  %v672_v56 = vld [vmem:[%s8026_s7 + $0x168] sm:$0xff]  ;;  %v519_v59 = vmul.f32 0.125, %v391_v53  ;;  %v520_v61 = vmul.f32 0.125, %v392_v55  ;;  %v377_v62 = vld [vmem:[%s8048_s10 + $0x30] sm:$0xff]  ;;  %v378_v0 = vld [vmem:[%s8048_s10 + $0x38] sm:$0xff] }
  0x2b   : > { %v688_v57 = vld [vmem:[%s8026_s7 + $0x1e8] sm:$0xff]  ;;  %v393_v63 = vld [vmem:[%s8048_s10 + $0xb0] sm:$0xff]  ;;  %v394_v1 = vld [vmem:[%s8048_s10 + $0xb8] sm:$0xff]  ;;  %v505_v4 = vmul.f32 0.125, %v377_v62  ;;  %v506_v6 = vmul.f32 0.125, %v378_v0 }
  0x2c   : > { %6401 = vmatpush3.xpose.msk.msra.mxu0 %vm883_vm0, %v638_v11  ;;  %v671_v2 = vld [vmem:[%s8026_s7 + $0x160] sm:$0xff]  ;;  %v521_v5 = vmul.f32 0.125, %v393_v63  ;;  %v522_v7 = vmul.f32 0.125, %v394_v1  ;;  %v380_v10 = vld [vmem:[%s8048_s10 + $0x48] sm:$0xff]  ;;  %v686_v13 = vld [vmem:[%s8026_s7 + $0x1d8] sm:$0xff] }
  0x2d   : > { %6457 = vmatpush3.xpose.msk.msra.mxu1 %vm883_vm0, %v654_v12  ;;  %6402 = vmatprep.subr.msk.mxu0 %vm883_vm0, %v637_v14  ;;  %v687_v3 = vld [vmem:[%s8026_s7 + $0x1e0] sm:$0xff]  ;;  %v396_v11 = vld [vmem:[%s8048_s10 + $0xc8] sm:$0xff]  ;;  %v670_v12 = vld [vmem:[%s8026_s7 + $0x158] sm:$0xff] }
  0x2e   : > { %6458 = vmatprep.subr.msk.mxu1 %vm883_vm0, %v653_v15  ;;  %v379_v8 = vld [vmem:[%s8048_s10 + $0x40] sm:$0xff]  ;;  %v386_v40 = vld [vmem:[%s8048_s10 + $0x78] sm:$0xff]  ;;  %v665_v54 = vld [vmem:[%s8026_s7 + $0x130] sm:$0xff] }
  0x2f   : > { %v395_v9 = vld [vmem:[%s8048_s10 + $0xc0] sm:$0xff]  ;;  %v681_v55 = vld [vmem:[%s8026_s7 + $0x1b0] sm:$0xff]  ;;  %v660_v0 = vld [vmem:[%s8026_s7 + $0x108] sm:$0xff] }
  0x30   : > { %6403 = vmatpush3.xpose.msk.msra.mxu0 %vm883_vm0, %v637_v14  ;;  %v507_v14 = vmul.f32 0.125, %v379_v8  ;;  %v683_v43 = vld [vmem:[%s8026_s7 + $0x1c0] sm:$0xff]  ;;  %v661_v62 = vld [vmem:[%s8026_s7 + $0x110] sm:$0xff]  ;;  %v676_v1 = vld [vmem:[%s8026_s7 + $0x188] sm:$0xff] }
  0x31   : > { %6459 = vmatpush3.xpose.msk.msra.mxu1 %vm883_vm0, %v653_v15  ;;  %6404 = vmatprep.subr.msk.mxu0 %vm883_vm0, %v636_v16  ;;  %v523_v15 = vmul.f32 0.125, %v395_v9  ;;  %v677_v63 = vld [vmem:[%s8026_s7 + $0x190] sm:$0xff] }
  0x32   : > { %6460 = vmatprep.subr.msk.mxu1 %vm883_vm0, %v652_v17 }
  0x34   : > { %6405 = vmatpush3.xpose.msk.msra.mxu0 %vm883_vm0, %v636_v16  ;;  %v508_v16 = vmul.f32 0.125, %v380_v10  ;;  %v405_v10 = vld [vmem:[%s8048_s10 + $0x110] sm:$0xff] }
  0x35   : > { %6461 = vmatpush3.xpose.msk.msra.mxu1 %vm883_vm0, %v652_v17  ;;  %6406 = vmatprep.subr.msk.mxu0 %vm883_vm0, %v635_v18  ;;  %v524_v17 = vmul.f32 0.125, %v396_v11  ;;  %v421_v11 = vld [vmem:[%s8048_s10 + $0x190] sm:$0xff] }
  0x36   : > { %6462 = vmatprep.subr.msk.mxu1 %vm883_vm0, %v651_v19 }
  0x38   : > { %6407 = vmatpush3.xpose.msk.msra.mxu0 %vm883_vm0, %v635_v18  ;;  %v381_v18 = vld [vmem:[%s8048_s10 + $0x50] sm:$0xff] }
  0x39   : > { %6463 = vmatpush3.xpose.msk.msra.mxu1 %vm883_vm0, %v651_v19  ;;  %6408 = vmatprep.subr.msk.mxu0 %vm883_vm0, %v634_v20  ;;  %v397_v19 = vld [vmem:[%s8048_s10 + $0xd0] sm:$0xff] }
  0x3a   : > { %6464 = vmatprep.subr.msk.mxu1 %vm883_vm0, %v650_v21 }
  0x3c   : > { %6409 = vmatpush3.xpose.msk.msra.mxu0 %vm883_vm0, %v634_v20  ;;  %v382_v20 = vld [vmem:[%s8048_s10 + $0x58] sm:$0xff] }
  0x3d   : > { %6465 = vmatpush3.xpose.msk.msra.mxu1 %vm883_vm0, %v650_v21  ;;  %6410 = vmatprep.subr.msk.mxu0 %vm883_vm0, %v633_v22  ;;  %v398_v21 = vld [vmem:[%s8048_s10 + $0xd8] sm:$0xff] }
  0x3e   : > { %6466 = vmatprep.subr.msk.mxu1 %vm883_vm0, %v649_v23 }
  0x40   : > { %6411 = vmatpush3.xpose.msk.msra.mxu0 %vm883_vm0, %v633_v22  ;;  %v669_v22 = vld [vmem:[%s8026_s7 + $0x150] sm:$0xff] }
  0x41   : > { %6467 = vmatpush3.xpose.msk.msra.mxu1 %vm883_vm0, %v649_v23  ;;  %6412 = vmatprep.subr.msk.mxu0 %vm883_vm0, %v632_v24  ;;  %v685_v23 = vld [vmem:[%s8026_s7 + $0x1d0] sm:$0xff] }
  0x42   : > { %6468 = vmatprep.subr.msk.mxu1 %vm883_vm0, %v648_v25 }
  0x44   : > { %6413 = vmatpush3.xpose.msk.msra.mxu0 %vm883_vm0, %v632_v24  ;;  %v509_v24 = vmul.f32 0.125, %v381_v18 }
  0x45   : > { %6469 = vmatpush3.xpose.msk.msra.mxu1 %vm883_vm0, %v648_v25  ;;  %6414 = vmatprep.subr.msk.mxu0 %vm883_vm0, %v631_v26  ;;  %v525_v25 = vmul.f32 0.125, %v397_v19 }
  0x46   : > { %6470 = vmatprep.subr.msk.mxu1 %vm883_vm0, %v647_v27 }
  0x48   : > { %6415 = vmatpush3.xpose.msk.msra.mxu0 %vm883_vm0, %v631_v26  ;;  %v510_v26 = vmul.f32 0.125, %v382_v20  ;;  %v407_v20 = vld [vmem:[%s8048_s10 + $0x120] sm:$0xff] }
  0x49   : > { %6471 = vmatpush3.xpose.msk.msra.mxu1 %vm883_vm0, %v647_v27  ;;  %6416 = vmatprep.subr.msk.mxu0 %vm883_vm0, %v630_v28  ;;  %v526_v27 = vmul.f32 0.125, %v398_v21  ;;  %v423_v21 = vld [vmem:[%s8048_s10 + $0x1a0] sm:$0xff] }
  0x4a   : > { %6472 = vmatprep.subr.msk.mxu1 %vm883_vm0, %v646_v29 }
  0x4c   : > { %6417 = vmatpush3.xpose.msk.msra.mxu0 %vm883_vm0, %v630_v28  ;;  %v383_v28 = vld [vmem:[%s8048_s10 + $0x60] sm:$0xff] }
  0x4d   : > { %6473 = vmatpush3.xpose.msk.msra.mxu1 %vm883_vm0, %v646_v29  ;;  %6418 = vmatprep.subr.msk.mxu0 %vm883_vm0, %v629_v30  ;;  %v399_v29 = vld [vmem:[%s8048_s10 + $0xe0] sm:$0xff] }
  0x4e   : > { %6474 = vmatprep.subr.msk.mxu1 %vm883_vm0, %v645_v31 }
  0x50   : > { %6419 = vmatpush3.xpose.msk.msra.mxu0 %vm883_vm0, %v629_v30  ;;  %v384_v30 = vld [vmem:[%s8048_s10 + $0x68] sm:$0xff] }
  0x51   : > { %6475 = vmatpush3.xpose.msk.msra.mxu1 %vm883_vm0, %v645_v31  ;;  %6420 = vmatprep.subr.msk.mxu0 %vm883_vm0, %v628_v32  ;;  %v400_v31 = vld [vmem:[%s8048_s10 + $0xe8] sm:$0xff]  ;;  %v512_v36 = vmul.f32 0.125, %v384_v30  ;;  %v409_v30 = vld [vmem:[%s8048_s10 + $0x130] sm:$0xff] }
  0x52   : > { %6476 = vmatprep.subr.msk.mxu1 %vm883_vm0, %v644_v33  ;;  %v528_v37 = vmul.f32 0.125, %v400_v31  ;;  %v425_v31 = vld [vmem:[%s8048_s10 + $0x1b0] sm:$0xff] }
  0x54   : > { %6421 = vmatpush3.xpose.msk.msra.mxu0 %vm883_vm0, %v628_v32  ;;  %v668_v32 = vld [vmem:[%s8026_s7 + $0x148] sm:$0xff] }
  0x55   : > { %6477 = vmatpush3.xpose.msk.msra.mxu1 %vm883_vm0, %v644_v33  ;;  %6422 = vmatprep.subr.msk.mxu0 %vm883_vm0, %v627_v34  ;;  %v684_v33 = vld [vmem:[%s8026_s7 + $0x1c8] sm:$0xff] }
  0x56   : > { %6478 = vmatprep.subr.msk.mxu1 %vm883_vm0, %v643_v35 }
  0x58   : > { %6423 = vmatpush3.xpose.msk.msra.mxu0 %vm883_vm0, %v627_v34  ;;  %v511_v34 = vmul.f32 0.125, %v383_v28 }
  0x59   : > { %6479 = vmatpush3.xpose.msk.msra.mxu1 %vm883_vm0, %v643_v35  ;;  %6504 = vmatprep.subr.msk.mxu0 %vm883_vm0, %v674_v38  ;;  %v527_v35 = vmul.f32 0.125, %v399_v29 }
  0x5a   : > { %6560 = vmatprep.subr.msk.mxu1 %vm883_vm0, %v690_v39 }
  0x5b   : > { %6425 = vmatmul.mubr.msk.f32.vlgmr.msra.gmra.mxu0 %vm883_vm0, %v500_v41  ;;  %v402_v41 = vld [vmem:[%s8048_s10 + $0xf8] sm:$0xff] }
  0x5c   : > { %6481 = vmatmul.mubr.msk.f32.vlgmr.msra.gmra.mxu1 %vm883_vm0, %v516_v42  ;;  %6505 = vmatpush3.xpose.msk.msra.mxu0 %vm883_vm0, %v674_v38  ;;  %v385_v38 = vld [vmem:[%s8048_s10 + $0x70] sm:$0xff]  ;;  %v667_v42 = vld [vmem:[%s8026_s7 + $0x140] sm:$0xff] }
  0x5d   : > { %6561 = vmatpush3.xpose.msk.msra.mxu1 %vm883_vm0, %v690_v39  ;;  %6427 = vmatprep.mubr.msk.f32.mxu0 %vm883_vm0, %v501_v46  ;;  %v401_v39 = vld [vmem:[%s8048_s10 + $0xf0] sm:$0xff]  ;;  %v513_v44 = vmul.f32 0.125, %v385_v38  ;;  %v514_v46 = vmul.f32 0.125, %v386_v40  ;;  %v411_v40 = vld [vmem:[%s8048_s10 + $0x140] sm:$0xff] }
  0x5e   : > { %6506 = vmatprep.subr.msk.mxu0 %vm883_vm0, %v673_v47  ;;  %6562 = vmatprep.subr.msk.mxu1 %vm883_vm0, %v689_v50  ;;  %v529_v45 = vmul.f32 0.125, %v401_v39 }
  0x5f   : > { %6483 = vmatprep.mubr.msk.f32.mxu1 %vm883_vm0, %v517_v48  ;;  %6428 = vmatmul.mubr.msk.f32.gmra.mxu0 %vm883_vm0, %v502_v49  ;;  %v403_v48 = vld [vmem:[%s8048_s10 + $0x100] sm:$0xff] }
  0x60   : > { %6484 = vmatmul.mubr.msk.f32.gmra.mxu1 %vm883_vm0, %v518_v51  ;;  %6507 = vmatpush3.xpose.msk.msra.mxu0 %vm883_vm0, %v673_v47  ;;  %v530_v47 = vmul.f32 0.125, %v402_v41  ;;  %v419_v49 = vld [vmem:[%s8048_s10 + $0x180] sm:$0xff]  ;;  %v682_v51 = vld [vmem:[%s8026_s7 + $0x1b8] sm:$0xff]  ;;  %v531_v52 = vmul.f32 0.125, %v403_v48 }
  0x61   : > { %6563 = vmatpush3.xpose.msk.msra.mxu1 %vm883_vm0, %v689_v50  ;;  %6508 = vmatprep.subr.msk.mxu0 %vm883_vm0, %v672_v56  ;;  %v666_v50 = vld [vmem:[%s8026_s7 + $0x138] sm:$0xff]  ;;  %v547_v53 = vmul.f32 0.125, %v419_v49  ;;  %v427_v41 = vld [vmem:[%s8048_s10 + $0x1c0] sm:$0xff] }
  0x62   : > { %6564 = vmatprep.subr.msk.mxu1 %vm883_vm0, %v688_v57  ;;  %6430 = vmatprep.mubr.msk.f32.mxu0 %vm883_vm0, %v503_v58  ;;  %v663_v58 = vld [vmem:[%s8026_s7 + $0x120] sm:$0xff] }
  0x63   : > { %6486 = vmatprep.mubr.msk.f32.mxu1 %vm883_vm0, %v519_v59  ;;  %6431 = vmatmul.mubr.msk.f32.gmra.mxu0 %vm883_vm0, %v504_v60  ;;  %v679_v59 = vld [vmem:[%s8026_s7 + $0x1a0] sm:$0xff]  ;;  %v662_v60 = vld [vmem:[%s8026_s7 + $0x118] sm:$0xff] }
  0x64   : > { %6487 = vmatmul.mubr.msk.f32.gmra.mxu1 %vm883_vm0, %v520_v61  ;;  %6509 = vmatpush3.xpose.msk.msra.mxu0 %vm883_vm0, %v672_v56  ;;  %v664_v56 = vld [vmem:[%s8026_s7 + $0x128] sm:$0xff]  ;;  %v678_v61 = vld [vmem:[%s8026_s7 + $0x198] sm:$0xff] }
  0x65   : > { %6565 = vmatpush3.xpose.msk.msra.mxu1 %vm883_vm0, %v688_v57  ;;  %6510 = vmatprep.subr.msk.mxu0 %vm883_vm0, %v671_v2  ;;  %v680_v57 = vld [vmem:[%s8026_s7 + $0x1a8] sm:$0xff] }
  0x66   : > { %6566 = vmatprep.subr.msk.mxu1 %vm883_vm0, %v687_v3  ;;  %6433 = vmatprep.mubr.msk.f32.mxu0 %vm883_vm0, %v505_v4  ;;  %v404_v4 = vld [vmem:[%s8048_s10 + $0x108] sm:$0xff] }
  0x67   : > { %6489 = vmatprep.mubr.msk.f32.mxu1 %vm883_vm0, %v521_v5  ;;  %6434 = vmatmul.mubr.msk.f32.gmra.mxu0 %vm883_vm0, %v506_v6  ;;  %v420_v5 = vld [vmem:[%s8048_s10 + $0x188] sm:$0xff]  ;;  %v706_v6 = vld [vmem:[%s8026_s7 + $0x278] sm:$0xff]  ;;  %v532_v8 = vmul.f32 0.125, %v404_v4 }
  0x68   : > { %6490 = vmatmul.mubr.msk.f32.gmra.mxu1 %vm883_vm0, %v522_v7  ;;  %6511 = vmatpush3.xpose.msk.msra.mxu0 %vm883_vm0, %v671_v2  ;;  %v659_v2 = vld [vmem:[%s8026_s7 + $0x100] sm:$0xff]  ;;  %v722_v7 = vld [vmem:[%s8026_s7 + $0x2f8] sm:$0xff]  ;;  %v548_v9 = vmul.f32 0.125, %v420_v5 }
  0x69   : > { %6567 = vmatpush3.xpose.msk.msra.mxu1 %vm883_vm0, %v687_v3  ;;  %6512 = vmatprep.subr.msk.mxu0 %vm883_vm0, %v670_v12  ;;  %v675_v3 = vld [vmem:[%s8026_s7 + $0x180] sm:$0xff] }
  0x6a   : > { %6568 = vmatprep.subr.msk.mxu1 %vm883_vm0, %v686_v13  ;;  %6436 = vmatprep.mubr.msk.f32.mxu0 %vm883_vm0, %v507_v14  ;;  %v705_v14 = vld [vmem:[%s8026_s7 + $0x270] sm:$0xff] }
  0x6b   : > { %6492 = vmatprep.mubr.msk.f32.mxu1 %vm883_vm0, %v523_v15  ;;  %6437 = vmatmul.mubr.msk.f32.gmra.mxu0 %vm883_vm0, %v508_v16  ;;  %v721_v15 = vld [vmem:[%s8026_s7 + $0x2f0] sm:$0xff]  ;;  %v533_v16 = vmul.f32 0.125, %v405_v10  ;;  %v699_v10 = vld [vmem:[%s8026_s7 + $0x240] sm:$0xff] }
  0x6c   : > { %6493 = vmatmul.mubr.msk.f32.gmra.mxu1 %vm883_vm0, %v524_v17  ;;  %6513 = vmatpush3.xpose.msk.msra.mxu0 %vm883_vm0, %v670_v12  ;;  %v406_v12 = vld [vmem:[%s8048_s10 + $0x118] sm:$0xff]  ;;  %v549_v17 = vmul.f32 0.125, %v421_v11  ;;  %v715_v11 = vld [vmem:[%s8026_s7 + $0x2c0] sm:$0xff] }
  0x6d   : > { %6569 = vmatpush3.xpose.msk.msra.mxu1 %vm883_vm0, %v686_v13  ;;  %6514 = vmatprep.subr.msk.mxu0 %vm883_vm0, %v669_v22  ;;  %v422_v13 = vld [vmem:[%s8048_s10 + $0x198] sm:$0xff]  ;;  %v534_v18 = vmul.f32 0.125, %v406_v12 }
  0x6e   : > { %6570 = vmatprep.subr.msk.mxu1 %vm883_vm0, %v685_v23  ;;  %6439 = vmatprep.mubr.msk.f32.mxu0 %vm883_vm0, %v509_v24  ;;  %v550_v19 = vmul.f32 0.125, %v422_v13  ;;  %v704_v24 = vld [vmem:[%s8026_s7 + $0x268] sm:$0xff] }
  0x6f   : > { %6495 = vmatprep.mubr.msk.f32.mxu1 %vm883_vm0, %v525_v25  ;;  %6440 = vmatmul.mubr.msk.f32.gmra.mxu0 %vm883_vm0, %v510_v26  ;;  %v720_v25 = vld [vmem:[%s8026_s7 + $0x2e8] sm:$0xff]  ;;  %v535_v26 = vmul.f32 0.125, %v407_v20 }
  0x70   : > { %6496 = vmatmul.mubr.msk.f32.gmra.mxu1 %vm883_vm0, %v526_v27  ;;  %6515 = vmatpush3.xpose.msk.msra.mxu0 %vm883_vm0, %v669_v22  ;;  %v408_v22 = vld [vmem:[%s8048_s10 + $0x128] sm:$0xff]  ;;  %v551_v27 = vmul.f32 0.125, %v423_v21 }
  0x71   : > { %6571 = vmatpush3.xpose.msk.msra.mxu1 %vm883_vm0, %v685_v23  ;;  %6516 = vmatprep.subr.msk.mxu0 %vm883_vm0, %v668_v32  ;;  %v424_v23 = vld [vmem:[%s8048_s10 + $0x1a8] sm:$0xff]  ;;  %v536_v28 = vmul.f32 0.125, %v408_v22  ;;  %v697_v22 = vld [vmem:[%s8026_s7 + $0x230] sm:$0xff] }
  0x72   : > { %6572 = vmatprep.subr.msk.mxu1 %vm883_vm0, %v684_v33  ;;  %6442 = vmatprep.mubr.msk.f32.mxu0 %vm883_vm0, %v511_v34  ;;  %v552_v29 = vmul.f32 0.125, %v424_v23  ;;  %v703_v34 = vld [vmem:[%s8026_s7 + $0x260] sm:$0xff]  ;;  %v713_v23 = vld [vmem:[%s8026_s7 + $0x2b0] sm:$0xff] }
  0x73   : > { %6498 = vmatprep.mubr.msk.f32.mxu1 %vm883_vm0, %v527_v35  ;;  %6443 = vmatmul.mubr.msk.f32.gmra.mxu0 %vm883_vm0, %v512_v36  ;;  %v719_v35 = vld [vmem:[%s8026_s7 + $0x2e0] sm:$0xff]  ;;  %v537_v36 = vmul.f32 0.125, %v409_v30  ;;  %v693_v30 = vld [vmem:[%s8026_s7 + $0x210] sm:$0xff] }
  0x74   : > { %6499 = vmatmul.mubr.msk.f32.gmra.mxu1 %vm883_vm0, %v528_v37  ;;  %6517 = vmatpush3.xpose.msk.msra.mxu0 %vm883_vm0, %v668_v32  ;;  %v410_v32 = vld [vmem:[%s8048_s10 + $0x138] sm:$0xff]  ;;  %v553_v37 = vmul.f32 0.125, %v425_v31  ;;  %v709_v31 = vld [vmem:[%s8026_s7 + $0x290] sm:$0xff] }
  0x75   : > { %6573 = vmatpush3.xpose.msk.msra.mxu1 %vm883_vm0, %v684_v33  ;;  %6518 = vmatprep.subr.msk.mxu0 %vm883_vm0, %v667_v42  ;;  %v426_v33 = vld [vmem:[%s8048_s10 + $0x1b8] sm:$0xff]  ;;  %v538_v38 = vmul.f32 0.125, %v410_v32  ;;  %v692_v32 = vld [vmem:[%s8026_s7 + $0x208] sm:$0xff] }
  0x76   : > { %6574 = vmatprep.subr.msk.mxu1 %vm883_vm0, %v683_v43  ;;  %6445 = vmatprep.mubr.msk.f32.mxu0 %vm883_vm0, %v513_v44  ;;  %v554_v39 = vmul.f32 0.125, %v426_v33  ;;  %v702_v44 = vld [vmem:[%s8026_s7 + $0x258] sm:$0xff]  ;;  %v708_v33 = vld [vmem:[%s8026_s7 + $0x288] sm:$0xff] }
  0x77   : > { %6501 = vmatprep.mubr.msk.f32.mxu1 %vm883_vm0, %v529_v45  ;;  %6446 = vmatmul.mubr.msk.f32.gmra.mxu0 %vm883_vm0, %v514_v46  ;;  %v718_v45 = vld [vmem:[%s8026_s7 + $0x2d8] sm:$0xff]  ;;  %v539_v46 = vmul.f32 0.125, %v411_v40 }
  0x78   : > { %6502 = vmatmul.mubr.msk.f32.gmra.mxu1 %vm883_vm0, %v530_v47  ;;  %6519 = vmatpush3.xpose.msk.msra.mxu0 %vm883_vm0, %v667_v42  ;;  %v412_v42 = vld [vmem:[%s8048_s10 + $0x148] sm:$0xff]  ;;  %v555_v47 = vmul.f32 0.125, %v427_v41  ;;  %v738_v40 = vld [vmem:[%s8026_s7 + $0x378] sm:$0xff] }
  0x79   : > { %6575 = vmatpush3.xpose.msk.msra.mxu1 %vm883_vm0, %v683_v43  ;;  %6520 = vmatprep.subr.msk.mxu0 %vm883_vm0, %v666_v50  ;;  %v428_v43 = vld [vmem:[%s8048_s10 + $0x1c8] sm:$0xff]  ;;  %v540_v48 = vmul.f32 0.125, %v412_v42  ;;  %v754_v41 = vld [vmem:[%s8026_s7 + $0x3f8] sm:$0xff] }
  0x7a   : > { %6576 = vmatprep.subr.msk.mxu1 %vm883_vm0, %v682_v51  ;;  %6536 = vmatprep.mubr.msk.f32.mxu0 %vm883_vm0, %v531_v52  ;;  %v556_v49 = vmul.f32 0.125, %v428_v43  ;;  %v414_v52 = vld [vmem:[%s8048_s10 + $0x158] sm:$0xff] }
  0x7b   : > { %6592 = vmatprep.mubr.msk.f32.mxu1 %vm883_vm0, %v547_v53  ;;  %v430_v53 = vld [vmem:[%s8048_s10 + $0x1d8] sm:$0xff] }
  0x7c   : > { %6521 = vmatpush3.xpose.msk.msra.mxu0 %vm883_vm0, %v666_v50  ;;  %v413_v50 = vld [vmem:[%s8048_s10 + $0x150] sm:$0xff] }
  0x7d   : > { %6577 = vmatpush3.xpose.msk.msra.mxu1 %vm883_vm0, %v682_v51  ;;  %6522 = vmatprep.subr.msk.mxu0 %vm883_vm0, %v665_v54  ;;  %v429_v51 = vld [vmem:[%s8048_s10 + $0x1d0] sm:$0xff] }
  0x7e   : > { %6578 = vmatprep.subr.msk.mxu1 %vm883_vm0, %v681_v55 }
  0x80   : > { %6523 = vmatpush3.xpose.msk.msra.mxu0 %vm883_vm0, %v665_v54  ;;  %v701_v54 = vld [vmem:[%s8026_s7 + $0x250] sm:$0xff] }
  0x81   : > { %6579 = vmatpush3.xpose.msk.msra.mxu1 %vm883_vm0, %v681_v55  ;;  %6524 = vmatprep.subr.msk.mxu0 %vm883_vm0, %v664_v56  ;;  %v717_v55 = vld [vmem:[%s8026_s7 + $0x2d0] sm:$0xff] }
  0x82   : > { %6580 = vmatprep.subr.msk.mxu1 %vm883_vm0, %v680_v57 }
  0x84   : > { %6525 = vmatpush3.xpose.msk.msra.mxu0 %vm883_vm0, %v664_v56  ;;  %v541_v56 = vmul.f32 0.125, %v413_v50 }
  0x85   : > { %6581 = vmatpush3.xpose.msk.msra.mxu1 %vm883_vm0, %v680_v57  ;;  %6526 = vmatprep.subr.msk.mxu0 %vm883_vm0, %v663_v58  ;;  %v557_v57 = vmul.f32 0.125, %v429_v51 }
  0x86   : > { %6582 = vmatprep.subr.msk.mxu1 %vm883_vm0, %v679_v59 }
  0x88   : > { %6527 = vmatpush3.xpose.msk.msra.mxu0 %vm883_vm0, %v663_v58  ;;  %v542_v58 = vmul.f32 0.125, %v414_v52  ;;  %v737_v52 = vld [vmem:[%s8026_s7 + $0x370] sm:$0xff] }
  0x89   : > { %6583 = vmatpush3.xpose.msk.msra.mxu1 %vm883_vm0, %v679_v59  ;;  %6528 = vmatprep.subr.msk.mxu0 %vm883_vm0, %v662_v60  ;;  %v558_v59 = vmul.f32 0.125, %v430_v53  ;;  %v753_v53 = vld [vmem:[%s8026_s7 + $0x3f0] sm:$0xff] }
  0x8a   : > { %6584 = vmatprep.subr.msk.mxu1 %vm883_vm0, %v678_v61 }
  0x8c   : > { %6529 = vmatpush3.xpose.msk.msra.mxu0 %vm883_vm0, %v662_v60  ;;  %v415_v60 = vld [vmem:[%s8048_s10 + $0x160] sm:$0xff] }
  0x8d   : > { %6585 = vmatpush3.xpose.msk.msra.mxu1 %vm883_vm0, %v678_v61  ;;  %6530 = vmatprep.subr.msk.mxu0 %vm883_vm0, %v661_v62  ;;  %v431_v61 = vld [vmem:[%s8048_s10 + $0x1e0] sm:$0xff] }
  0x8e   : > { %6586 = vmatprep.subr.msk.mxu1 %vm883_vm0, %v677_v63 }
  0x90   : > { %6531 = vmatpush3.xpose.msk.msra.mxu0 %vm883_vm0, %v661_v62  ;;  %v416_v62 = vld [vmem:[%s8048_s10 + $0x168] sm:$0xff] }
  0x91   : > { %6587 = vmatpush3.xpose.msk.msra.mxu1 %vm883_vm0, %v677_v63  ;;  %6532 = vmatprep.subr.msk.mxu0 %vm883_vm0, %v660_v0  ;;  %v432_v63 = vld [vmem:[%s8048_s10 + $0x1e8] sm:$0xff]  ;;  %v544_v4 = vmul.f32 0.125, %v416_v62 }
  0x92   : > { %6588 = vmatprep.subr.msk.mxu1 %vm883_vm0, %v676_v1  ;;  %v560_v5 = vmul.f32 0.125, %v432_v63  ;;  %v736_v62 = vld [vmem:[%s8026_s7 + $0x368] sm:$0xff] }
  0x93   : > { %v752_v63 = vld [vmem:[%s8026_s7 + $0x3e8] sm:$0xff] }
  0x94   : > { %6533 = vmatpush3.xpose.msk.msra.mxu0 %vm883_vm0, %v660_v0  ;;  %v700_v0 = vld [vmem:[%s8026_s7 + $0x248] sm:$0xff] }
  0x95   : > { %6589 = vmatpush3.xpose.msk.msra.mxu1 %vm883_vm0, %v676_v1  ;;  %6534 = vmatprep.subr.msk.mxu0 %vm883_vm0, %v659_v2  ;;  %v716_v1 = vld [vmem:[%s8026_s7 + $0x2c8] sm:$0xff] }
  0x96   : > { %6590 = vmatprep.subr.msk.mxu1 %vm883_vm0, %v675_v3 }
  0x98   : > { %6535 = vmatpush3.xpose.msk.msra.mxu0 %vm883_vm0, %v659_v2  ;;  %v543_v2 = vmul.f32 0.125, %v415_v60 }
  0x99   : > { %6591 = vmatpush3.xpose.msk.msra.mxu1 %vm883_vm0, %v675_v3  ;;  %6616 = vmatprep.subr.msk.mxu0 %vm883_vm0, %v706_v6  ;;  %v559_v3 = vmul.f32 0.125, %v431_v61 }
  0x9a   : > { %6672 = vmatprep.subr.msk.mxu1 %vm883_vm0, %v722_v7 }
  0x9b   : > { %6537 = vmatmul.mubr.msk.f32.vlgmr.msra.gmra.mxu0 %vm883_vm0, %v532_v8  ;;  %v418_v8 = vld [vmem:[%s8048_s10 + $0x178] sm:$0xff] }
  0x9c   : > { %6593 = vmatmul.mubr.msk.f32.vlgmr.msra.gmra.mxu1 %vm883_vm0, %v548_v9  ;;  %6617 = vmatpush3.xpose.msk.msra.mxu0 %vm883_vm0, %v706_v6  ;;  %v417_v6 = vld [vmem:[%s8048_s10 + $0x170] sm:$0xff]  ;;  %v434_v9 = vld [vmem:[%s8048_s10 + $0x1f8] sm:$0xff] }
  0x9d   : > { %6673 = vmatpush3.xpose.msk.msra.mxu1 %vm883_vm0, %v722_v7  ;;  %6618 = vmatprep.subr.msk.mxu0 %vm883_vm0, %v705_v14  ;;  %v433_v7 = vld [vmem:[%s8048_s10 + $0x1f0] sm:$0xff]  ;;  %v545_v12 = vmul.f32 0.125, %v417_v6 }
  0x9e   : > { %6674 = vmatprep.subr.msk.mxu1 %vm883_vm0, %v721_v15  ;;  %6539 = vmatprep.mubr.msk.f32.mxu0 %vm883_vm0, %v533_v16  ;;  %v561_v13 = vmul.f32 0.125, %v433_v7  ;;  %v435_v16 = vld [vmem:[%s8048_s10 + $0x200] sm:$0xff] }
  0x9f   : > { %6595 = vmatprep.mubr.msk.f32.mxu1 %vm883_vm0, %v549_v17  ;;  %6540 = vmatmul.mubr.msk.f32.gmra.mxu0 %vm883_vm0, %v534_v18  ;;  %v451_v17 = vld [vmem:[%s8048_s10 + $0x280] sm:$0xff]  ;;  %v698_v18 = vld [vmem:[%s8026_s7 + $0x238] sm:$0xff]  ;;  %v563_v20 = vmul.f32 0.125, %v435_v16 }
  0xa0   : > { %6596 = vmatmul.mubr.msk.f32.gmra.mxu1 %vm883_vm0, %v550_v19  ;;  %6619 = vmatpush3.xpose.msk.msra.mxu0 %vm883_vm0, %v705_v14  ;;  %v546_v14 = vmul.f32 0.125, %v418_v8  ;;  %v714_v19 = vld [vmem:[%s8026_s7 + $0x2b8] sm:$0xff]  ;;  %v579_v21 = vmul.f32 0.125, %v451_v17  ;;  %v735_v8 = vld [vmem:[%s8026_s7 + $0x360] sm:$0xff] }
  0xa1   : > { %6675 = vmatpush3.xpose.msk.msra.mxu1 %vm883_vm0, %v721_v15  ;;  %6620 = vmatprep.subr.msk.mxu0 %vm883_vm0, %v704_v24  ;;  %v562_v15 = vmul.f32 0.125, %v434_v9  ;;  %v751_v9 = vld [vmem:[%s8026_s7 + $0x3e0] sm:$0xff] }
  0xa2   : > { %6676 = vmatprep.subr.msk.mxu1 %vm883_vm0, %v720_v25  ;;  %6542 = vmatprep.mubr.msk.f32.mxu0 %vm883_vm0, %v535_v26  ;;  %v695_v26 = vld [vmem:[%s8026_s7 + $0x220] sm:$0xff] }
  0xa3   : > { %6598 = vmatprep.mubr.msk.f32.mxu1 %vm883_vm0, %v551_v27  ;;  %6543 = vmatmul.mubr.msk.f32.gmra.mxu0 %vm883_vm0, %v536_v28  ;;  %v711_v27 = vld [vmem:[%s8026_s7 + $0x2a0] sm:$0xff]  ;;  %v694_v28 = vld [vmem:[%s8026_s7 + $0x218] sm:$0xff] }
  0xa4   : > { %6599 = vmatmul.mubr.msk.f32.gmra.mxu1 %vm883_vm0, %v552_v29  ;;  %6621 = vmatpush3.xpose.msk.msra.mxu0 %vm883_vm0, %v704_v24  ;;  %v696_v24 = vld [vmem:[%s8026_s7 + $0x228] sm:$0xff]  ;;  %v710_v29 = vld [vmem:[%s8026_s7 + $0x298] sm:$0xff] }
  0xa5   : > { %6677 = vmatpush3.xpose.msk.msra.mxu1 %vm883_vm0, %v720_v25  ;;  %6622 = vmatprep.subr.msk.mxu0 %vm883_vm0, %v703_v34  ;;  %v712_v25 = vld [vmem:[%s8026_s7 + $0x2a8] sm:$0xff] }
  0xa6   : > { %6678 = vmatprep.subr.msk.mxu1 %vm883_vm0, %v719_v35  ;;  %6545 = vmatprep.mubr.msk.f32.mxu0 %vm883_vm0, %v537_v36  ;;  %v436_v36 = vld [vmem:[%s8048_s10 + $0x208] sm:$0xff] }
  0xa7   : > { %6601 = vmatprep.mubr.msk.f32.mxu1 %vm883_vm0, %v553_v37  ;;  %6546 = vmatmul.mubr.msk.f32.gmra.mxu0 %vm883_vm0, %v538_v38  ;;  %v452_v37 = vld [vmem:[%s8048_s10 + $0x288] sm:$0xff]  ;;  %v437_v38 = vld [vmem:[%s8048_s10 + $0x210] sm:$0xff]  ;;  %v564_v42 = vmul.f32 0.125, %v436_v36 }
  0xa8   : > { %6602 = vmatmul.mubr.msk.f32.gmra.mxu1 %vm883_vm0, %v554_v39  ;;  %6623 = vmatpush3.xpose.msk.msra.mxu0 %vm883_vm0, %v703_v34  ;;  %v691_v34 = vld [vmem:[%s8026_s7 + $0x200] sm:$0xff]  ;;  %v453_v39 = vld [vmem:[%s8048_s10 + $0x290] sm:$0xff]  ;;  %v580_v43 = vmul.f32 0.125, %v452_v37 }
  0xa9   : > { %6679 = vmatpush3.xpose.msk.msra.mxu1 %vm883_vm0, %v719_v35  ;;  %6624 = vmatprep.subr.msk.mxu0 %vm883_vm0, %v702_v44  ;;  %v707_v35 = vld [vmem:[%s8026_s7 + $0x280] sm:$0xff] }
  0xaa   : > { %6680 = vmatprep.subr.msk.mxu1 %vm883_vm0, %v718_v45  ;;  %6548 = vmatprep.mubr.msk.f32.mxu0 %vm883_vm0, %v539_v46  ;;  %v438_v46 = vld [vmem:[%s8048_s10 + $0x218] sm:$0xff] }
  0xab   : > { %6604 = vmatprep.mubr.msk.f32.mxu1 %vm883_vm0, %v555_v47  ;;  %6549 = vmatmul.mubr.msk.f32.gmra.mxu0 %vm883_vm0, %v540_v48  ;;  %v454_v47 = vld [vmem:[%s8048_s10 + $0x298] sm:$0xff]  ;;  %v439_v48 = vld [vmem:[%s8048_s10 + $0x220] sm:$0xff]  ;;  %v566_v50 = vmul.f32 0.125, %v438_v46 }
  0xac   : > { %6605 = vmatmul.mubr.msk.f32.gmra.mxu1 %vm883_vm0, %v556_v49  ;;  %6625 = vmatpush3.xpose.msk.msra.mxu0 %vm883_vm0, %v702_v44  ;;  %v565_v44 = vmul.f32 0.125, %v437_v38  ;;  %v455_v49 = vld [vmem:[%s8048_s10 + $0x2a0] sm:$0xff]  ;;  %v582_v51 = vmul.f32 0.125, %v454_v47  ;;  %v732_v38 = vld [vmem:[%s8026_s7 + $0x348] sm:$0xff] }
  0xad   : > { %6681 = vmatpush3.xpose.msk.msra.mxu1 %vm883_vm0, %v718_v45  ;;  %6626 = vmatprep.subr.msk.mxu0 %vm883_vm0, %v701_v54  ;;  %v581_v45 = vmul.f32 0.125, %v453_v39  ;;  %v748_v39 = vld [vmem:[%s8026_s7 + $0x3c8] sm:$0xff] }
  0xae   : > { %6682 = vmatprep.subr.msk.mxu1 %vm883_vm0, %v717_v55  ;;  %6551 = vmatprep.mubr.msk.f32.mxu0 %vm883_vm0, %v541_v56  ;;  %v440_v56 = vld [vmem:[%s8048_s10 + $0x228] sm:$0xff] }
  0xaf   : > { %6607 = vmatprep.mubr.msk.f32.mxu1 %vm883_vm0, %v557_v57  ;;  %6552 = vmatmul.mubr.msk.f32.gmra.mxu0 %vm883_vm0, %v542_v58  ;;  %v456_v57 = vld [vmem:[%s8048_s10 + $0x2a8] sm:$0xff]  ;;  %v441_v58 = vld [vmem:[%s8048_s10 + $0x230] sm:$0xff]  ;;  %v568_v60 = vmul.f32 0.125, %v440_v56 }
  0xb0   : > { %6608 = vmatmul.mubr.msk.f32.gmra.mxu1 %vm883_vm0, %v558_v59  ;;  %6627 = vmatpush3.xpose.msk.msra.mxu0 %vm883_vm0, %v701_v54  ;;  %v567_v54 = vmul.f32 0.125, %v439_v48  ;;  %v457_v59 = vld [vmem:[%s8048_s10 + $0x2b0] sm:$0xff]  ;;  %v584_v61 = vmul.f32 0.125, %v456_v57  ;;  %v731_v48 = vld [vmem:[%s8026_s7 + $0x340] sm:$0xff]  ;;  %v728_v56 = vld [vmem:[%s8026_s7 + $0x328] sm:$0xff] }
  0xb1   : > { %6683 = vmatpush3.xpose.msk.msra.mxu1 %vm883_vm0, %v717_v55  ;;  %6628 = vmatprep.subr.msk.mxu0 %vm883_vm0, %v700_v0  ;;  %v583_v55 = vmul.f32 0.125, %v455_v49  ;;  %v747_v49 = vld [vmem:[%s8026_s7 + $0x3c0] sm:$0xff]  ;;  %v744_v57 = vld [vmem:[%s8026_s7 + $0x3a8] sm:$0xff] }
  0xb2   : > { %6684 = vmatprep.subr.msk.mxu1 %vm883_vm0, %v716_v1  ;;  %6554 = vmatprep.mubr.msk.f32.mxu0 %vm883_vm0, %v543_v2  ;;  %v442_v2 = vld [vmem:[%s8048_s10 + $0x238] sm:$0xff] }
  0xb3   : > { %6610 = vmatprep.mubr.msk.f32.mxu1 %vm883_vm0, %v559_v3  ;;  %6555 = vmatmul.mubr.msk.f32.gmra.mxu0 %vm883_vm0, %v544_v4  ;;  %v458_v3 = vld [vmem:[%s8048_s10 + $0x2b8] sm:$0xff]  ;;  %v443_v4 = vld [vmem:[%s8048_s10 + $0x240] sm:$0xff]  ;;  %v570_v6 = vmul.f32 0.125, %v442_v2 }
  0xb4   : > { %6611 = vmatmul.mubr.msk.f32.gmra.mxu1 %vm883_vm0, %v560_v5  ;;  %6629 = vmatpush3.xpose.msk.msra.mxu0 %vm883_vm0, %v700_v0  ;;  %v569_v0 = vmul.f32 0.125, %v441_v58  ;;  %v459_v5 = vld [vmem:[%s8048_s10 + $0x2c0] sm:$0xff]  ;;  %v586_v7 = vmul.f32 0.125, %v458_v3 }
  0xb5   : > { %6685 = vmatpush3.xpose.msk.msra.mxu1 %vm883_vm0, %v716_v1  ;;  %6630 = vmatprep.subr.msk.mxu0 %vm883_vm0, %v699_v10  ;;  %v585_v1 = vmul.f32 0.125, %v457_v59  ;;  %v727_v58 = vld [vmem:[%s8026_s7 + $0x320] sm:$0xff] }
  0xb6   : > { %6686 = vmatprep.subr.msk.mxu1 %vm883_vm0, %v715_v11  ;;  %6557 = vmatprep.mubr.msk.f32.mxu0 %vm883_vm0, %v545_v12  ;;  %v444_v12 = vld [vmem:[%s8048_s10 + $0x248] sm:$0xff]  ;;  %v743_v59 = vld [vmem:[%s8026_s7 + $0x3a0] sm:$0xff] }
  0xb7   : > { %6613 = vmatprep.mubr.msk.f32.mxu1 %vm883_vm0, %v561_v13  ;;  %6558 = vmatmul.mubr.msk.f32.gmra.mxu0 %vm883_vm0, %v546_v14  ;;  %v460_v13 = vld [vmem:[%s8048_s10 + $0x2c8] sm:$0xff]  ;;  %v445_v14 = vld [vmem:[%s8048_s10 + $0x250] sm:$0xff]  ;;  %v572_v16 = vmul.f32 0.125, %v444_v12  ;;  %v723_v2 = vld [vmem:[%s8026_s7 + $0x300] sm:$0xff] }
  0xb8   : > { %6614 = vmatmul.mubr.msk.f32.gmra.mxu1 %vm883_vm0, %v562_v15  ;;  %6631 = vmatpush3.xpose.msk.msra.mxu0 %vm883_vm0, %v699_v10  ;;  %v571_v10 = vmul.f32 0.125, %v443_v4  ;;  %v461_v15 = vld [vmem:[%s8048_s10 + $0x2d0] sm:$0xff]  ;;  %v588_v17 = vmul.f32 0.125, %v460_v13  ;;  %v739_v3 = vld [vmem:[%s8026_s7 + $0x380] sm:$0xff]  ;;  %v468_v4 = vld [vmem:[%s8048_s10 + $0x308] sm:$0xff] }
  0xb9   : > { %6687 = vmatpush3.xpose.msk.msra.mxu1 %vm883_vm0, %v715_v11  ;;  %6632 = vmatprep.subr.msk.mxu0 %vm883_vm0, %v698_v18  ;;  %v587_v11 = vmul.f32 0.125, %v459_v5  ;;  %v484_v5 = vld [vmem:[%s8048_s10 + $0x388] sm:$0xff]  ;;  %v486_v13 = vld [vmem:[%s8048_s10 + $0x398] sm:$0xff] }
  0xba   : > { %6688 = vmatprep.subr.msk.mxu1 %vm883_vm0, %v714_v19  ;;  %6648 = vmatprep.mubr.msk.f32.mxu0 %vm883_vm0, %v563_v20  ;;  %v573_v20 = vmul.f32 0.125, %v445_v14  ;;  %v471_v14 = vld [vmem:[%s8048_s10 + $0x320] sm:$0xff] }
  0xbb   : > { %6704 = vmatprep.mubr.msk.f32.mxu1 %vm883_vm0, %v579_v21  ;;  %v589_v21 = vmul.f32 0.125, %v461_v15 }
  0xbc   : > { %6633 = vmatpush3.xpose.msk.msra.mxu0 %vm883_vm0, %v698_v18  ;;  %v734_v18 = vld [vmem:[%s8026_s7 + $0x358] sm:$0xff] }
  0xbd   : > { %6689 = vmatpush3.xpose.msk.msra.mxu1 %vm883_vm0, %v714_v19  ;;  %6634 = vmatprep.subr.msk.mxu0 %vm883_vm0, %v697_v22  ;;  %v750_v19 = vld [vmem:[%s8026_s7 + $0x3d8] sm:$0xff] }
  0xbe   : > { %6690 = vmatprep.subr.msk.mxu1 %vm883_vm0, %v713_v23 }
  0xc0   : > { %6635 = vmatpush3.xpose.msk.msra.mxu0 %vm883_vm0, %v697_v22  ;;  %v446_v22 = vld [vmem:[%s8048_s10 + $0x258] sm:$0xff] }
  0xc1   : > { %6691 = vmatpush3.xpose.msk.msra.mxu1 %vm883_vm0, %v713_v23  ;;  %6636 = vmatprep.subr.msk.mxu0 %vm883_vm0, %v696_v24  ;;  %v462_v23 = vld [vmem:[%s8048_s10 + $0x2d8] sm:$0xff] }
  0xc2   : > { %6692 = vmatprep.subr.msk.mxu1 %vm883_vm0, %v712_v25 }
  0xc4   : > { %6637 = vmatpush3.xpose.msk.msra.mxu0 %vm883_vm0, %v696_v24  ;;  %v447_v24 = vld [vmem:[%s8048_s10 + $0x260] sm:$0xff] }
  0xc5   : > { %6693 = vmatpush3.xpose.msk.msra.mxu1 %vm883_vm0, %v712_v25  ;;  %6638 = vmatprep.subr.msk.mxu0 %vm883_vm0, %v695_v26  ;;  %v463_v25 = vld [vmem:[%s8048_s10 + $0x2e0] sm:$0xff] }
  0xc6   : > { %6694 = vmatprep.subr.msk.mxu1 %vm883_vm0, %v711_v27 }
  0xc8   : > { %6639 = vmatpush3.xpose.msk.msra.mxu0 %vm883_vm0, %v695_v26  ;;  %v574_v26 = vmul.f32 0.125, %v446_v22  ;;  %v599_v22 = vmul.f32 0.125, %v471_v14 }
  0xc9   : > { %6695 = vmatpush3.xpose.msk.msra.mxu1 %vm883_vm0, %v711_v27  ;;  %6640 = vmatprep.subr.msk.mxu0 %vm883_vm0, %v694_v28  ;;  %v590_v27 = vmul.f32 0.125, %v462_v23  ;;  %v472_v23 = vld [vmem:[%s8048_s10 + $0x328] sm:$0xff] }
  0xca   : > { %6696 = vmatprep.subr.msk.mxu1 %vm883_vm0, %v710_v29 }
  0xcc   : > { %6641 = vmatpush3.xpose.msk.msra.mxu0 %vm883_vm0, %v694_v28  ;;  %v733_v28 = vld [vmem:[%s8026_s7 + $0x350] sm:$0xff] }
  0xcd   : > { %6697 = vmatpush3.xpose.msk.msra.mxu1 %vm883_vm0, %v710_v29  ;;  %6642 = vmatprep.subr.msk.mxu0 %vm883_vm0, %v693_v30  ;;  %v749_v29 = vld [vmem:[%s8026_s7 + $0x3d0] sm:$0xff] }
  0xce   : > { %6698 = vmatprep.subr.msk.mxu1 %vm883_vm0, %v709_v31 }
  0xd0   : > { %6643 = vmatpush3.xpose.msk.msra.mxu0 %vm883_vm0, %v693_v30  ;;  %v575_v30 = vmul.f32 0.125, %v447_v24 }
  0xd1   : > { %6699 = vmatpush3.xpose.msk.msra.mxu1 %vm883_vm0, %v709_v31  ;;  %6644 = vmatprep.subr.msk.mxu0 %vm883_vm0, %v692_v32  ;;  %v591_v31 = vmul.f32 0.125, %v463_v25  ;;  %v488_v25 = vld [vmem:[%s8048_s10 + $0x3a8] sm:$0xff] }
  0xd2   : > { %6700 = vmatprep.subr.msk.mxu1 %vm883_vm0, %v708_v33 }
  0xd4   : > { %6645 = vmatpush3.xpose.msk.msra.mxu0 %vm883_vm0, %v692_v32  ;;  %v448_v32 = vld [vmem:[%s8048_s10 + $0x268] sm:$0xff] }
  0xd5   : > { %6701 = vmatpush3.xpose.msk.msra.mxu1 %vm883_vm0, %v708_v33  ;;  %6646 = vmatprep.subr.msk.mxu0 %vm883_vm0, %v691_v34  ;;  %v464_v33 = vld [vmem:[%s8048_s10 + $0x2e8] sm:$0xff]  ;;  %v576_v36 = vmul.f32 0.125, %v448_v32  ;;  %v474_v32 = vld [vmem:[%s8048_s10 + $0x338] sm:$0xff] }
  0xd6   : > { %6702 = vmatprep.subr.msk.mxu1 %vm883_vm0, %v707_v35  ;;  %v592_v37 = vmul.f32 0.125, %v464_v33 }
  0xd8   : > { %6647 = vmatpush3.xpose.msk.msra.mxu0 %vm883_vm0, %v691_v34  ;;  %v449_v34 = vld [vmem:[%s8048_s10 + $0x270] sm:$0xff] }
  0xd9   : > { %6703 = vmatpush3.xpose.msk.msra.mxu1 %vm883_vm0, %v707_v35  ;;  %6728 = vmatprep.subr.msk.mxu0 %vm883_vm0, %v738_v40  ;;  %v465_v35 = vld [vmem:[%s8048_s10 + $0x2f0] sm:$0xff] }
  0xda   : > { %6784 = vmatprep.subr.msk.mxu1 %vm883_vm0, %v754_v41 }
  0xdb   : > { %6649 = vmatmul.mubr.msk.f32.vlgmr.msra.gmra.mxu0 %vm883_vm0, %v564_v42  ;;  %v450_v42 = vld [vmem:[%s8048_s10 + $0x278] sm:$0xff] }
  0xdc   : > { %6705 = vmatmul.mubr.msk.f32.vlgmr.msra.gmra.mxu1 %vm883_vm0, %v580_v43  ;;  %6651 = vmatprep.mubr.msk.f32.mxu0 %vm883_vm0, %v565_v44  ;;  %v466_v43 = vld [vmem:[%s8048_s10 + $0x2f8] sm:$0xff]  ;;  %v467_v44 = vld [vmem:[%s8048_s10 + $0x300] sm:$0xff]  ;;  %v578_v46 = vmul.f32 0.125, %v450_v42  ;;  %v476_v42 = vld [vmem:[%s8048_s10 + $0x348] sm:$0xff] }
  0xdd   : > { %6707 = vmatprep.mubr.msk.f32.mxu1 %vm883_vm0, %v581_v45  ;;  %6729 = vmatpush3.xpose.msk.msra.mxu0 %vm883_vm0, %v738_v40  ;;  %v577_v40 = vmul.f32 0.125, %v449_v34  ;;  %v483_v45 = vld [vmem:[%s8048_s10 + $0x380] sm:$0xff]  ;;  %v594_v47 = vmul.f32 0.125, %v466_v43  ;;  %v490_v34 = vld [vmem:[%s8048_s10 + $0x3b8] sm:$0xff] }
  0xde   : > { %6785 = vmatpush3.xpose.msk.msra.mxu1 %vm883_vm0, %v754_v41  ;;  %6730 = vmatprep.subr.msk.mxu0 %vm883_vm0, %v737_v52  ;;  %v593_v41 = vmul.f32 0.125, %v465_v35  ;;  %v475_v35 = vld [vmem:[%s8048_s10 + $0x340] sm:$0xff] }
  0xdf   : > { %6786 = vmatprep.subr.msk.mxu1 %vm883_vm0, %v753_v53  ;;  %6652 = vmatmul.mubr.msk.f32.gmra.mxu0 %vm883_vm0, %v566_v50  ;;  %v595_v50 = vmul.f32 0.125, %v467_v44  ;;  %v492_v44 = vld [vmem:[%s8048_s10 + $0x3c8] sm:$0xff] }
  0xe0   : > { %6708 = vmatmul.mubr.msk.f32.gmra.mxu1 %vm883_vm0, %v582_v51  ;;  %6654 = vmatprep.mubr.msk.f32.mxu0 %vm883_vm0, %v567_v54  ;;  %v611_v51 = vmul.f32 0.125, %v483_v45  ;;  %v729_v54 = vld [vmem:[%s8026_s7 + $0x330] sm:$0xff] }
  0xe1   : > { %6710 = vmatprep.mubr.msk.f32.mxu1 %vm883_vm0, %v583_v55  ;;  %6731 = vmatpush3.xpose.msk.msra.mxu0 %vm883_vm0, %v737_v52  ;;  %v730_v52 = vld [vmem:[%s8026_s7 + $0x338] sm:$0xff]  ;;  %v745_v55 = vld [vmem:[%s8026_s7 + $0x3b0] sm:$0xff] }
  0xe2   : > { %6787 = vmatpush3.xpose.msk.msra.mxu1 %vm883_vm0, %v753_v53  ;;  %6732 = vmatprep.subr.msk.mxu0 %vm883_vm0, %v736_v62  ;;  %v746_v53 = vld [vmem:[%s8026_s7 + $0x3b8] sm:$0xff]  ;;  %v477_v45 = vld [vmem:[%s8048_s10 + $0x350] sm:$0xff] }
  0xe3   : > { %6788 = vmatprep.subr.msk.mxu1 %vm883_vm0, %v752_v63  ;;  %6655 = vmatmul.mubr.msk.f32.gmra.mxu0 %vm883_vm0, %v568_v60  ;;  %v726_v60 = vld [vmem:[%s8026_s7 + $0x318] sm:$0xff] }
  0xe4   : > { %6711 = vmatmul.mubr.msk.f32.gmra.mxu1 %vm883_vm0, %v584_v61  ;;  %6657 = vmatprep.mubr.msk.f32.mxu0 %vm883_vm0, %v569_v0  ;;  %v742_v61 = vld [vmem:[%s8026_s7 + $0x398] sm:$0xff]  ;;  %v724_v0 = vld [vmem:[%s8026_s7 + $0x308] sm:$0xff] }
  0xe5   : > { %6713 = vmatprep.mubr.msk.f32.mxu1 %vm883_vm0, %v585_v1  ;;  %6733 = vmatpush3.xpose.msk.msra.mxu0 %vm883_vm0, %v736_v62  ;;  %v725_v62 = vld [vmem:[%s8026_s7 + $0x310] sm:$0xff]  ;;  %v740_v1 = vld [vmem:[%s8026_s7 + $0x388] sm:$0xff] }
  0xe6   : > { %6789 = vmatpush3.xpose.msk.msra.mxu1 %vm883_vm0, %v752_v63  ;;  %6734 = vmatprep.subr.msk.mxu0 %vm883_vm0, %v735_v8  ;;  %v741_v63 = vld [vmem:[%s8026_s7 + $0x390] sm:$0xff] }
  0xe7   : > { %6790 = vmatprep.subr.msk.mxu1 %vm883_vm0, %v751_v9  ;;  %6658 = vmatmul.mubr.msk.f32.gmra.mxu0 %vm883_vm0, %v570_v6  ;;  %v469_v6 = vld [vmem:[%s8048_s10 + $0x310] sm:$0xff] }
  0xe8   : > { %6714 = vmatmul.mubr.msk.f32.gmra.mxu1 %vm883_vm0, %v586_v7  ;;  %6660 = vmatprep.mubr.msk.f32.mxu0 %vm883_vm0, %v571_v10  ;;  %v485_v7 = vld [vmem:[%s8048_s10 + $0x390] sm:$0xff]  ;;  %v597_v10 = vmul.f32 0.125, %v469_v6 }
  0xe9   : > { %6716 = vmatprep.mubr.msk.f32.mxu1 %vm883_vm0, %v587_v11  ;;  %6735 = vmatpush3.xpose.msk.msra.mxu0 %vm883_vm0, %v735_v8  ;;  %v596_v8 = vmul.f32 0.125, %v468_v4  ;;  %v470_v11 = vld [vmem:[%s8048_s10 + $0x318] sm:$0xff]  ;;  %v613_v12 = vmul.f32 0.125, %v485_v7 }
  0xea   : > { %6791 = vmatpush3.xpose.msk.msra.mxu1 %vm883_vm0, %v751_v9  ;;  %6736 = vmatprep.subr.msk.mxu0 %vm883_vm0, %v734_v18  ;;  %v612_v9 = vmul.f32 0.125, %v484_v5 }
  0xeb   : > { %6792 = vmatprep.subr.msk.mxu1 %vm883_vm0, %v750_v19  ;;  %6661 = vmatmul.mubr.msk.f32.gmra.mxu0 %vm883_vm0, %v572_v16 }
  0xec   : > { %6717 = vmatmul.mubr.msk.f32.gmra.mxu1 %vm883_vm0, %v588_v17  ;;  %6663 = vmatprep.mubr.msk.f32.mxu0 %vm883_vm0, %v573_v20  ;;  %v487_v17 = vld [vmem:[%s8048_s10 + $0x3a0] sm:$0xff] }
  0xed   : > { %6719 = vmatprep.mubr.msk.f32.mxu1 %vm883_vm0, %v589_v21  ;;  %6737 = vmatpush3.xpose.msk.msra.mxu0 %vm883_vm0, %v734_v18  ;;  %v598_v18 = vmul.f32 0.125, %v470_v11  ;;  %v614_v21 = vmul.f32 0.125, %v486_v13  ;;  %v615_v24 = vmul.f32 0.125, %v487_v17 }
  0xee   : > { %6793 = vmatpush3.xpose.msk.msra.mxu1 %vm883_vm0, %v750_v19  ;;  %6738 = vmatprep.subr.msk.mxu0 %vm883_vm0, %v733_v28 }
  0xef   : > { %6794 = vmatprep.subr.msk.mxu1 %vm883_vm0, %v749_v29  ;;  %6664 = vmatmul.mubr.msk.f32.gmra.mxu0 %vm883_vm0, %v574_v26  ;;  %v473_v26 = vld [vmem:[%s8048_s10 + $0x330] sm:$0xff] }
  0xf0   : > { %6720 = vmatmul.mubr.msk.f32.gmra.mxu1 %vm883_vm0, %v590_v27  ;;  %6666 = vmatprep.mubr.msk.f32.mxu0 %vm883_vm0, %v575_v30  ;;  %v489_v27 = vld [vmem:[%s8048_s10 + $0x3b0] sm:$0xff]  ;;  %v616_v30 = vmul.f32 0.125, %v488_v25 }
  0xf1   : > { %6722 = vmatprep.mubr.msk.f32.mxu1 %vm883_vm0, %v591_v31  ;;  %6739 = vmatpush3.xpose.msk.msra.mxu0 %vm883_vm0, %v733_v28  ;;  %v600_v28 = vmul.f32 0.125, %v472_v23  ;;  %v601_v31 = vmul.f32 0.125, %v473_v26  ;;  %v617_v33 = vmul.f32 0.125, %v489_v27 }
  0xf2   : > { %6795 = vmatpush3.xpose.msk.msra.mxu1 %vm883_vm0, %v749_v29  ;;  %6740 = vmatprep.subr.msk.mxu0 %vm883_vm0, %v732_v38 }
  0xf3   : > { %6796 = vmatprep.subr.msk.mxu1 %vm883_vm0, %v748_v39  ;;  %6667 = vmatmul.mubr.msk.f32.gmra.mxu0 %vm883_vm0, %v576_v36 }
  0xf4   : > { %6723 = vmatmul.mubr.msk.f32.gmra.mxu1 %vm883_vm0, %v592_v37  ;;  %6669 = vmatprep.mubr.msk.f32.mxu0 %vm883_vm0, %v577_v40  ;;  %v491_v37 = vld [vmem:[%s8048_s10 + $0x3c0] sm:$0xff]  ;;  %v618_v40 = vmul.f32 0.125, %v490_v34 }
  0xf5   : > { %6725 = vmatprep.mubr.msk.f32.mxu1 %vm883_vm0, %v593_v41  ;;  %6741 = vmatpush3.xpose.msk.msra.mxu0 %vm883_vm0, %v732_v38  ;;  %v602_v38 = vmul.f32 0.125, %v474_v32  ;;  %v603_v41 = vmul.f32 0.125, %v475_v35  ;;  %v619_v43 = vmul.f32 0.125, %v491_v37 }
  0xf6   : > { %6797 = vmatpush3.xpose.msk.msra.mxu1 %vm883_vm0, %v748_v39  ;;  %6742 = vmatprep.subr.msk.mxu0 %vm883_vm0, %v731_v48 }
  0xf7   : > { %6798 = vmatprep.subr.msk.mxu1 %vm883_vm0, %v747_v49  ;;  %6670 = vmatmul.mubr.msk.f32.gmra.mxu0 %vm883_vm0, %v578_v46 }
  0xf8   : > { %6726 = vmatmul.mubr.msk.f32.gmra.mxu1 %vm883_vm0, %v594_v47  ;;  %6760 = vmatprep.mubr.msk.f32.mxu0 %vm883_vm0, %v595_v50  ;;  %v493_v47 = vld [vmem:[%s8048_s10 + $0x3d0] sm:$0xff]  ;;  %v620_v50 = vmul.f32 0.125, %v492_v44 }
  0xf9   : > { %6816 = vmatprep.mubr.msk.f32.mxu1 %vm883_vm0, %v611_v51  ;;  %6743 = vmatpush3.xpose.msk.msra.mxu0 %vm883_vm0, %v731_v48  ;;  %v604_v48 = vmul.f32 0.125, %v476_v42  ;;  %v605_v51 = vmul.f32 0.125, %v477_v45 }
  0xfa   : > { %6799 = vmatpush3.xpose.msk.msra.mxu1 %vm883_vm0, %v747_v49  ;;  %6744 = vmatprep.subr.msk.mxu0 %vm883_vm0, %v730_v52 }
  0xfb   : > { %6800 = vmatprep.subr.msk.mxu1 %vm883_vm0, %v746_v53 }
  0xfd   : > { %6745 = vmatpush3.xpose.msk.msra.mxu0 %vm883_vm0, %v730_v52  ;;  %v478_v52 = vld [vmem:[%s8048_s10 + $0x358] sm:$0xff] }
  0xfe   : > { %6801 = vmatpush3.xpose.msk.msra.mxu1 %vm883_vm0, %v746_v53  ;;  %6746 = vmatprep.subr.msk.mxu0 %vm883_vm0, %v729_v54  ;;  %v621_v53 = vmul.f32 0.125, %v493_v47 }
  0xff   : > { %6802 = vmatprep.subr.msk.mxu1 %vm883_vm0, %v745_v55 }
 0x101   : > { %6747 = vmatpush3.xpose.msk.msra.mxu0 %vm883_vm0, %v729_v54  ;;  %v494_v54 = vld [vmem:[%s8048_s10 + $0x3d8] sm:$0xff] }
 0x102   : > { %6803 = vmatpush3.xpose.msk.msra.mxu1 %vm883_vm0, %v745_v55  ;;  %6748 = vmatprep.subr.msk.mxu0 %vm883_vm0, %v728_v56  ;;  %v479_v55 = vld [vmem:[%s8048_s10 + $0x360] sm:$0xff] }
 0x103   : > { %6804 = vmatprep.subr.msk.mxu1 %vm883_vm0, %v744_v57 }
 0x105   : > { %6749 = vmatpush3.xpose.msk.msra.mxu0 %vm883_vm0, %v728_v56 }
 0x106   : > { %6805 = vmatpush3.xpose.msk.msra.mxu1 %vm883_vm0, %v744_v57  ;;  %6750 = vmatprep.subr.msk.mxu0 %vm883_vm0, %v727_v58  ;;  %v495_v57 = vld [vmem:[%s8048_s10 + $0x3e0] sm:$0xff] }
 0x107   : > { %6806 = vmatprep.subr.msk.mxu1 %vm883_vm0, %v743_v59 }
 0x109   : > { %6751 = vmatpush3.xpose.msk.msra.mxu0 %vm883_vm0, %v727_v58  ;;  %v606_v58 = vmul.f32 0.125, %v478_v52 }
 0x10a   : > { %6807 = vmatpush3.xpose.msk.msra.mxu1 %vm883_vm0, %v743_v59  ;;  %6752 = vmatprep.subr.msk.mxu0 %vm883_vm0, %v726_v60  ;;  %v622_v59 = vmul.f32 0.125, %v494_v54 }
 0x10b   : > { %6808 = vmatprep.subr.msk.mxu1 %vm883_vm0, %v742_v61 }
 0x10d   : > { %6753 = vmatpush3.xpose.msk.msra.mxu0 %vm883_vm0, %v726_v60  ;;  %v607_v60 = vmul.f32 0.125, %v479_v55 }
 0x10e   : > { %6809 = vmatpush3.xpose.msk.msra.mxu1 %vm883_vm0, %v742_v61  ;;  %6754 = vmatprep.subr.msk.mxu0 %vm883_vm0, %v725_v62  ;;  %v480_v61 = vld [vmem:[%s8048_s10 + $0x368] sm:$0xff] }
 0x10f   : > { %6810 = vmatprep.subr.msk.mxu1 %vm883_vm0, %v741_v63  ;;  %v608_v4 = vmul.f32 0.125, %v480_v61 }
 0x111   : > { %6755 = vmatpush3.xpose.msk.msra.mxu0 %vm883_vm0, %v725_v62  ;;  %v623_v62 = vmul.f32 0.125, %v495_v57 }
 0x112   : > { %6811 = vmatpush3.xpose.msk.msra.mxu1 %vm883_vm0, %v741_v63  ;;  %6756 = vmatprep.subr.msk.mxu0 %vm883_vm0, %v724_v0  ;;  %v496_v63 = vld [vmem:[%s8048_s10 + $0x3e8] sm:$0xff] }
 0x113   : > { %6812 = vmatprep.subr.msk.mxu1 %vm883_vm0, %v740_v1  ;;  %v624_v6 = vmul.f32 0.125, %v496_v63 }
 0x115   : > { %6757 = vmatpush3.xpose.msk.msra.mxu0 %vm883_vm0, %v724_v0  ;;  %v481_v0 = vld [vmem:[%s8048_s10 + $0x370] sm:$0xff] }
 0x116   : > { %6813 = vmatpush3.xpose.msk.msra.mxu1 %vm883_vm0, %v740_v1  ;;  %6758 = vmatprep.subr.msk.mxu0 %vm883_vm0, %v723_v2  ;;  %v609_v7 = vmul.f32 0.125, %v481_v0 }
 0x117   : > { %6814 = vmatprep.subr.msk.mxu1 %vm883_vm0, %v739_v3 }
 0x119   : > { %6759 = vmatpush3.xpose.msk.msra.mxu0 %vm883_vm0, %v723_v2 }
 0x11a   : > { %6815 = vmatpush3.xpose.msk.msra.mxu1 %vm883_vm0, %v739_v3  ;;  %v497_v3 = vld [vmem:[%s8048_s10 + $0x3f0] sm:$0xff] }
 0x11b   : > { %v8621_v15 = vpop.f32.mrf.mxu0 }
 0x11c   : > { %v8623_v16 = vpop.f32.mrf.mxu1  ;;  %2814 = vmax.xlane.f32.xlu0 %v8621_v15  ;;  %6761 = vmatmul.mubr.msk.f32.vlgmr.msra.gmra.mxu0 %vm883_vm0, %v596_v8  ;;  %v482_v8 = vld [vmem:[%s8048_s10 + $0x378] sm:$0xff] }
 0x11d   : > { %v8628_v19 = vpop.f32.mrf.mxu0  ;;  %6817 = vmatmul.mubr.msk.f32.vlgmr.msra.gmra.mxu1 %vm883_vm0, %v612_v9  ;;  %6763 = vmatprep.mubr.msk.f32.mxu0 %vm883_vm0, %v597_v10  ;;  %v625_v9 = vmul.f32 0.125, %v497_v3  ;;  %v498_v10 = vld [vmem:[%s8048_s10 + $0x3f8] sm:$0xff]  ;;  %s7857_s10 = scalar_lea.vmem %s10505_s5, 16384 }
 0x11e   : > { %v8630_v20 = vpop.f32.mrf.mxu1  ;;  %6819 = vmatprep.mubr.msk.f32.mxu1 %vm883_vm0, %v613_v12  ;;  %v610_v12 = vmul.f32 0.125, %v482_v8  ;;  %v626_v13 = vmul.f32 0.125, %v498_v10  ;;  %p7858_p12 = scmp.ne.s32.totalorder %s10505_s5, %s7857_s10  ;;  %p7865_p2 = scmp.lt.s32.totalorder %s7863_s12, %s7857_s10 }
 0x11f   : > { %2844 = vmax.xlane.f32.xlu1 %v8630_v20  ;;  %v8642_v29 = vpop.f32.mrf.mxu0 }
 0x120   : > { %2846 = vmax.xlane.f32.xlu0 %v8623_v16  ;;  %6764 = vmatmul.mubr.msk.f32.gmra.mxu0 %vm883_vm0, %v598_v18  ;;  %v8651_v36 = vpop.f32.mrf.mxu1  ;;  %p7859_p13 = pnand %p7858_p12, %p8003_p4  ;;  %p7866_p3 = por %p7865_p2, %p7864_p1 }
 0x121   : > { %6820 = vmatmul.mubr.msk.f32.gmra.mxu1 %vm883_vm0, %v614_v21  ;;  %6766 = vmatprep.mubr.msk.f32.mxu0 %vm883_vm0, %v599_v22  ;;  %v8656_v39 = vpop.f32.mrf.mxu0 }
 0x122   : > { %6822 = vmatprep.mubr.msk.f32.mxu1 %vm883_vm0, %v615_v24  ;;  %v8665_v46 = vpop.f32.mrf.mxu1  ;;  %p7860_p0 = pneg %p7859_p13 }
 0x123   : > { %2818 = vmax.xlane.f32.xlu1 %v8642_v29  ;;  %v8679_v56 = vpop.f32.mrf.mxu0 }
 0x124   : > { %2812 = vmax.xlane.f32.xlu0 %v8628_v19  ;;  %6767 = vmatmul.mubr.msk.f32.gmra.mxu0 %vm883_vm0, %v600_v28  ;;  %v8670_v49 = vpop.f32.mrf.mxu1  ;;  %p7867_p5 = pnand %p7866_p3, %p7860_p0 }
 0x125   : > { %6823 = vmatmul.mubr.msk.f32.gmra.mxu1 %vm883_vm0, %v616_v30  ;;  %6769 = vmatprep.mubr.msk.f32.mxu0 %vm883_vm0, %v601_v31  ;;  %v8691_v1 = vpop.f32.mrf.mxu0 }
 0x126   : > { %6825 = vmatprep.mubr.msk.f32.mxu1 %vm883_vm0, %v617_v33  ;;  %v8693_v2 = vpop.f32.mrf.mxu1 }
 0x127   : > { %2816 = vmax.xlane.f32.xlu1 %v8656_v39  ;;  %v8706_v11 = vpop.f32.mrf.mxu0 }
 0x128   : > { %2850 = vmax.xlane.f32.xlu0 %v8651_v36  ;;  %6770 = vmatmul.mubr.msk.f32.gmra.mxu0 %vm883_vm0, %v602_v38  ;;  %v8698_v5 = vpop.f32.mrf.mxu1 }
 0x129   : > { %6826 = vmatmul.mubr.msk.f32.gmra.mxu1 %vm883_vm0, %v618_v40  ;;  %6772 = vmatprep.mubr.msk.f32.mxu0 %vm883_vm0, %v603_v41  ;;  %v8714_v14 = vpop.f32.mrf.mxu0 }
 0x12a   : > { %6828 = vmatprep.mubr.msk.f32.mxu1 %vm883_vm0, %v619_v43  ;;  %v8718_v17 = vpop.f32.mrf.mxu1 }
 0x12b   : > { %2848 = vmax.xlane.f32.xlu1 %v8665_v46  ;;  %v8720_v18 = vpop.f32.mrf.mxu0 }
 0x12c   : > { %2854 = vmax.xlane.f32.xlu0 %v8670_v49  ;;  %6773 = vmatmul.mubr.msk.f32.gmra.mxu0 %vm883_vm0, %v604_v48  ;;  %v8725_v21 = vpop.f32.mrf.mxu1 }
 0x12d   : > { %6829 = vmatmul.mubr.msk.f32.gmra.mxu1 %vm883_vm0, %v620_v50  ;;  %6775 = vmatprep.mubr.msk.f32.mxu0 %vm883_vm0, %v605_v51  ;;  %v8728_v22 = vpop.f32.mrf.mxu0 }
 0x12e   : > { %6831 = vmatprep.mubr.msk.f32.mxu1 %vm883_vm0, %v621_v53  ;;  %v8731_v23 = vpop.f32.mrf.mxu1 }
 0x12f   : > { %2822 = vmax.xlane.f32.xlu1 %v8679_v56  ;;  %v8733_v24 = vpop.f32.mrf.mxu0 }
 0x130   : > { %2820 = vmax.xlane.f32.xlu0 %v8691_v1  ;;  %6776 = vmatmul.mubr.msk.f32.gmra.mxu0 %vm883_vm0, %v606_v58  ;;  %v8737_v25 = vpop.f32.mrf.mxu1 }
 0x131   : > { %6832 = vmatmul.mubr.msk.f32.gmra.mxu1 %vm883_vm0, %v622_v59  ;;  %6778 = vmatprep.mubr.msk.f32.mxu0 %vm883_vm0, %v607_v60  ;;  %v8740_v26 = vpop.f32.mrf.mxu0 }
 0x132   : > { %6834 = vmatprep.mubr.msk.f32.mxu1 %vm883_vm0, %v623_v62  ;;  %v8743_v27 = vpop.f32.mrf.mxu1 }
 0x133   : > { %2852 = vmax.xlane.f32.xlu1 %v8693_v2  ;;  %v8745_v28 = vpop.f32.mrf.mxu0 }
 0x134   : > { %2858 = vmax.xlane.f32.xlu0 %v8698_v5  ;;  %6779 = vmatmul.mubr.msk.f32.gmra.mxu0 %vm883_vm0, %v608_v4  ;;  %v8749_v30 = vpop.f32.mrf.mxu1 }
 0x135   : > { %6835 = vmatmul.mubr.msk.f32.gmra.mxu1 %vm883_vm0, %v624_v6  ;;  %6781 = vmatprep.mubr.msk.f32.mxu0 %vm883_vm0, %v609_v7  ;;  %v8752_v31 = vpop.f32.mrf.mxu0 }
 0x136   : > { %6837 = vmatprep.mubr.msk.f32.mxu1 %vm883_vm0, %v625_v9  ;;  %v8755_v32 = vpop.f32.mrf.mxu1 }
 0x137   : > { %2826 = vmax.xlane.f32.xlu1 %v8706_v11  ;;  %v8757_v33 = vpop.f32.mrf.mxu0 }
 0x138   : > { %2824 = vmax.xlane.f32.xlu0 %v8714_v14  ;;  %6782 = vmatmul.mubr.msk.f32.gmra.mxu0 %vm883_vm0, %v610_v12  ;;  %v8761_v34 = vpop.f32.mrf.mxu1 }
 0x139   : > { %6838 = vmatmul.mubr.msk.f32.gmra.mxu1 %vm883_vm0, %v626_v13  ;;  %v8764_v35 = vpop.f32.mrf.mxu0 }
 0x13a   : > { %v8767_v37 = vpop.f32.mrf.mxu1 }
 0x13b   : > { %2856 = vmax.xlane.f32.xlu1 %v8718_v17 }
 0x13c   : > { %2830 = vmax.xlane.f32.xlu0 %v8720_v18 }
 0x13f   : > { %2862 = vmax.xlane.f32.xlu1 %v8725_v21 }
 0x140   : > { %2828 = vmax.xlane.f32.xlu0 %v8728_v22 }
 0x143   : > { %2860 = vmax.xlane.f32.xlu1 %v8731_v23 }
 0x144   : > { %2834 = vmax.xlane.f32.xlu0 %v8733_v24 }
 0x147   : > { %2866 = vmax.xlane.f32.xlu1 %v8737_v25 }
 0x148   : > { %2832 = vmax.xlane.f32.xlu0 %v8740_v26 }
 0x14b   : > { %2864 = vmax.xlane.f32.xlu1 %v8743_v27 }
 0x14c   : > { %2838 = vmax.xlane.f32.xlu0 %v8745_v28 }
 0x14f   : > { %2870 = vmax.xlane.f32.xlu1 %v8749_v30 }
 0x150   : > { %2836 = vmax.xlane.f32.xlu0 %v8752_v31 }
 0x153   : > { %2868 = vmax.xlane.f32.xlu1 %v8755_v32 }
 0x154   : > { %2842 = vmax.xlane.f32.xlu0 %v8757_v33 }
 0x157   : > { %2874 = vmax.xlane.f32.xlu1 %v8761_v34 }
 0x158   : > { %2840 = vmax.xlane.f32.xlu0 %v8764_v35 }
 0x15b   : > { %2872 = vmax.xlane.f32.xlu1 %v8767_v37  ;;  %v8770_v38 = vpop.f32.mrf.mxu0 }
 0x15c   : > { %2878 = vmax.xlane.f32.xlu0 %v8770_v38  ;;  %v8773_v40 = vpop.f32.mrf.mxu1 }
 0x15d   : > { %v8776_v41 = vpop.f32.mrf.mxu0 }
 0x15e   : > { %v8779_v42 = vpop.f32.mrf.mxu1 }
 0x15f   : > { %2910 = vmax.xlane.f32.xlu1 %v8773_v40  ;;  %v8781_v43 = vpop.f32.mrf.mxu0 }
 0x160   : > { %2876 = vmax.xlane.f32.xlu0 %v8776_v41  ;;  %v8785_v44 = vpop.f32.mrf.mxu1 }
 0x161   : > { %v8788_v45 = vpop.f32.mrf.mxu0 }
 0x162   : > { %v8791_v47 = vpop.f32.mrf.mxu1 }
 0x163   : > { %2908 = vmax.xlane.f32.xlu1 %v8779_v42  ;;  %v8793_v48 = vpop.f32.mrf.mxu0 }
 0x164   : > { %2882 = vmax.xlane.f32.xlu0 %v8781_v43  ;;  %v8797_v50 = vpop.f32.mrf.mxu1 }
 0x165   : > { %10838 = vst [vmem:[#allocation5_spill] sm:$0xff] %v8797_v50  ;;  %v8800_v51 = vpop.f32.mrf.mxu0 }
 0x166   : > { %10839 = vst [vmem:[#allocation6_spill] sm:$0xff] %v8800_v51  ;;  %v8803_v52 = vpop.f32.mrf.mxu1 }
 0x167   : > { %2914 = vmax.xlane.f32.xlu1 %v8785_v44  ;;  %10840 = vst [vmem:[#allocation7_spill] sm:$0xff] %v8803_v52  ;;  %v8805_v53 = vpop.f32.mrf.mxu0 }
 0x168   : > { %2880 = vmax.xlane.f32.xlu0 %v8788_v45  ;;  %10841 = vst [vmem:[#allocation8_spill] sm:$0xff] %v8805_v53  ;;  %v8809_v54 = vpop.f32.mrf.mxu1 }
 0x169   : > { %10842 = vst [vmem:[#allocation9_spill] sm:$0xff] %v8809_v54  ;;  %v8812_v55 = vpop.f32.mrf.mxu0 }
 0x16a   : > { %10843 = vst [vmem:[#allocation10_spill] sm:$0xff] %v8812_v55  ;;  %v8815_v57 = vpop.f32.mrf.mxu1 }
 0x16b   : > { %2912 = vmax.xlane.f32.xlu1 %v8791_v47  ;;  %10844 = vst [vmem:[#allocation11_spill] sm:$0xff] %v8815_v57  ;;  %v8817_v58 = vpop.f32.mrf.mxu0 }
 0x16c   : > { %2886 = vmax.xlane.f32.xlu0 %v8793_v48  ;;  %10845 = vst [vmem:[#allocation12_spill] sm:$0xff] %v8817_v58  ;;  %v8821_v59 = vpop.f32.mrf.mxu1 }
 0x16d   : > { %10846 = vst [vmem:[#allocation13_spill] sm:$0xff] %v8821_v59  ;;  %v8824_v60 = vpop.f32.mrf.mxu0 }
 0x16e   : > { %10847 = vst [vmem:[#allocation14_spill] sm:$0xff] %v8824_v60  ;;  %v8827_v61 = vpop.f32.mrf.mxu1 }
 0x16f   : > { %2918 = vmax.xlane.f32.xlu1 %v8797_v50  ;;  %10848 = vst [vmem:[#allocation15_spill] sm:$0xff] %v8827_v61  ;;  %v8829_v62 = vpop.f32.mrf.mxu0 }
 0x170   : > { %2884 = vmax.xlane.f32.xlu0 %v8800_v51  ;;  %10849 = vst [vmem:[#allocation16_spill] sm:$0xff] %v8829_v62  ;;  %v8833_v63 = vpop.f32.mrf.mxu1 }
 0x171   : > { %10850 = vst [vmem:[#allocation17_spill] sm:$0xff] %v8833_v63  ;;  %v8836_v0 = vpop.f32.mrf.mxu0 }
 0x172   : > { %10851 = vst [vmem:[#allocation18_spill] sm:$0xff] %v8836_v0  ;;  %v8839_v3 = vpop.f32.mrf.mxu1 }
 0x173   : > { %2916 = vmax.xlane.f32.xlu1 %v8803_v52  ;;  %10852 = vst [vmem:[#allocation19_spill] sm:$0xff] %v8839_v3  ;;  %v8841_v4 = vpop.f32.mrf.mxu0 }
 0x174   : > { %2890 = vmax.xlane.f32.xlu0 %v8805_v53  ;;  %10853 = vst [vmem:[#allocation20_spill] sm:$0xff] %v8841_v4  ;;  %v8845_v6 = vpop.f32.mrf.mxu1 }
 0x175   : > { %10854 = vst [vmem:[#allocation21_spill] sm:$0xff] %v8845_v6  ;;  %v8848_v7 = vpop.f32.mrf.mxu0 }
 0x176   : > { %10855 = vst [vmem:[#allocation22_spill] sm:$0xff] %v8848_v7  ;;  %v8851_v8 = vpop.f32.mrf.mxu1 }
 0x177   : > { %2922 = vmax.xlane.f32.xlu1 %v8809_v54  ;;  %10856 = vst [vmem:[#allocation23_spill] sm:$0xff] %v8851_v8  ;;  %v8853_v9 = vpop.f32.mrf.mxu0 }
 0x178   : > { %2888 = vmax.xlane.f32.xlu0 %v8812_v55  ;;  %10857 = vst [vmem:[#allocation24_spill] sm:$0xff] %v8853_v9  ;;  %v8857_v10 = vpop.f32.mrf.mxu1 }
 0x179   : > { %10858 = vst [vmem:[#allocation25_spill] sm:$0xff] %v8857_v10  ;;  %v8860_v12 = vpop.f32.mrf.mxu0 }
 0x17a   : > { %10859 = vst [vmem:[#allocation26_spill] sm:$0xff] %v8860_v12  ;;  %v8863_v13 = vpop.f32.mrf.mxu1 }
 0x17b   : > { %2920 = vmax.xlane.f32.xlu1 %v8815_v57  ;;  %10860 = vst [vmem:[#allocation27_spill] sm:$0xff] %v8863_v13 }
 0x17c   : > { %2894 = vmax.xlane.f32.xlu0 %v8817_v58 }
 0x17f   : > { %2926 = vmax.xlane.f32.xlu1 %v8821_v59 }
 0x180   : > { %2892 = vmax.xlane.f32.xlu0 %v8824_v60 }
 0x183   : > { %2924 = vmax.xlane.f32.xlu1 %v8827_v61 }
 0x184   : > { %2898 = vmax.xlane.f32.xlu0 %v8829_v62 }
 0x187   : > { %2930 = vmax.xlane.f32.xlu1 %v8833_v63 }
 0x188   : > { %2896 = vmax.xlane.f32.xlu0 %v8836_v0 }
 0x18b   : > { %2928 = vmax.xlane.f32.xlu1 %v8839_v3 }
 0x18c   : > { %2902 = vmax.xlane.f32.xlu0 %v8841_v4 }
 0x18f   : > { %2934 = vmax.xlane.f32.xlu1 %v8845_v6 }
 0x190   : > { %2900 = vmax.xlane.f32.xlu0 %v8848_v7 }
 0x193   : > { %2932 = vmax.xlane.f32.xlu1 %v8851_v8 }
 0x194   : > { %2906 = vmax.xlane.f32.xlu0 %v8853_v9 }
 0x197   : > { %2938 = vmax.xlane.f32.xlu1 %v8857_v10 }
 0x198   : > { %2904 = vmax.xlane.f32.xlu0 %v8860_v12 }
 0x19b   : > { %2936 = vmax.xlane.f32.xlu1 %v8863_v13  ;;  %v8866_v7 = vpop.f32.mrf.mxu0 }
 0x19c   : > { %10861 = vst [vmem:[#allocation28_spill] sm:$0xff] %v8866_v7  ;;  %2942 = vmax.xlane.f32.xlu0 %v8866_v7  ;;  %v8869_v6 = vpop.f32.mrf.mxu1 }
 0x19d   : > { %10862 = vst [vmem:[#allocation29_spill] sm:$0xff] %v8869_v6  ;;  %v8872_v9 = vpop.f32.mrf.mxu0 }
 0x19e   : > { %10863 = vst [vmem:[#allocation30_spill] sm:$0xff] %v8872_v9  ;;  %v8875_v10 = vpop.f32.mrf.mxu1 }
 0x19f   : > { %2974 = vmax.xlane.f32.xlu1 %v8869_v6  ;;  %10864 = vst [vmem:[#allocation31_spill] sm:$0xff] %v8875_v10  ;;  %v8877_v8 = vpop.f32.mrf.mxu0 }
 0x1a0   : > { %2940 = vmax.xlane.f32.xlu0 %v8872_v9  ;;  %10865 = vst [vmem:[#allocation32_spill] sm:$0xff] %v8877_v8  ;;  %v8880_v12 = vpop.f32.mrf.mxu1 }
 0x1a1   : > { %10866 = vst [vmem:[#allocation33_spill] sm:$0xff] %v8880_v12  ;;  %v8884_v7 = vpop.f32.mrf.mxu0 }
 0x1a2   : > { %10867 = vst [vmem:[#allocation34_spill] sm:$0xff] %v8884_v7  ;;  %v8888_v4 = vpop.f32.mrf.mxu1 }
 0x1a3   : > { %2972 = vmax.xlane.f32.xlu1 %v8875_v10  ;;  %10868 = vst [vmem:[#allocation35_spill] sm:$0xff] %v8888_v4  ;;  %v8891_v3 = vpop.f32.mrf.mxu0 }
 0x1a4   : > { %2946 = vmax.xlane.f32.xlu0 %v8877_v8  ;;  %10869 = vst [vmem:[#allocation36_spill] sm:$0xff] %v8891_v3  ;;  %v8896_v0 = vpop.f32.mrf.mxu1 }
 0x1a5   : > { %v2815_v13 = vpop.xlane.xlu0 %2814  ;;  %10870 = vst [vmem:[#allocation37_spill] sm:$0xff] %v8896_v0  ;;  %v8900_v8 = vpop.f32.mrf.mxu0 }
 0x1a6   : > { %10871 = vst [vmem:[#allocation38_spill] sm:$0xff] %v8900_v8  ;;  %v8904_v62 = vpop.f32.mrf.mxu1  ;;  %v3069_v55 = vsub.f32 %v8621_v15, %v2815_v13 }
 0x1a7   : > { %2978 = vmax.xlane.f32.xlu1 %v8880_v12  ;;  %10872 = vst [vmem:[#allocation39_spill] sm:$0xff] %v8904_v62 }
 0x1a8   : > { %v8886_v6 = vpop.xlane.xlu1 %2844  ;;  %2944 = vmax.xlane.f32.xlu0 %v8884_v7 }
 0x1a9   : > { %v2847_v9 = vpop.xlane.xlu0 %2846 }
 0x1aa   : > { %v3085_v53 = vsub.f32 %v8623_v16, %v2847_v9 }
 0x1ab   : > { %2976 = vmax.xlane.f32.xlu1 %v8888_v4  ;;  %v8909_v4 = vpop.f32.mrf.mxu0 }
 0x1ac   : > { %v8894_v10 = vpop.xlane.xlu1 %2818  ;;  %2950 = vmax.xlane.f32.xlu0 %v8891_v3  ;;  %10873 = vst [vmem:[#allocation40_spill] sm:$0xff] %v8909_v4  ;;  %v8914_v3 = vpop.f32.mrf.mxu1  ;;  %v3230_v13 = vmul.f32 1.442695, %v3085_v53 }
 0x1ad   : > { %v2813_v12 = vpop.xlane.xlu0 %2812  ;;  %10874 = vst [vmem:[#allocation41_spill] sm:$0xff] %v8914_v3  ;;  %v8920_v60 = vpop.f32.mrf.mxu0 }
 0x1ae   : > { %10875 = vst [vmem:[#allocation42_spill] sm:$0xff] %v8920_v60  ;;  %v3068_v16 = vsub.f32 %v8628_v19, %v2813_v12 }
 0x1af   : > { %2982 = vmax.xlane.f32.xlu1 %v8896_v0 }
 0x1b0   : > { %v8902_v63 = vpop.xlane.xlu1 %2816  ;;  %2948 = vmax.xlane.f32.xlu0 %v8900_v8  ;;  %v8924_v8 = vpop.f32.mrf.mxu1 }
 0x1b1   : > { %v8907_v7 = vpop.xlane.xlu0 %2850  ;;  %10876 = vst [vmem:[#allocation43_spill] sm:$0xff] %v8924_v8 }
 0x1b3   : > { %2980 = vmax.xlane.f32.xlu1 %v8904_v62  ;;  %v8929_v62 = vpop.f32.mrf.mxu0 }
 0x1b4   : > { %v8912_v61 = vpop.xlane.xlu1 %2848  ;;  %2954 = vmax.xlane.f32.xlu0 %v8909_v4  ;;  %10877 = vst [vmem:[#allocation44_spill] sm:$0xff] %v8929_v62  ;;  %v8934_v4 = vpop.f32.mrf.mxu1 }
 0x1b5   : > { %v8917_v0 = vpop.xlane.xlu0 %2854  ;;  %10878 = vst [vmem:[#allocation45_spill] sm:$0xff] %v8934_v4  ;;  %v8941_v54 = vpop.f32.mrf.mxu0 }
 0x1b6   : > { %10879 = vst [vmem:[#allocation46_spill] sm:$0xff] %v8941_v54  ;;  %v8946_v52 = vpop.f32.mrf.mxu1 }
 0x1b7   : > { %2986 = vmax.xlane.f32.xlu1 %v8914_v3  ;;  %10880 = vst [vmem:[#allocation47_spill] sm:$0xff] %v8946_v52  ;;  %v8951_v51 = vpop.f32.mrf.mxu0 }
 0x1b8   : > { %v8922_v59 = vpop.xlane.xlu1 %2822  ;;  %2952 = vmax.xlane.f32.xlu0 %v8920_v60  ;;  %10881 = vst [vmem:[#allocation48_spill] sm:$0xff] %v8951_v51 }
 0x1b9   : > { %v8927_v58 = vpop.xlane.xlu0 %2820  ;;  %v8963_v9 = vpop.f32.mrf.mxu0 }
 0x1ba   : > { %10883 = vst [vmem:[#allocation50_spill] sm:$0xff] %v8963_v9 }
 0x1bb   : > { %2984 = vmax.xlane.f32.xlu1 %v8924_v8 }
 0x1bc   : > { %v8932_v57 = vpop.xlane.xlu1 %2852  ;;  %2958 = vmax.xlane.f32.xlu0 %v8929_v62  ;;  %v3198_v62 = vmul.f32 1.442695, %v3069_v55  ;;  %v3084_v55 = vsub.f32 %v8630_v20, %v8886_v6  ;;  %v3071_v6 = vsub.f32 %v8642_v29, %v8894_v10  ;;  %v3070_v29 = vsub.f32 %v8656_v39, %v8902_v63 }
 0x1bd   : > { %v8937_v3 = vpop.xlane.xlu0 %2858 }
 0x1be   : > { %7345 = vpow2.f32 %v3198_v62  ;;  %v3196_v62 = vmul.f32 1.442695, %v3068_v16  ;;  %v3228_v12 = vmul.f32 1.442695, %v3084_v55  ;;  %v3087_v55 = vsub.f32 %v8651_v36, %v8907_v7 }
 0x1bf   : > { %2990 = vmax.xlane.f32.xlu1 %v8934_v4  ;;  %v8956_v4 = vpop.f32.mrf.mxu1  ;;  %7347 = vpow2.f32 %v3230_v13  ;;  %v3086_v36 = vsub.f32 %v8665_v46, %v8912_v61  ;;  %v3200_v39 = vmul.f32 1.442695, %v3070_v29  ;;  %v3073_v46 = vsub.f32 %v8679_v56, %v8922_v59  ;;  %v770_v61 = vld [vmem:[%s9018_s13 + $0x78] sm:$0xff] }
 0x1c0   : > { %v8943_v60 = vpop.xlane.xlu1 %2826  ;;  %2956 = vmax.xlane.f32.xlu0 %v8941_v54  ;;  %10882 = vst [vmem:[#allocation49_spill] sm:$0xff] %v8956_v4  ;;  %7349 = vpow2.f32 %v3196_v62  ;;  %6840 = vmatprep.subr.mxu0 %v770_v61  ;;  %v786_v29 = vld [vmem:[%s9018_s13 + $0xf8] sm:$0xff] }
 0x1c1   : > { %v8949_v8 = vpop.xlane.xlu0 %2824  ;;  %v8969_v53 = vpop.f32.mrf.mxu1  ;;  %7351 = vpow2.f32 %v3228_v12  ;;  %v3234_v12 = vmul.f32 1.442695, %v3087_v55  ;;  %v3232_v55 = vmul.f32 1.442695, %v3086_v36  ;;  %6841 = vmatpush3.msra.mxu0 %v770_v61  ;;  %6896 = vmatprep.subr.mxu1 %v786_v29  ;;  %v3206_v59 = vmul.f32 1.442695, %v3073_v46 }
 0x1c2   : > { %10884 = vst [vmem:[#allocation51_spill] sm:$0xff] %v8969_v53  ;;  %6897 = vmatpush3.msra.mxu1 %v786_v29 }
 0x1c3   : > { %2988 = vmax.xlane.f32.xlu1 %v8946_v52  ;;  %v8974_v52 = vpop.f32.mrf.mxu0 }
 0x1c4   : > { %v8954_v15 = vpop.xlane.xlu1 %2856  ;;  %2962 = vmax.xlane.f32.xlu0 %v8951_v51  ;;  %10885 = vst [vmem:[#allocation52_spill] sm:$0xff] %v8974_v52 }
 0x1c5   : > { %v8959_v50 = vpop.xlane.xlu0 %2830  ;;  %v8987_v13 = vpop.f32.mrf.mxu0 }
 0x1c6   : > { %10887 = vst [vmem:[#allocation54_spill] sm:$0xff] %v8987_v13 }
 0x1c7   : > { %2994 = vmax.xlane.f32.xlu1 %v8956_v4  ;;  %v8980_v4 = vpop.f32.mrf.mxu1 }
 0x1c8   : > { %v8965_v54 = vpop.xlane.xlu1 %2862  ;;  %2960 = vmax.xlane.f32.xlu0 %v8963_v9  ;;  %10886 = vst [vmem:[#allocation53_spill] sm:$0xff] %v8980_v4  ;;  %v3202_v9 = vmul.f32 1.442695, %v3071_v6  ;;  %v9012_v6 = vpop.f32.mrf.mxu0 }
 0x1c9   : > { %v8972_v51 = vpop.xlane.xlu0 %2828  ;;  %10889 = vst [vmem:[#allocation56_spill] sm:$0xff] %v9012_v6 }
 0x1ca   : > { %7353 = vpow2.f32 %v3202_v9  ;;  %v769_v9 = vld [vmem:[%s9018_s13 + $0x70] sm:$0xff] }
 0x1cb   : > { %2992 = vmax.xlane.f32.xlu1 %v8969_v53  ;;  %v9001_v10 = vpop.eup %7345  ;;  %7355 = vpow2.f32 %v3234_v12  ;;  %6842 = vmatprep.subr.mxu0 %v769_v9  ;;  %v3072_v12 = vsub.f32 %v8691_v1, %v8927_v58  ;;  %v767_v1 = vld [vmem:[%s9018_s13 + $0x60] sm:$0xff]  ;;  %v784_v58 = vld [vmem:[%s9018_s13 + $0xe8] sm:$0xff] }
 0x1cc   : > { %v8977_v19 = vpop.xlane.xlu1 %2860  ;;  %2966 = vmax.xlane.f32.xlu0 %v8974_v52  ;;  %v8994_v52 = vpop.f32.mrf.mxu1  ;;  %7357 = vpow2.f32 %v3200_v39  ;;  %6843 = vmatpush3.msra.mxu0 %v769_v9  ;;  %v3088_v39 = vsub.f32 %v8693_v2, %v8932_v57 }
 0x1cd   : > { %v8982_v20 = vpop.xlane.xlu0 %2834  ;;  %10888 = vst [vmem:[#allocation55_spill] sm:$0xff] %v8994_v52  ;;  %v9008_v7 = vpop.eup %7347  ;;  %7359 = vpow2.f32 %v3232_v55  ;;  %v3204_v29 = vmul.f32 1.442695, %v3072_v12  ;;  %v766_v55 = vld [vmem:[%s9018_s13 + $0x58] sm:$0xff]  ;;  %v765_v12 = vld [vmem:[%s9018_s13 + $0x50] sm:$0xff] }
 0x1ce   : > { %v9040_v36 = vpop.eup %7349  ;;  %7361 = vpow2.f32 %v3206_v59  ;;  %v9056_v2 = vpop.f32.mrf.mxu0  ;;  %v3091_v59 = vsub.f32 %v8698_v5, %v8937_v3 }
 0x1cf   : > { %2998 = vmax.xlane.f32.xlu1 %v8980_v4  ;;  %v9031_v4 = vpop.f32.mrf.mxu1  ;;  %v9049_v46 = vpop.eup %7351  ;;  %10891 = vst [vmem:[#allocation58_spill] sm:$0xff] %v9056_v2 }
 0x1d0   : > { %v8989_v16 = vpop.xlane.xlu1 %2866  ;;  %2964 = vmax.xlane.f32.xlu0 %v8987_v13  ;;  %10890 = vst [vmem:[#allocation57_spill] sm:$0xff] %v9031_v4 }
 0x1d1   : > { %v8996_v53 = vpop.xlane.xlu0 %2832 }
 0x1d3   : > { %2996 = vmax.xlane.f32.xlu1 %v8994_v52  ;;  %v3089_v52 = vsub.f32 %v8670_v49, %v8917_v0  ;;  %v768_v49 = vld [vmem:[%s9018_s13 + $0x68] sm:$0xff]  ;;  %v785_v0 = vld [vmem:[%s9018_s13 + $0xf0] sm:$0xff] }
 0x1d4   : > { %v9003_v62 = vpop.xlane.xlu1 %2864  ;;  %3454 = vadd.xlane.f32.xlu0 %v9001_v10  ;;  %6844 = vmatprep.subr.mxu0 %v768_v49 }
 0x1d5   : > { %v9010_v13 = vpop.xlane.xlu0 %2838  ;;  %6898 = vmatprep.subr.mxu1 %v785_v0  ;;  %6845 = vmatpush3.msra.mxu0 %v768_v49  ;;  %v3236_v49 = vmul.f32 1.442695, %v3088_v39  ;;  %v764_v39 = vld [vmem:[%s9018_s13 + $0x48] sm:$0xff] }
 0x1d6   : > { %6899 = vmatpush3.msra.mxu1 %v785_v0  ;;  %6846 = vmatprep.subr.mxu0 %v767_v1  ;;  %v782_v0 = vld [vmem:[%s9018_s13 + $0xd8] sm:$0xff] }
 0x1d7   : > { %3486 = vadd.xlane.f32.xlu1 %v9008_v7  ;;  %6900 = vmatprep.subr.mxu1 %v784_v58  ;;  %v9074_v5 = vpop.eup %7353 }
 0x1d8   : > { %v9024_v63 = vpop.xlane.xlu1 %2870  ;;  %2970 = vmax.xlane.f32.xlu0 %v9012_v6  ;;  %v3238_v6 = vmul.f32 1.442695, %v3089_v52  ;;  %v3075_v52 = vsub.f32 %v8706_v11, %v8943_v60  ;;  %6847 = vmatpush3.msra.mxu0 %v767_v1  ;;  %v9065_v11 = vpop.f32.mrf.mxu1 }
 0x1d9   : > { %v9033_v56 = vpop.xlane.xlu0 %2836  ;;  %6901 = vmatpush3.msra.mxu1 %v784_v58  ;;  %10892 = vst [vmem:[#allocation59_spill] sm:$0xff] %v9065_v11  ;;  %6848 = vmatprep.subr.mxu0 %v766_v55  ;;  %v3242_v58 = vmul.f32 1.442695, %v3091_v59 }
 0x1da   : > { %7363 = vpow2.f32 %v3238_v6  ;;  %v3210_v1 = vmul.f32 1.442695, %v3075_v52  ;;  %v3074_v6 = vsub.f32 %v8714_v14, %v8949_v8  ;;  %6849 = vmatpush3.msra.mxu0 %v766_v55  ;;  %v781_v14 = vld [vmem:[%s9018_s13 + $0xd0] sm:$0xff]  ;;  %v9083_v8 = vpop.eup %7355  ;;  %v3077_v55 = vsub.f32 %v8720_v18, %v8959_v50  ;;  %v762_v18 = vld [vmem:[%s9018_s13 + $0x38] sm:$0xff] }
 0x1db   : > { %3002 = vmax.xlane.f32.xlu1 %v9031_v4  ;;  %v783_v4 = vld [vmem:[%s9018_s13 + $0xe0] sm:$0xff]  ;;  %7365 = vpow2.f32 %v3204_v29  ;;  %6850 = vmatprep.subr.mxu0 %v765_v12  ;;  %v3090_v29 = vsub.f32 %v8718_v17, %v8954_v15  ;;  %v780_v15 = vld [vmem:[%s9018_s13 + $0xc8] sm:$0xff] }
 0x1dc   : > { %v9042_v61 = vpop.xlane.xlu1 %2868  ;;  %3452 = vadd.xlane.f32.xlu0 %v9040_v36  ;;  %6902 = vmatprep.subr.mxu1 %v783_v4  ;;  %7367 = vpow2.f32 %v3236_v49  ;;  %v763_v17 = vld [vmem:[%s9018_s13 + $0x40] sm:$0xff]  ;;  %v9092_v49 = vpop.eup %7357 }
 0x1dd   : > { %v9051_v9 = vpop.xlane.xlu0 %2842  ;;  %6903 = vmatpush3.msra.mxu1 %v783_v4  ;;  %6851 = vmatpush3.msra.mxu0 %v765_v12  ;;  %7369 = vpow2.f32 %v3210_v1  ;;  %v3208_v4 = vmul.f32 1.442695, %v3074_v6  ;;  %v3240_v12 = vmul.f32 1.442695, %v3090_v29  ;;  %v9100_v50 = vpop.eup %7359  ;;  %v779_v6 = vld [vmem:[%s9018_s13 + $0xc0] sm:$0xff]  ;;  %v761_v29 = vld [vmem:[%s9018_s13 + $0x30] sm:$0xff] }
 0x1de   : > { %6904 = vmatprep.subr.mxu1 %v782_v0  ;;  %6852 = vmatprep.subr.mxu0 %v764_v39  ;;  %7371 = vpow2.f32 %v3242_v58  ;;  %v3076_v58 = vsub.f32 %v8728_v22, %v8972_v51  ;;  %v778_v22 = vld [vmem:[%s9018_s13 + $0xb8] sm:$0xff] }
 0x1df   : > { %3484 = vadd.xlane.f32.xlu1 %v9049_v46  ;;  %6905 = vmatpush3.msra.mxu1 %v782_v0  ;;  %v3093_v0 = vsub.f32 %v8725_v21, %v8965_v54  ;;  %7373 = vpow2.f32 %v3208_v4  ;;  %v9108_v21 = vpop.eup %7361  ;;  %v3092_v4 = vsub.f32 %v8731_v23, %v8977_v19  ;;  %v760_v23 = vld [vmem:[%s9018_s13 + $0x28] sm:$0xff]  ;;  %v777_v19 = vld [vmem:[%s9018_s13 + $0xb0] sm:$0xff] }
 0x1e0   : > { %v9058_v57 = vpop.xlane.xlu1 %2874  ;;  %2968 = vmax.xlane.f32.xlu0 %v9056_v2  ;;  %6906 = vmatprep.subr.mxu1 %v781_v14  ;;  %7375 = vpow2.f32 %v3240_v12 }
 0x1e1   : > { %v9067_v60 = vpop.xlane.xlu0 %2840  ;;  %6853 = vmatpush3.msra.mxu0 %v764_v39  ;;  %6907 = vmatpush3.msra.mxu1 %v781_v14  ;;  %v3214_v39 = vmul.f32 1.442695, %v3077_v55  ;;  %v3246_v14 = vmul.f32 1.442695, %v3093_v0 }
 0x1e2   : > { %6854 = vmatprep.subr.mxu0 %v763_v17  ;;  %6908 = vmatprep.subr.mxu1 %v780_v15 }
 0x1e3   : > { %3000 = vmax.xlane.f32.xlu1 %v9065_v11  ;;  %6855 = vmatpush3.msra.mxu0 %v763_v17  ;;  %7377 = vpow2.f32 %v3214_v39  ;;  %v3212_v17 = vmul.f32 1.442695, %v3076_v58  ;;  %v776_v58 = vld [vmem:[%s9018_s13 + $0xa8] sm:$0xff] }
 0x1e4   : > { %v9076_v3 = vpop.xlane.xlu1 %2872  ;;  %3458 = vadd.xlane.f32.xlu0 %v9074_v5  ;;  %6909 = vmatpush3.msra.mxu1 %v780_v15  ;;  %v3079_v15 = vsub.f32 %v8733_v24, %v8982_v20  ;;  %7379 = vpow2.f32 %v3246_v14  ;;  %v759_v24 = vld [vmem:[%s9018_s13 + $0x20] sm:$0xff]  ;;  %v3078_v14 = vsub.f32 %v8740_v26, %v8996_v53 }
 0x1e5   : > { %v9085_v52 = vpop.xlane.xlu0 %2878  ;;  %6856 = vmatprep.subr.mxu0 %v762_v18  ;;  %6910 = vmatprep.subr.mxu1 %v779_v6  ;;  %7381 = vpow2.f32 %v3212_v17  ;;  %v3094_v17 = vsub.f32 %v8743_v27, %v9003_v62  ;;  %v775_v26 = vld [vmem:[%s9018_s13 + $0xa0] sm:$0xff]  ;;  %v757_v27 = vld [vmem:[%s9018_s13 + $0x10] sm:$0xff]  ;;  %v774_v62 = vld [vmem:[%s9018_s13 + $0x98] sm:$0xff] }
 0x1e6   : > { %6857 = vmatpush3.msra.mxu0 %v762_v18  ;;  %6911 = vmatpush3.msra.mxu1 %v779_v6  ;;  %v3244_v18 = vmul.f32 1.442695, %v3092_v4  ;;  %v3095_v6 = vsub.f32 %v8737_v25, %v8989_v16  ;;  %v758_v4 = vld [vmem:[%s9018_s13 + $0x18] sm:$0xff] }
 0x1e7   : > { %3490 = vadd.xlane.f32.xlu1 %v9083_v8  ;;  %v9117_v51 = vpop.eup %7363  ;;  %6858 = vmatprep.subr.mxu0 %v761_v29 }
 0x1e8   : > { %v9094_v59 = vpop.xlane.xlu1 %2910  ;;  %3456 = vadd.xlane.f32.xlu0 %v9092_v49  ;;  %v9126_v12 = vpop.eup %7365  ;;  %6912 = vmatprep.subr.mxu1 %v778_v22  ;;  %7383 = vpow2.f32 %v3244_v18 }
 0x1e9   : > { %v9102_v1 = vpop.xlane.xlu0 %2876  ;;  %6859 = vmatpush3.msra.mxu0 %v761_v29  ;;  %6913 = vmatpush3.msra.mxu1 %v778_v22  ;;  %v9134_v20 = vpop.eup %7367  ;;  %v3218_v29 = vmul.f32 1.442695, %v3079_v15  ;;  %v3250_v22 = vmul.f32 1.442695, %v3095_v6 }
 0x1ea   : > { %10893 = vst [vmem:[#allocation60_spill] sm:$0xff] %v9134_v20  ;;  %6860 = vmatprep.subr.mxu0 %v760_v23  ;;  %6914 = vmatprep.subr.mxu1 %v777_v19  ;;  %v9142_v25 = vpop.eup %7369 }
 0x1eb   : > { %3488 = vadd.xlane.f32.xlu1 %v9100_v50  ;;  %6861 = vmatpush3.msra.mxu0 %v760_v23  ;;  %10894 = vst [vmem:[#allocation61_spill] sm:$0xff] %v9142_v25  ;;  %v9151_v53 = vpop.eup %7371  ;;  %7385 = vpow2.f32 %v3218_v29  ;;  %v3216_v23 = vmul.f32 1.442695, %v3078_v14  ;;  %v773_v14 = vld [vmem:[%s9018_s13 + $0x90] sm:$0xff] }
 0x1ec   : > { %v9110_v54 = vpop.xlane.xlu1 %2908  ;;  %3462 = vadd.xlane.f32.xlu0 %v9108_v21  ;;  %6915 = vmatpush3.msra.mxu1 %v777_v19  ;;  %10895 = vst [vmem:[#allocation62_spill] sm:$0xff] %v9151_v53  ;;  %v3081_v19 = vsub.f32 %v8745_v28, %v9010_v13  ;;  %v9160_v18 = vpop.eup %7373  ;;  %7387 = vpow2.f32 %v3250_v22  ;;  %v756_v28 = vld [vmem:[%s9018_s13 + $0x8] sm:$0xff]  ;;  %v3080_v22 = vsub.f32 %v8752_v31, %v9033_v56 }
 0x1ed   : > { %v9119_v55 = vpop.xlane.xlu0 %2882  ;;  %6862 = vmatprep.subr.mxu0 %v759_v24  ;;  %6916 = vmatprep.subr.mxu1 %v776_v58  ;;  %10896 = vst [vmem:[#allocation63_spill] sm:$0xff] %v9160_v18  ;;  %v9168_v13 = vpop.eup %7375  ;;  %7389 = vpow2.f32 %v3216_v23  ;;  %v3096_v23 = vsub.f32 %v8755_v32, %v9042_v61  ;;  %v772_v31 = vld [vmem:[%s9018_s13 + $0x88] sm:$0xff] }
 0x1ee   : > { %6863 = vmatpush3.msra.mxu0 %v759_v24  ;;  %6917 = vmatpush3.msra.mxu1 %v776_v58  ;;  %v3248_v24 = vmul.f32 1.442695, %v3094_v17  ;;  %v3097_v58 = vsub.f32 %v8749_v30, %v9024_v63  ;;  %10897 = vst [vmem:[#allocation64_spill] sm:$0xff] %v9168_v13  ;;  %v755_v17 = vld [vmem:[%s9018_s13] sm:$0xff] }
 0x1ef   : > { %3494 = vadd.xlane.f32.xlu1 %v9117_v51  ;;  %6864 = vmatprep.subr.mxu0 %v758_v4 }
 0x1f0   : > { %v9128_v0 = vpop.xlane.xlu1 %2914  ;;  %3460 = vadd.xlane.f32.xlu0 %v9126_v12  ;;  %6918 = vmatprep.subr.mxu1 %v775_v26  ;;  %v9176_v30 = vpop.eup %7377  ;;  %7391 = vpow2.f32 %v3248_v24  ;;  %v771_v24 = vld [vmem:[%s9018_s13 + $0x80] sm:$0xff] }
 0x1f1   : > { %v9136_v39 = vpop.xlane.xlu0 %2880  ;;  %6865 = vmatpush3.msra.mxu0 %v758_v4  ;;  %6919 = vmatpush3.msra.mxu1 %v775_v26  ;;  %v3222_v4 = vmul.f32 1.442695, %v3081_v19  ;;  %10898 = vst [vmem:[#allocation65_spill] sm:$0xff] %v9176_v30  ;;  %v3254_v26 = vmul.f32 1.442695, %v3097_v58  ;;  %v9185_v56 = vpop.eup %7379 }
 0x1f2   : > { %6866 = vmatprep.subr.mxu0 %v757_v27  ;;  %6920 = vmatprep.subr.mxu1 %v774_v62  ;;  %10899 = vst [vmem:[#allocation66_spill] sm:$0xff] %v9185_v56  ;;  %v9193_v32 = vpop.eup %7381  ;;  %v3252_v58 = vmul.f32 1.442695, %v3096_v23 }
 0x1f3   : > { %3492 = vadd.xlane.f32.xlu1 %v9134_v20  ;;  %6867 = vmatpush3.msra.mxu0 %v757_v27  ;;  %7393 = vpow2.f32 %v3222_v4  ;;  %v3220_v27 = vmul.f32 1.442695, %v3080_v22  ;;  %10900 = vst [vmem:[#allocation67_spill] sm:$0xff] %v9193_v32  ;;  %v3082_v4 = vsub.f32 %v8764_v35, %v9067_v60 }
 0x1f4   : > { %v9144_v16 = vpop.xlane.xlu1 %2912  ;;  %3466 = vadd.xlane.f32.xlu0 %v9142_v25  ;;  %6921 = vmatpush3.msra.mxu1 %v774_v62  ;;  %v3083_v62 = vsub.f32 %v8757_v33, %v9051_v9  ;;  %7395 = vpow2.f32 %v3254_v26 }
 0x1f5   : > { %v9153_v15 = vpop.xlane.xlu0 %2886  ;;  %6868 = vmatprep.subr.mxu0 %v756_v28  ;;  %6922 = vmatprep.subr.mxu1 %v773_v14  ;;  %7397 = vpow2.f32 %v3220_v27  ;;  %v3224_v35 = vmul.f32 1.442695, %v3082_v4 }
 0x1f6   : > { %6869 = vmatpush3.msra.mxu0 %v756_v28  ;;  %6923 = vmatpush3.msra.mxu1 %v773_v14  ;;  %v3099_v28 = vsub.f32 %v8761_v34, %v9058_v57  ;;  %v9200_v14 = vpop.eup %7383  ;;  %v3226_v9 = vmul.f32 1.442695, %v3083_v62  ;;  %7399 = vpow2.f32 %v3252_v58  ;;  %v3098_v57 = vsub.f32 %v8767_v37, %v9076_v3 }
 0x1f7   : > { %3498 = vadd.xlane.f32.xlu1 %v9151_v53  ;;  %6870 = vmatprep.subr.mxu0 %v755_v17  ;;  %10901 = vst [vmem:[#allocation68_spill] sm:$0xff] %v9200_v14 }
 0x1f8   : > { %v9162_v6 = vpop.xlane.xlu1 %2918  ;;  %3464 = vadd.xlane.f32.xlu0 %v9160_v18  ;;  %6924 = vmatprep.subr.mxu1 %v772_v31  ;;  %v9207_v22 = vpop.eup %7385  ;;  %v3258_v34 = vmul.f32 1.442695, %v3099_v28  ;;  %7401 = vpow2.f32 %v3226_v9  ;;  %v3256_v27 = vmul.f32 1.442695, %v3098_v57 }
 0x1f9   : > { %v9170_v29 = vpop.xlane.xlu0 %2884  ;;  %6871 = vmatpush3.msra.mxu0 %v755_v17  ;;  %6925 = vmatpush3.msra.mxu1 %v772_v31  ;;  %10902 = vst [vmem:[#allocation69_spill] sm:$0xff] %v9207_v22  ;;  %v9214_v26 = vpop.eup %7387 }
 0x1fa   : > { %6926 = vmatprep.subr.mxu1 %v771_v24  ;;  %10903 = vst [vmem:[#allocation70_spill] sm:$0xff] %v9214_v26  ;;  %v9219_v60 = vpop.eup %7389  ;;  %7403 = vpow2.f32 %v3258_v34 }
 0x1fb   : > { %3496 = vadd.xlane.f32.xlu1 %v9168_v13  ;;  %6927 = vmatpush3.msra.mxu1 %v771_v24  ;;  %10904 = vst [vmem:[#allocation71_spill] sm:$0xff] %v9219_v60  ;;  %7405 = vpow2.f32 %v3224_v35 }
 0x1fc   : > { %v9178_v63 = vpop.xlane.xlu1 %2916  ;;  %3470 = vadd.xlane.f32.xlu0 %v9176_v30  ;;  %7407 = vpow2.f32 %v3256_v27 }
 0x1fd   : > { %v9187_v19 = vpop.xlane.xlu0 %2890  ;;  %v9224_v62 = vpop.eup %7391 }
 0x1fe   : > { %10905 = vst [vmem:[#allocation72_spill] sm:$0xff] %v9224_v62 }
 0x1ff   : > { %3502 = vadd.xlane.f32.xlu1 %v9185_v56 }
 0x200   : > { %v9195_v61 = vpop.xlane.xlu1 %2922  ;;  %3468 = vadd.xlane.f32.xlu0 %v9193_v32  ;;  %v9229_v3 = vpop.eup %7393 }
 0x201   : > { %v9202_v33 = vpop.xlane.xlu0 %2888  ;;  %10906 = vst [vmem:[#allocation73_spill] sm:$0xff] %v9229_v3  ;;  %v9234_v58 = vpop.eup %7395 }
 0x202   : > { %10907 = vst [vmem:[#allocation74_spill] sm:$0xff] %v9234_v58  ;;  %v9239_v9 = vpop.eup %7397 }
 0x203   : > { %3500 = vadd.xlane.f32.xlu1 %v9200_v14  ;;  %10908 = vst [vmem:[#allocation75_spill] sm:$0xff] %v9239_v9  ;;  %v9244_v34 = vpop.eup %7399 }
 0x204   : > { %v9209_v17 = vpop.xlane.xlu1 %2920  ;;  %3474 = vadd.xlane.f32.xlu0 %v9207_v22  ;;  %10909 = vst [vmem:[#allocation76_spill] sm:$0xff] %v9244_v34 }
 0x205   : > { %v9216_v23 = vpop.xlane.xlu0 %2894  ;;  %v9249_v35 = vpop.eup %7401 }
 0x206   : > { %10910 = vst [vmem:[#allocation77_spill] sm:$0xff] %v9249_v35 }
 0x207   : > { %3506 = vadd.xlane.f32.xlu1 %v9214_v26  ;;  %v9254_v11 = vpop.eup %7403 }
 0x208   : > { %v9221_v31 = vpop.xlane.xlu1 %2926  ;;  %3472 = vadd.xlane.f32.xlu0 %v9219_v60  ;;  %10911 = vst [vmem:[#allocation78_spill] sm:$0xff] %v9254_v11  ;;  %v9273_v60 = vpop.f32.mrf.mxu1 }
 0x209   : > { %v9226_v37 = vpop.xlane.xlu0 %2892  ;;  %10915 = vst [vmem:[#allocation82_spill] sm:$0xff] %v9273_v60 }
 0x20a   : > { %v9283_v22 = vpop.f32.mrf.mxu1 }
 0x20b   : > { %3504 = vadd.xlane.f32.xlu1 %v9224_v62  ;;  %v9268_v62 = vpop.f32.mrf.mxu0  ;;  %10917 = vst [vmem:[#allocation84_spill] sm:$0xff] %v9283_v22 }
 0x20c   : > { %v9231_v24 = vpop.xlane.xlu1 %2924  ;;  %3478 = vadd.xlane.f32.xlu0 %v9229_v3  ;;  %10914 = vst [vmem:[#allocation81_spill] sm:$0xff] %v9268_v62 }
 0x20d   : > { %v9236_v28 = vpop.xlane.xlu0 %2898  ;;  %v9279_v26 = vpop.f32.mrf.mxu0 }
 0x20e   : > { %10916 = vst [vmem:[#allocation83_spill] sm:$0xff] %v9279_v26 }
 0x20f   : > { %3510 = vadd.xlane.f32.xlu1 %v9234_v58  ;;  %v9259_v58 = vpop.eup %7405 }
 0x210   : > { %v9241_v4 = vpop.xlane.xlu1 %2930  ;;  %3476 = vadd.xlane.f32.xlu0 %v9239_v9  ;;  %10912 = vst [vmem:[#allocation79_spill] sm:$0xff] %v9259_v58  ;;  %v9264_v3 = vpop.eup %7407 }
 0x211   : > { %v9246_v57 = vpop.xlane.xlu0 %2896  ;;  %10913 = vst [vmem:[#allocation80_spill] sm:$0xff] %v9264_v3 }
 0x213   : > { %3508 = vadd.xlane.f32.xlu1 %v9244_v34 }
 0x214   : > { %v9251_v27 = vpop.xlane.xlu1 %2928  ;;  %3482 = vadd.xlane.f32.xlu0 %v9249_v35 }
 0x215   : > { %v9256_v2 = vpop.xlane.xlu0 %2902 }
 0x217   : > { %3514 = vadd.xlane.f32.xlu1 %v9254_v11 }
 0x218   : > { %v9261_v9 = vpop.xlane.xlu1 %2934  ;;  %3480 = vadd.xlane.f32.xlu0 %v9259_v58 }
 0x219   : > { %v9266_v34 = vpop.xlane.xlu0 %2900 }
 0x21b   : > { %3512 = vadd.xlane.f32.xlu1 %v9264_v3  ;;  %v9288_v3 = vpop.f32.mrf.mxu0 }
 0x21c   : > { %v9271_v35 = vpop.xlane.xlu1 %2932  ;;  %3006 = vmax.xlane.f32.xlu0 %v9268_v62  ;;  %10918 = vst [vmem:[#allocation85_spill] sm:$0xff] %v9288_v3  ;;  %v9293_v62 = vpop.f32.mrf.mxu1 }
 0x21d   : > { %v9276_v11 = vpop.xlane.xlu0 %2906  ;;  %10919 = vst [vmem:[#allocation86_spill] sm:$0xff] %v9293_v62  ;;  %v9299_v56 = vpop.f32.mrf.mxu0 }
 0x21e   : > { %10920 = vst [vmem:[#allocation87_spill] sm:$0xff] %v9299_v56 }
 0x21f   : > { %3038 = vmax.xlane.f32.xlu1 %v9273_v60 }
 0x220   : > { %v9281_v58 = vpop.xlane.xlu1 %2938  ;;  %3004 = vmax.xlane.f32.xlu0 %v9279_v26  ;;  %v9303_v26 = vpop.f32.mrf.mxu1 }
 0x221   : > { %v9286_v14 = vpop.xlane.xlu0 %2904  ;;  %10921 = vst [vmem:[#allocation88_spill] sm:$0xff] %v9303_v26 }
 0x223   : > { %3036 = vmax.xlane.f32.xlu1 %v9283_v22  ;;  %v9308_v22 = vpop.f32.mrf.mxu0 }
 0x224   : > { %v9291_v32 = vpop.xlane.xlu1 %2936  ;;  %3010 = vmax.xlane.f32.xlu0 %v9288_v3  ;;  %10922 = vst [vmem:[#allocation89_spill] sm:$0xff] %v9308_v22  ;;  %v9313_v3 = vpop.f32.mrf.mxu1 }
 0x225   : > { %v9296_v60 = vpop.xlane.xlu0 %2942  ;;  %10924 = vst [vmem:[#allocation91_spill] sm:$0xff] %v9313_v3  ;;  %v9319_v53 = vpop.f32.mrf.mxu0 }
 0x226   : > { %10926 = vst [vmem:[#allocation93_spill] sm:$0xff] %v9319_v53 }
 0x227   : > { %3042 = vmax.xlane.f32.xlu1 %v9293_v62 }
 0x228   : > { %v9301_v30 = vpop.xlane.xlu1 %2974  ;;  %3008 = vmax.xlane.f32.xlu0 %v9299_v56  ;;  %v9323_v56 = vpop.f32.mrf.mxu1 }
 0x229   : > { %v9306_v13 = vpop.xlane.xlu0 %2940  ;;  %10928 = vst [vmem:[#allocation95_spill] sm:$0xff] %v9323_v56 }
 0x22b   : > { %3040 = vmax.xlane.f32.xlu1 %v9303_v26  ;;  %v9328_v26 = vpop.f32.mrf.mxu0 }
 0x22c   : > { %v9311_v18 = vpop.xlane.xlu1 %2972  ;;  %3014 = vmax.xlane.f32.xlu0 %v9308_v22  ;;  %10930 = vst [vmem:[#allocation97_spill] sm:$0xff] %v9328_v26  ;;  %v9333_v22 = vpop.f32.mrf.mxu1 }
 0x22d   : > { %10923 = vst [vmem:[#allocation90_spill] sm:$0xff] %v9311_v18  ;;  %v9316_v62 = vpop.xlane.xlu0 %2946  ;;  %10932 = vst [vmem:[#allocation99_spill] sm:$0xff] %v9333_v22 }
 0x22e   : > { %10925 = vst [vmem:[#allocation92_spill] sm:$0xff] %v9316_v62 }
 0x22f   : > { %3046 = vmax.xlane.f32.xlu1 %v9313_v3 }
 0x230   : > { %v9321_v25 = vpop.xlane.xlu1 %2978  ;;  %3012 = vmax.xlane.f32.xlu0 %v9319_v53  ;;  %v9343_v53 = vpop.f32.mrf.mxu1 }
 0x231   : > { %10927 = vst [vmem:[#allocation94_spill] sm:$0xff] %v9321_v25  ;;  %v9326_v20 = vpop.xlane.xlu0 %2944  ;;  %v9339_v25 = vpop.f32.mrf.mxu0  ;;  %10936 = vst [vmem:[#allocation103_spill] sm:$0xff] %v9343_v53 }
 0x232   : > { %10929 = vst [vmem:[#allocation96_spill] sm:$0xff] %v9326_v20  ;;  %10934 = vst [vmem:[#allocation101_spill] sm:$0xff] %v9339_v25 }
 0x233   : > { %3044 = vmax.xlane.f32.xlu1 %v9323_v56  ;;  %v9348_v56 = vpop.f32.mrf.mxu0 }
 0x234   : > { %v9331_v18 = vpop.xlane.xlu1 %2976  ;;  %3018 = vmax.xlane.f32.xlu0 %v9328_v26  ;;  %10938 = vst [vmem:[#allocation105_spill] sm:$0xff] %v9348_v56  ;;  %v9353_v26 = vpop.f32.mrf.mxu1 }
 0x235   : > { %10931 = vst [vmem:[#allocation98_spill] sm:$0xff] %v9331_v18  ;;  %v9336_v3 = vpop.xlane.xlu0 %2950  ;;  %10940 = vst [vmem:[#allocation107_spill] sm:$0xff] %v9353_v26 }
 0x236   : > { %10933 = vst [vmem:[#allocation100_spill] sm:$0xff] %v9336_v3  ;;  %v9367_v3 = vpop.f32.mrf.mxu1 }
 0x237   : > { %3050 = vmax.xlane.f32.xlu1 %v9333_v22  ;;  %10944 = vst [vmem:[#allocation111_spill] sm:$0xff] %v9367_v3 }
 0x238   : > { %v9341_v62 = vpop.xlane.xlu1 %2982  ;;  %3016 = vmax.xlane.f32.xlu0 %v9339_v25  ;;  %v9361_v25 = vpop.f32.mrf.mxu0 }
 0x239   : > { %10935 = vst [vmem:[#allocation102_spill] sm:$0xff] %v9341_v62  ;;  %v9346_v20 = vpop.xlane.xlu0 %2948  ;;  %v3101_v62 = vsub.f32 %v8770_v38, %v9085_v52  ;;  %10942 = vst [vmem:[#allocation109_spill] sm:$0xff] %v9361_v25 }
 0x23a   : > { %10937 = vst [vmem:[#allocation104_spill] sm:$0xff] %v9346_v20 }
 0x23b   : > { %3048 = vmax.xlane.f32.xlu1 %v9343_v53  ;;  %v3117_v53 = vsub.f32 %v8773_v40, %v9094_v59  ;;  %v3100_v40 = vsub.f32 %v8776_v41, %v9102_v1 }
 0x23c   : > { %v9351_v18 = vpop.xlane.xlu1 %2980  ;;  %3022 = vmax.xlane.f32.xlu0 %v9348_v56  ;;  %v9372_v56 = vpop.f32.mrf.mxu0 }
 0x23d   : > { %10939 = vst [vmem:[#allocation106_spill] sm:$0xff] %v9351_v18  ;;  %v9356_v22 = vpop.xlane.xlu0 %2954  ;;  %10945 = vst [vmem:[#allocation112_spill] sm:$0xff] %v9372_v56  ;;  %v3294_v52 = vmul.f32 1.442695, %v3117_v53  ;;  %v3116_v53 = vsub.f32 %v8779_v42, %v9110_v54  ;;  %v3103_v42 = vsub.f32 %v8781_v43, %v9119_v55  ;;  %v3102_v43 = vsub.f32 %v8788_v45, %v9136_v39 }
 0x23e   : > { %10941 = vst [vmem:[#allocation108_spill] sm:$0xff] %v9356_v22  ;;  %v3262_v22 = vmul.f32 1.442695, %v3101_v62  ;;  %v9385_v59 = vpop.f32.mrf.mxu0  ;;  %v3105_v39 = vsub.f32 %v8793_v48, %v9153_v15  ;;  %v9453_v48 = vld [vmem:[%s9018_s13 + $0x1f8] sm:$0xff] }
 0x23f   : > { %3054 = vmax.xlane.f32.xlu1 %v9353_v26  ;;  %v9377_v26 = vpop.f32.mrf.mxu1  ;;  %10947 = vst [vmem:[#allocation114_spill] sm:$0xff] %v9385_v59  ;;  %v3292_v1 = vmul.f32 1.442695, %v3116_v53  ;;  %v3119_v53 = vsub.f32 %v8785_v44, %v9128_v0  ;;  %v3118_v44 = vsub.f32 %v8791_v47, %v9144_v16  ;;  %v3264_v45 = vmul.f32 1.442695, %v3102_v43  ;;  %v10956_v16 = vld [vmem:[#allocation5_spill] sm:$0xff]  ;;  %7008 = vmatprep.subr.mxu1 %v9453_v48 }
 0x240   : > { %v9363_v20 = vpop.xlane.xlu1 %2986  ;;  %3020 = vmax.xlane.f32.xlu0 %v9361_v25  ;;  %10946 = vst [vmem:[#allocation113_spill] sm:$0xff] %v9377_v26  ;;  %7409 = vpow2.f32 %v3262_v22  ;;  %v9396_v22 = vpop.f32.mrf.mxu0  ;;  %v3260_v25 = vmul.f32 1.442695, %v3100_v40  ;;  %v3270_v15 = vmul.f32 1.442695, %v3105_v39 }
 0x241   : > { %10943 = vst [vmem:[#allocation110_spill] sm:$0xff] %v9363_v20  ;;  %v9370_v18 = vpop.xlane.xlu0 %2952  ;;  %7411 = vpow2.f32 %v3294_v52  ;;  %10949 = vst [vmem:[#allocation116_spill] sm:$0xff] %v9396_v22  ;;  %v3296_v47 = vmul.f32 1.442695, %v3118_v44 }
 0x242   : > { %7413 = vpow2.f32 %v3260_v25  ;;  %v9409_v54 = vpop.f32.mrf.mxu0  ;;  %v3266_v25 = vmul.f32 1.442695, %v3103_v42 }
 0x243   : > { %3052 = vmax.xlane.f32.xlu1 %v9367_v3  ;;  %v9391_v3 = vpop.f32.mrf.mxu1  ;;  %10951 = vst [vmem:[#allocation118_spill] sm:$0xff] %v9409_v54  ;;  %7415 = vpow2.f32 %v3292_v1  ;;  %v3298_v1 = vmul.f32 1.442695, %v3119_v53 }
 0x244   : > { %v9375_v38 = vpop.xlane.xlu1 %2984  ;;  %3026 = vmax.xlane.f32.xlu0 %v9372_v56  ;;  %10948 = vst [vmem:[#allocation115_spill] sm:$0xff] %v9391_v3  ;;  %7417 = vpow2.f32 %v3266_v25 }
 0x245   : > { %v9380_v20 = vpop.xlane.xlu0 %2958  ;;  %v9402_v52 = vpop.f32.mrf.mxu1  ;;  %7419 = vpow2.f32 %v3298_v1 }
 0x246   : > { %10950 = vst [vmem:[#allocation117_spill] sm:$0xff] %v9402_v52  ;;  %7421 = vpow2.f32 %v3264_v45 }
 0x247   : > { %3058 = vmax.xlane.f32.xlu1 %v9377_v26  ;;  %7423 = vpow2.f32 %v3296_v47 }
 0x248   : > { %v9387_v62 = vpop.xlane.xlu1 %2990  ;;  %3024 = vmax.xlane.f32.xlu0 %v9385_v59  ;;  %v3121_v59 = vsub.f32 %v10956_v16, %v9162_v6  ;;  %v10961_v16 = vld [vmem:[#allocation7_spill] sm:$0xff]  ;;  %7425 = vpow2.f32 %v3270_v15  ;;  %v10966_v15 = vld [vmem:[#allocation10_spill] sm:$0xff] }
 0x249   : > { %v9394_v56 = vpop.xlane.xlu0 %2956 }
 0x24a   : > { %v3302_v44 = vmul.f32 1.442695, %v3121_v59 }
 0x24b   : > { %3056 = vmax.xlane.f32.xlu1 %v9391_v3 }
 0x24c   : > { %v9399_v41 = vpop.xlane.xlu1 %2988  ;;  %3030 = vmax.xlane.f32.xlu0 %v9396_v22  ;;  %v9416_v22 = vpop.f32.mrf.mxu1 }
 0x24d   : > { %v9404_v26 = vpop.xlane.xlu0 %2962  ;;  %10952 = vst [vmem:[#allocation119_spill] sm:$0xff] %v9416_v22  ;;  %v9423_v55 = vpop.eup %7409 }
 0x24e   : > { %10953 = vst [vmem:[#allocation120_spill] sm:$0xff] %v9423_v55  ;;  %v9430_v0 = vpop.eup %7411  ;;  %v9448_v25 = vpop.f32.mrf.mxu1 }
 0x24f   : > { %3062 = vmax.xlane.f32.xlu1 %v9402_v52  ;;  %10954 = vst [vmem:[#allocation121_spill] sm:$0xff] %v9430_v0  ;;  %10957 = vst [vmem:[#allocation5_spill] sm:$0xff] %v9448_v25  ;;  %v9459_v6 = vpop.eup %7413 }
 0x250   : > { %v9411_v40 = vpop.xlane.xlu1 %2994  ;;  %3028 = vmax.xlane.f32.xlu0 %v9409_v54  ;;  %v9434_v54 = vpop.f32.mrf.mxu0 }
 0x251   : > { %v9418_v3 = vpop.xlane.xlu0 %2960  ;;  %10955 = vst [vmem:[#allocation122_spill] sm:$0xff] %v9434_v54  ;;  %v9466_v45 = vpop.eup %7415 }
 0x253   : > { %3060 = vmax.xlane.f32.xlu1 %v9416_v22  ;;  %v9442_v22 = vld [vmem:[%s9018_s13 + $0x178] sm:$0xff] }
 0x254   : > { %v9425_v52 = vpop.xlane.xlu1 %2992  ;;  %3518 = vadd.xlane.f32.xlu0 %v9423_v55  ;;  %6952 = vmatprep.subr.mxu0 %v9442_v22 }
 0x255   : > { %v9432_v42 = vpop.xlane.xlu0 %2966 }
 0x257   : > { %3550 = vadd.xlane.f32.xlu1 %v9430_v0  ;;  %v10959_v0 = vld [vmem:[#allocation6_spill] sm:$0xff] }
 0x258   : > { %v9439_v53 = vpop.xlane.xlu1 %2998  ;;  %3034 = vmax.xlane.f32.xlu0 %v9434_v54  ;;  %v3104_v55 = vsub.f32 %v10959_v0, %v9170_v29  ;;  %10960 = vst [vmem:[#allocation6_spill] sm:$0xff] %v9459_v6  ;;  %v3120_v54 = vsub.f32 %v10961_v16, %v9178_v63  ;;  %v10962_v0 = vld [vmem:[#allocation8_spill] sm:$0xff]  ;;  %v10964_v63 = vld [vmem:[#allocation9_spill] sm:$0xff] }
 0x259   : > { %v9450_v43 = vpop.xlane.xlu0 %2964  ;;  %v3123_v16 = vsub.f32 %v10964_v63, %v9195_v61 }
 0x25a   : > { %10958 = vst [vmem:[#allocation123_spill] sm:$0xff] %v9450_v43  ;;  %v3268_v29 = vmul.f32 1.442695, %v3104_v55  ;;  %v9471_v43 = vpop.f32.mrf.mxu0  ;;  %v3300_v59 = vmul.f32 1.442695, %v3120_v54 }
 0x25b   : > { %3066 = vmax.xlane.f32.xlu1 %v9448_v25  ;;  %v3107_v25 = vsub.f32 %v10962_v0, %v9187_v19  ;;  %10963 = vst [vmem:[#allocation7_spill] sm:$0xff] %v9471_v43  ;;  %v3106_v0 = vsub.f32 %v10966_v15, %v9202_v33  ;;  %v3306_v61 = vmul.f32 1.442695, %v3123_v16  ;;  %v10970_v15 = vld [vmem:[#allocation13_spill] sm:$0xff] }
 0x25c   : > { %v9461_v1 = vpop.xlane.xlu1 %2996  ;;  %3516 = vadd.xlane.f32.xlu0 %v9459_v6  ;;  %v9476_v6 = vpop.f32.mrf.mxu1 }
 0x25d   : > { %v3455_v39 = vpop.xlane.xlu0 %3454  ;;  %10965 = vst [vmem:[#allocation8_spill] sm:$0xff] %v9476_v6  ;;  %v3274_v19 = vmul.f32 1.442695, %v3107_v25  ;;  %v10969_v25 = vld [vmem:[#allocation12_spill] sm:$0xff]  ;;  %v3272_v33 = vmul.f32 1.442695, %v3106_v0 }
 0x25e   : > { %7427 = vrcp.f32 %v3455_v39  ;;  %v10968_v39 = vld [vmem:[#allocation11_spill] sm:$0xff] }
 0x25f   : > { %3548 = vadd.xlane.f32.xlu1 %v9466_v45  ;;  %7429 = vpow2.f32 %v3302_v44  ;;  %v9483_v44 = vpop.eup %7417  ;;  %v3122_v63 = vsub.f32 %v10968_v39, %v9209_v17  ;;  %v10971_v39 = vld [vmem:[#allocation14_spill] sm:$0xff] }
 0x260   : > { %v3487_v47 = vpop.xlane.xlu1 %3486  ;;  %3032 = vmax.xlane.f32.xlu0 %v9471_v43  ;;  %10967 = vst [vmem:[#allocation9_spill] sm:$0xff] %v9483_v44 }
 0x261   : > { %7431 = vrcp.f32 %v3487_v47  ;;  %v9478_v55 = vpop.xlane.xlu0 %2970  ;;  %v9490_v47 = vpop.eup %7419  ;;  %v3304_v16 = vmul.f32 1.442695, %v3122_v63 }
 0x262   : > { %7433 = vpow2.f32 %v3268_v29  ;;  %v3109_v29 = vsub.f32 %v10969_v25, %v9216_v23 }
 0x263   : > { %3064 = vmax.xlane.f32.xlu1 %v9476_v6  ;;  %7435 = vpow2.f32 %v3300_v59  ;;  %v3125_v6 = vsub.f32 %v10970_v15, %v9221_v31  ;;  %v9498_v59 = vpop.eup %7421 }
 0x264   : > { %v9485_v54 = vpop.xlane.xlu1 %3002  ;;  %3522 = vadd.xlane.f32.xlu0 %v9483_v44  ;;  %7437 = vpow2.f32 %v3274_v19  ;;  %v3108_v44 = vsub.f32 %v10971_v39, %v9226_v37  ;;  %v9503_v23 = vpop.eup %7423  ;;  %v3278_v19 = vmul.f32 1.442695, %v3109_v29 }
 0x265   : > { %v3453_v43 = vpop.xlane.xlu0 %3452  ;;  %10972 = vst [vmem:[#allocation10_spill] sm:$0xff] %v9503_v23  ;;  %v3310_v31 = vmul.f32 1.442695, %v3125_v6 }
 0x266   : > { %7439 = vrcp.f32 %v3453_v43  ;;  %v9510_v43 = vpop.eup %7425  ;;  %v3276_v15 = vmul.f32 1.442695, %v3108_v44  ;;  %v10976_v44 = vld [vmem:[#allocation17_spill] sm:$0xff] }
 0x267   : > { %3554 = vadd.xlane.f32.xlu1 %v9490_v47  ;;  %7441 = vpow2.f32 %v3306_v61  ;;  %10973 = vst [vmem:[#allocation11_spill] sm:$0xff] %v9510_v43  ;;  %v10974_v61 = vld [vmem:[#allocation15_spill] sm:$0xff] }
 0x268   : > { %v3485_v17 = vpop.xlane.xlu1 %3484  ;;  %3520 = vadd.xlane.f32.xlu0 %v9498_v59  ;;  %v3124_v63 = vsub.f32 %v10974_v61, %v9231_v24 }
 0x269   : > { %7443 = vrcp.f32 %v3485_v17  ;;  %v9505_v0 = vpop.xlane.xlu0 %2968 }
 0x26a   : > { %7445 = vpow2.f32 %v3272_v33  ;;  %v10975_v33 = vld [vmem:[#allocation16_spill] sm:$0xff]  ;;  %v3308_v61 = vmul.f32 1.442695, %v3124_v63 }
 0x26b   : > { %3552 = vadd.xlane.f32.xlu1 %v9503_v23  ;;  %v7428_v25 = vpop.eup %7427  ;;  %7447 = vpow2.f32 %v3304_v16  ;;  %v3111_v6 = vsub.f32 %v10975_v33, %v9236_v28  ;;  %v3127_v16 = vsub.f32 %v10976_v44, %v9241_v4 }
 0x26c   : > { %v9514_v37 = vpop.xlane.xlu1 %3000  ;;  %3526 = vadd.xlane.f32.xlu0 %v9510_v43  ;;  %v9517_v29 = vpop.eup %7429  ;;  %7449 = vpow2.f32 %v3278_v19  ;;  %v3837_v39 = vmul.f32 %v7428_v25, %v9001_v10 }
 0x26d   : > { %v3459_v17 = vpop.xlane.xlu0 %3458  ;;  %7451 = vpow2.f32 %v3310_v31  ;;  %v3282_v19 = vmul.f32 1.442695, %v3111_v6  ;;  %v10977_v31 = vld [vmem:[#allocation18_spill] sm:$0xff]  ;;  %v3314_v33 = vmul.f32 1.442695, %v3127_v16  ;;  %v10979_v6 = vld [vmem:[#allocation20_spill] sm:$0xff] }
 0x26e   : > { %v7432_v23 = vpop.eup %7431  ;;  %7453 = vrcp.f32 %v3459_v17  ;;  %5125 = vst [vmem:[%s9527_s22 + $0x8] sm:$0xff] %v3837_v39  ;;  %v3110_v63 = vsub.f32 %v10977_v31, %v9246_v57  ;;  %v3113_v44 = vsub.f32 %v10979_v6, %v9256_v2  ;;  %v800_v6 = vld [vmem:[%s9018_s13 + $0x168] sm:$0xff] }
 0x26f   : > { %3558 = vadd.xlane.f32.xlu1 %v9517_v29  ;;  %v9523_v24 = vpop.eup %7433  ;;  %v3853_v28 = vmul.f32 %v7432_v23, %v9008_v7  ;;  %7455 = vpow2.f32 %v3276_v15  ;;  %v10978_v7 = vld [vmem:[#allocation19_spill] sm:$0xff] }
 0x270   : > { %v3491_v43 = vpop.xlane.xlu1 %3490  ;;  %3524 = vadd.xlane.f32.xlu0 %v9523_v24  ;;  %v9532_v10 = vpop.eup %7435  ;;  %v3126_v23 = vsub.f32 %v10978_v7, %v9251_v27  ;;  %v10980_v7 = vld [vmem:[#allocation21_spill] sm:$0xff] }
 0x271   : > { %7457 = vrcp.f32 %v3491_v43  ;;  %v3457_v4 = vpop.xlane.xlu0 %3456  ;;  %5141 = vst [vmem:[%s9527_s22 + $0x88] sm:$0xff] %v3853_v28  ;;  %v9538_v25 = vpop.eup %7437  ;;  %v3280_v43 = vmul.f32 1.442695, %v3110_v63 }
 0x272   : > { %7459 = vrcp.f32 %v3457_v4  ;;  %v3312_v4 = vmul.f32 1.442695, %v3126_v23  ;;  %v10981_v23 = vld [vmem:[#allocation22_spill] sm:$0xff] }
 0x273   : > { %3556 = vadd.xlane.f32.xlu1 %v9532_v10  ;;  %7461 = vpow2.f32 %v3308_v61  ;;  %v7440_v17 = vpop.eup %7439 }
 0x274   : > { %v3489_v15 = vpop.xlane.xlu1 %3488  ;;  %3530 = vadd.xlane.f32.xlu0 %v9538_v25  ;;  %v9543_v57 = vpop.eup %7441  ;;  %v3836_v61 = vmul.f32 %v7440_v17, %v9040_v36  ;;  %v801_v36 = vld [vmem:[%s9018_s13 + $0x170] sm:$0xff]  ;;  %v3112_v17 = vsub.f32 %v10981_v23, %v9266_v34  ;;  %v10984_v23 = vld [vmem:[#allocation25_spill] sm:$0xff] }
 0x275   : > { %7463 = vrcp.f32 %v3489_v15  ;;  %v3463_v31 = vpop.xlane.xlu0 %3462  ;;  %v10982_v34 = vld [vmem:[#allocation23_spill] sm:$0xff] }
 0x276   : > { %7465 = vpow2.f32 %v3282_v19  ;;  %v7444_v16 = vpop.eup %7443  ;;  %v3129_v19 = vsub.f32 %v10980_v7, %v9261_v9  ;;  %6872 = vmatprep.mubr.f32.mxu0 %v3836_v61  ;;  %5124 = vst [vmem:[%s9527_s22] sm:$0xff] %v3836_v61  ;;  %v3284_v7 = vmul.f32 1.442695, %v3112_v17  ;;  %v3131_v17 = vsub.f32 %v10984_v23, %v9281_v58  ;;  %v814_v23 = vld [vmem:[%s9018_s13 + $0x1d8] sm:$0xff] }
 0x277   : > { %7467 = vrcp.f32 %v3463_v31  ;;  %3562 = vadd.xlane.f32.xlu1 %v9543_v57  ;;  %v9549_v27 = vpop.eup %7445  ;;  %v3852_v2 = vmul.f32 %v7444_v16, %v9049_v46  ;;  %6873 = vmatmul.mubr.f32.vlgmr.msra.gmra.mxu0 %v3837_v39  ;;  %v817_v39 = vld [vmem:[%s9018_s13 + $0x1f0] sm:$0xff] }
 0x278   : > { %7469 = vpow2.f32 %v3314_v33  ;;  %v3495_v63 = vpop.xlane.xlu1 %3494  ;;  %3528 = vadd.xlane.f32.xlu0 %v9549_v27  ;;  %v9557_v15 = vpop.eup %7447  ;;  %v3286_v33 = vmul.f32 1.442695, %v3113_v44  ;;  %6953 = vmatpush3.msra.mxu0 %v9442_v22  ;;  %v3128_v44 = vsub.f32 %v10982_v34, %v9271_v35 }
 0x279   : > { %7471 = vrcp.f32 %v3495_v63  ;;  %6928 = vmatprep.mubr.f32.mxu1 %v3852_v2  ;;  %5140 = vst [vmem:[%s9527_s22 + $0x80] sm:$0xff] %v3852_v2  ;;  %v3461_v9 = vpop.xlane.xlu0 %3460  ;;  %v9563_v46 = vpop.eup %7449  ;;  %6954 = vmatprep.subr.mxu0 %v801_v36 }
 0x27a   : > { %7473 = vpow2.f32 %v3280_v43  ;;  %6929 = vmatmul.mubr.f32.vlgmr.msra.gmra.mxu1 %v3853_v28  ;;  %v9568_v31 = vpop.eup %7451  ;;  %v3318_v43 = vmul.f32 1.442695, %v3129_v19  ;;  %6955 = vmatpush3.msra.mxu0 %v801_v36  ;;  %v799_v28 = vld [vmem:[%s9018_s13 + $0x160] sm:$0xff] }
 0x27b   : > { %7475 = vrcp.f32 %v3461_v9  ;;  %3560 = vadd.xlane.f32.xlu1 %v9557_v15  ;;  %7009 = vmatpush3.msra.mxu1 %v9453_v48  ;;  %v7454_v22 = vpop.eup %7453  ;;  %v816_v48 = vld [vmem:[%s9018_s13 + $0x1e8] sm:$0xff] }
 0x27c   : > { %7477 = vpow2.f32 %v3312_v4  ;;  %v3493_v61 = vpop.xlane.xlu1 %3492  ;;  %3534 = vadd.xlane.f32.xlu0 %v9563_v46  ;;  %v9575_v16 = vpop.eup %7455  ;;  %v10983_v4 = vld [vmem:[#allocation24_spill] sm:$0xff]  ;;  %v3839_v63 = vmul.f32 %v7454_v22, %v9074_v5  ;;  %7010 = vmatprep.subr.mxu1 %v817_v39 }
 0x27d   : > { %7479 = vrcp.f32 %v3493_v61  ;;  %v3115_v19 = vsub.f32 %v10983_v4, %v9276_v11  ;;  %v3467_v35 = vpop.xlane.xlu0 %3466  ;;  %6956 = vmatprep.subr.mxu0 %v800_v6  ;;  %7011 = vmatpush3.msra.mxu1 %v817_v39  ;;  %v798_v22 = vld [vmem:[%s9018_s13 + $0x158] sm:$0xff]  ;;  %v3322_v4 = vmul.f32 1.442695, %v3131_v17 }
 0x27e   : > { %7481 = vpow2.f32 %v3286_v33  ;;  %v7458_v2 = vpop.eup %7457  ;;  %6957 = vmatpush3.msra.mxu0 %v800_v6  ;;  %v3316_v33 = vmul.f32 1.442695, %v3128_v44  ;;  %5127 = vst [vmem:[%s9527_s22 + $0x18] sm:$0xff] %v3839_v63  ;;  %7012 = vmatprep.subr.mxu1 %v816_v48  ;;  %v10985_v44 = vld [vmem:[#allocation26_spill] sm:$0xff] }
 0x27f   : > { %7483 = vrcp.f32 %v3467_v35  ;;  %3566 = vadd.xlane.f32.xlu1 %v9568_v31  ;;  %v7460_v36 = vpop.eup %7459  ;;  %v3855_v11 = vmul.f32 %v7458_v2, %v9083_v8  ;;  %6958 = vmatprep.subr.mxu0 %v799_v28  ;;  %v3290_v58 = vmul.f32 1.442695, %v3115_v19  ;;  %v3114_v61 = vsub.f32 %v10985_v44, %v9286_v14  ;;  %v10986_v14 = vld [vmem:[#allocation27_spill] sm:$0xff] }
 0x280   : > { %7485 = vpow2.f32 %v3318_v43  ;;  %v3499_v9 = vpop.xlane.xlu1 %3498  ;;  %v9586_v5 = vpop.eup %7461  ;;  %3532 = vadd.xlane.f32.xlu0 %v9575_v16  ;;  %v3838_v6 = vmul.f32 %v7460_v36, %v9092_v49  ;;  %v815_v43 = vld [vmem:[%s9018_s13 + $0x1e0] sm:$0xff]  ;;  %7013 = vmatpush3.msra.mxu1 %v816_v48  ;;  %v3130_v19 = vsub.f32 %v10986_v14, %v9291_v32  ;;  %v797_v48 = vld [vmem:[%s9018_s13 + $0x150] sm:$0xff]  ;;  %v10987_v32 = vld [vmem:[#allocation28_spill] sm:$0xff] }
 0x281   : > { %7487 = vrcp.f32 %v3499_v9  ;;  %v3465_v8 = vpop.xlane.xlu0 %3464  ;;  %5143 = vst [vmem:[%s9527_s22 + $0x98] sm:$0xff] %v3855_v11  ;;  %6959 = vmatpush3.msra.mxu0 %v799_v28  ;;  %7014 = vmatprep.subr.mxu1 %v815_v43  ;;  %v3288_v36 = vmul.f32 1.442695, %v3114_v61 }
 0x282   : > { %v7464_v34 = vpop.eup %7463  ;;  %7489 = vpow2.f32 %v3284_v7  ;;  %6875 = vmatprep.mubr.f32.mxu0 %v3838_v6  ;;  %5126 = vst [vmem:[%s9527_s22 + $0x10] sm:$0xff] %v3838_v6  ;;  %6960 = vmatprep.subr.mxu0 %v798_v22  ;;  %v3320_v6 = vmul.f32 1.442695, %v3130_v19 }
 0x283   : > { %v9594_v39 = vpop.eup %7465  ;;  %7491 = vrcp.f32 %v3465_v8  ;;  %3564 = vadd.xlane.f32.xlu1 %v9586_v5  ;;  %v3854_v49 = vmul.f32 %v7464_v34, %v9100_v50  ;;  %6876 = vmatmul.mubr.f32.gmra.mxu0 %v3839_v63 }
 0x284   : > { %v7468_v7 = vpop.eup %7467  ;;  %7493 = vpow2.f32 %v3316_v33  ;;  %v3497_v35 = vpop.xlane.xlu1 %3496  ;;  %3538 = vadd.xlane.f32.xlu0 %v9594_v39  ;;  %v3133_v33 = vsub.f32 %v10987_v32, %v9296_v60  ;;  %6961 = vmatpush3.msra.mxu0 %v798_v22  ;;  %v10988_v60 = vld [vmem:[#allocation29_spill] sm:$0xff] }
 0x285   : > { %v9602_v28 = vpop.eup %7469  ;;  %7495 = vrcp.f32 %v3497_v35  ;;  %6931 = vmatprep.mubr.f32.mxu1 %v3854_v49  ;;  %5142 = vst [vmem:[%s9527_s22 + $0x90] sm:$0xff] %v3854_v49  ;;  %v3841_v50 = vmul.f32 %v7468_v7, %v9108_v21  ;;  %v3471_v63 = vpop.xlane.xlu0 %3470  ;;  %7015 = vmatpush3.msra.mxu1 %v815_v43  ;;  %v10991_v35 = vld [vmem:[#allocation90_spill] sm:$0xff]  ;;  %v10993_v32 = vld [vmem:[#allocation61_spill] sm:$0xff] }
 0x286   : > { %v7472_v2 = vpop.eup %7471  ;;  %7497 = vpow2.f32 %v3290_v58  ;;  %6932 = vmatmul.mubr.f32.gmra.mxu1 %v3855_v11  ;;  %v3149_v11 = vsub.f32 %v10988_v60, %v9301_v30  ;;  %6962 = vmatprep.subr.mxu0 %v797_v48  ;;  %v3326_v8 = vmul.f32 1.442695, %v3133_v33  ;;  %v10989_v30 = vld [vmem:[#allocation30_spill] sm:$0xff]  ;;  %v10995_v60 = vld [vmem:[#allocation32_spill] sm:$0xff] }
 0x287   : > { %v9611_v17 = vpop.eup %7473  ;;  %7499 = vrcp.f32 %v3471_v63  ;;  %3570 = vadd.xlane.f32.xlu1 %v9602_v28  ;;  %5129 = vst [vmem:[%s9527_s22 + $0x28] sm:$0xff] %v3841_v50  ;;  %v3857_v21 = vmul.f32 %v7472_v2, %v9117_v51  ;;  %7016 = vmatprep.subr.mxu1 %v814_v23  ;;  %v813_v51 = vld [vmem:[%s9018_s13 + $0x1d0] sm:$0xff]  ;;  %v3132_v49 = vsub.f32 %v10989_v30, %v9306_v13  ;;  %v795_v63 = vld [vmem:[%s9018_s13 + $0x140] sm:$0xff] }
 0x288   : > { %v7476_v9 = vpop.eup %7475  ;;  %7501 = vpow2.f32 %v3322_v4  ;;  %v3503_v34 = vpop.xlane.xlu1 %3502  ;;  %3536 = vadd.xlane.f32.xlu0 %v9611_v17  ;;  %7017 = vmatpush3.msra.mxu1 %v814_v23  ;;  %v796_v4 = vld [vmem:[%s9018_s13 + $0x148] sm:$0xff]  ;;  %v3358_v19 = vmul.f32 1.442695, %v3149_v11  ;;  %v10992_v13 = vld [vmem:[#allocation31_spill] sm:$0xff] }
 0x289   : > { %v9618_v58 = vpop.eup %7477  ;;  %7503 = vrcp.f32 %v3503_v34  ;;  %v3840_v44 = vmul.f32 %v7476_v9, %v9126_v12  ;;  %5145 = vst [vmem:[%s9527_s22 + $0xa8] sm:$0xff] %v3857_v21  ;;  %v3469_v43 = vpop.xlane.xlu0 %3468  ;;  %6963 = vmatpush3.msra.mxu0 %v797_v48  ;;  %v10990_v12 = vld [vmem:[#allocation60_spill] sm:$0xff]  ;;  %v3148_v2 = vsub.f32 %v10992_v13, %v10991_v35  ;;  %7018 = vmatprep.subr.mxu1 %v813_v51  ;;  %v3324_v9 = vmul.f32 1.442695, %v3132_v49  ;;  %v812_v34 = vld [vmem:[%s9018_s13 + $0x1c8] sm:$0xff]  ;;  %v10999_v35 = vld [vmem:[#allocation63_spill] sm:$0xff] }
 0x28a   : > { %v7480_v61 = vpop.eup %7479  ;;  %7505 = vpow2.f32 %v3288_v36  ;;  %6964 = vmatprep.subr.mxu0 %v796_v4  ;;  %7019 = vmatpush3.msra.mxu1 %v813_v51 }
 0x28b   : > { %v9626_v22 = vpop.eup %7481  ;;  %7507 = vrcp.f32 %v3469_v43  ;;  %3568 = vadd.xlane.f32.xlu1 %v9618_v58  ;;  %6878 = vmatprep.mubr.f32.mxu0 %v3840_v44  ;;  %5128 = vst [vmem:[%s9527_s22 + $0x20] sm:$0xff] %v3840_v44  ;;  %v3856_v7 = vmul.f32 %v7480_v61, %v10990_v12  ;;  %v10996_v61 = vld [vmem:[#allocation62_spill] sm:$0xff]  ;;  %v3356_v49 = vmul.f32 1.442695, %v3148_v2  ;;  %v10998_v12 = vld [vmem:[#allocation33_spill] sm:$0xff] }
 0x28c   : > { %v7484_v14 = vpop.eup %7483  ;;  %7509 = vpow2.f32 %v3320_v6  ;;  %v3501_v36 = vpop.xlane.xlu1 %3500  ;;  %6879 = vmatmul.mubr.f32.gmra.mxu0 %v3841_v50  ;;  %3542 = vadd.xlane.f32.xlu0 %v9626_v22  ;;  %v10994_v6 = vld [vmem:[#allocation92_spill] sm:$0xff]  ;;  %v10997_v43 = vld [vmem:[#allocation94_spill] sm:$0xff] }
 0x28d   : > { %v9634_v48 = vpop.eup %7485  ;;  %7511 = vrcp.f32 %v3501_v36  ;;  %6934 = vmatprep.mubr.f32.mxu1 %v3856_v7  ;;  %5144 = vst [vmem:[%s9527_s22 + $0xa0] sm:$0xff] %v3856_v7  ;;  %v3843_v33 = vmul.f32 %v7484_v14, %v10993_v32  ;;  %v3135_v11 = vsub.f32 %v10995_v60, %v10994_v6  ;;  %v3475_v50 = vpop.xlane.xlu0 %3474  ;;  %6965 = vmatpush3.msra.mxu0 %v796_v4  ;;  %v811_v4 = vld [vmem:[%s9018_s13 + $0x1c0] sm:$0xff]  ;;  %v11000_v36 = vld [vmem:[#allocation96_spill] sm:$0xff]  ;;  %v11001_v32 = vld [vmem:[#allocation34_spill] sm:$0xff] }
 0x28e   : > { %v7488_v23 = vpop.eup %7487  ;;  %7513 = vpow2.f32 %v3326_v8  ;;  %6935 = vmatmul.mubr.f32.gmra.mxu1 %v3857_v21  ;;  %v3151_v21 = vsub.f32 %v10998_v12, %v10997_v43  ;;  %6966 = vmatprep.subr.mxu0 %v795_v63  ;;  %v11002_v60 = vld [vmem:[#allocation64_spill] sm:$0xff]  ;;  %v11004_v43 = vld [vmem:[#allocation35_spill] sm:$0xff] }
 0x28f   : > { %v9643_v44 = vpop.eup %7489  ;;  %7515 = vrcp.f32 %v3475_v50  ;;  %3574 = vadd.xlane.f32.xlu1 %v9634_v48  ;;  %5131 = vst [vmem:[%s9527_s22 + $0x38] sm:$0xff] %v3843_v33  ;;  %v3859_v30 = vmul.f32 %v7488_v23, %v10996_v61  ;;  %7020 = vmatprep.subr.mxu1 %v812_v34  ;;  %v3330_v2 = vmul.f32 1.442695, %v3135_v11  ;;  %v3134_v23 = vsub.f32 %v11001_v32, %v11000_v36  ;;  %v794_v61 = vld [vmem:[%s9018_s13 + $0x138] sm:$0xff] }
 0x290   : > { %v7492_v8 = vpop.eup %7491  ;;  %7517 = vpow2.f32 %v3358_v19  ;;  %v3507_v7 = vpop.xlane.xlu1 %3506  ;;  %3540 = vadd.xlane.f32.xlu0 %v9643_v44  ;;  %7021 = vmatpush3.msra.mxu1 %v812_v34  ;;  %v3362_v11 = vmul.f32 1.442695, %v3151_v21  ;;  %v11007_v36 = vld [vmem:[#allocation36_spill] sm:$0xff] }
 0x291   : > { %v9650_v14 = vpop.eup %7493  ;;  %7519 = vrcp.f32 %v3507_v7  ;;  %v3842_v13 = vmul.f32 %v7492_v8, %v10999_v35  ;;  %5147 = vst [vmem:[%s9527_s22 + $0xb8] sm:$0xff] %v3859_v30  ;;  %v3473_v51 = vpop.xlane.xlu0 %3472  ;;  %6967 = vmatpush3.msra.mxu0 %v795_v63  ;;  %v11003_v8 = vld [vmem:[#allocation98_spill] sm:$0xff]  ;;  %7022 = vmatprep.subr.mxu1 %v811_v4  ;;  %v11005_v7 = vld [vmem:[#allocation65_spill] sm:$0xff]  ;;  %v3328_v21 = vmul.f32 1.442695, %v3134_v23 }
 0x292   : > { %v7496_v19 = vpop.eup %7495  ;;  %7521 = vpow2.f32 %v3324_v9  ;;  %v3150_v12 = vsub.f32 %v11004_v43, %v11003_v8  ;;  %6968 = vmatprep.subr.mxu0 %v794_v61  ;;  %v11010_v8 = vld [vmem:[#allocation102_spill] sm:$0xff]  ;;  %v11011_v43 = vld [vmem:[#allocation37_spill] sm:$0xff]  ;;  %7023 = vmatpush3.msra.mxu1 %v811_v4 }
 0x293   : > { %v9658_v6 = vpop.eup %7497  ;;  %7523 = vrcp.f32 %v3473_v51  ;;  %3572 = vadd.xlane.f32.xlu1 %v9650_v14  ;;  %6881 = vmatprep.mubr.f32.mxu0 %v3842_v13  ;;  %5130 = vst [vmem:[%s9527_s22 + $0x30] sm:$0xff] %v3842_v13  ;;  %v3858_v50 = vmul.f32 %v7496_v19, %v11002_v60  ;;  %v793_v13 = vld [vmem:[%s9018_s13 + $0x130] sm:$0xff]  ;;  %v11006_v19 = vld [vmem:[#allocation100_spill] sm:$0xff] }
 0x294   : > { %v7500_v9 = vpop.eup %7499  ;;  %7525 = vpow2.f32 %v3356_v49  ;;  %v3505_v34 = vpop.xlane.xlu1 %3504  ;;  %6882 = vmatmul.mubr.f32.gmra.mxu0 %v3843_v33  ;;  %3546 = vadd.xlane.f32.xlu0 %v9658_v6  ;;  %v3137_v32 = vsub.f32 %v11007_v36, %v11006_v19  ;;  %v810_v51 = vld [vmem:[%s9018_s13 + $0x1b8] sm:$0xff]  ;;  %v3360_v23 = vmul.f32 1.442695, %v3150_v12  ;;  %v11013_v19 = vld [vmem:[#allocation67_spill] sm:$0xff] }
 0x295   : > { %v9666_v63 = vpop.eup %7501  ;;  %7527 = vrcp.f32 %v3505_v34  ;;  %6937 = vmatprep.mubr.f32.mxu1 %v3858_v50  ;;  %5146 = vst [vmem:[%s9527_s22 + $0xb0] sm:$0xff] %v3858_v50  ;;  %v3845_v35 = vmul.f32 %v7500_v9, %v11005_v7  ;;  %v3479_v33 = vpop.xlane.xlu0 %3478  ;;  %v11009_v50 = vld [vmem:[#allocation66_spill] sm:$0xff]  ;;  %6969 = vmatpush3.msra.mxu0 %v794_v61  ;;  %v809_v61 = vld [vmem:[%s9018_s13 + $0x1b0] sm:$0xff] }
 0x296   : > { %v7504_v49 = vpop.eup %7503  ;;  %7529 = vpow2.f32 %v3330_v2  ;;  %6938 = vmatmul.mubr.f32.gmra.mxu1 %v3859_v30  ;;  %v3153_v30 = vsub.f32 %v11011_v43, %v11010_v8  ;;  %6970 = vmatprep.subr.mxu0 %v793_v13  ;;  %v3334_v12 = vmul.f32 1.442695, %v3137_v32 }
 0x297   : > { %v9675_v60 = vpop.eup %7505  ;;  %7531 = vrcp.f32 %v3479_v33  ;;  %3578 = vadd.xlane.f32.xlu1 %v9666_v63  ;;  %5133 = vst [vmem:[%s9527_s22 + $0x48] sm:$0xff] %v3845_v35  ;;  %v3861_v9 = vmul.f32 %v7504_v49, %v11009_v50  ;;  %7024 = vmatprep.subr.mxu1 %v810_v51  ;;  %v11014_v49 = vld [vmem:[#allocation104_spill] sm:$0xff]  ;;  %v11015_v33 = vld [vmem:[#allocation38_spill] sm:$0xff] }
 0x298   : > { %11008 = vst [vmem:[#allocation12_spill] sm:$0xff] %v9675_v60  ;;  %v7508_v2 = vpop.eup %7507  ;;  %7533 = vpow2.f32 %v3362_v11  ;;  %v3511_v34 = vpop.xlane.xlu1 %3510  ;;  %3544 = vadd.xlane.f32.xlu0 %v9675_v60  ;;  %v3136_v50 = vsub.f32 %v11015_v33, %v11014_v49  ;;  %7025 = vmatpush3.msra.mxu1 %v810_v51  ;;  %v3366_v32 = vmul.f32 1.442695, %v3153_v30  ;;  %v11019_v49 = vld [vmem:[#allocation39_spill] sm:$0xff]  ;;  %v11025_v60 = vld [vmem:[#allocation41_spill] sm:$0xff] }
 0x299   : > { %v9682_v7 = vpop.eup %7509  ;;  %7535 = vrcp.f32 %v3511_v34  ;;  %v3844_v36 = vmul.f32 %v7508_v2, %v11013_v19  ;;  %5149 = vst [vmem:[%s9527_s22 + $0xc8] sm:$0xff] %v3861_v9  ;;  %v3477_v4 = vpop.xlane.xlu0 %3476  ;;  %6971 = vmatpush3.msra.mxu0 %v793_v13  ;;  %v11017_v2 = vld [vmem:[#allocation68_spill] sm:$0xff]  ;;  %v792_v34 = vld [vmem:[%s9018_s13 + $0x128] sm:$0xff]  ;;  %7026 = vmatprep.subr.mxu1 %v809_v61 }
 0x29a   : > { %11012 = vst [vmem:[#allocation13_spill] sm:$0xff] %v9682_v7  ;;  %v7512_v11 = vpop.eup %7511  ;;  %7537 = vpow2.f32 %v3328_v21  ;;  %v11018_v19 = vld [vmem:[#allocation106_spill] sm:$0xff]  ;;  %v3332_v30 = vmul.f32 1.442695, %v3136_v50  ;;  %6972 = vmatprep.subr.mxu0 %v792_v34  ;;  %7027 = vmatpush3.msra.mxu1 %v809_v61 }
 0x29b   : > { %v9690_v8 = vpop.eup %7513  ;;  %7539 = vrcp.f32 %v3477_v4  ;;  %3576 = vadd.xlane.f32.xlu1 %v9682_v7  ;;  %6884 = vmatprep.mubr.f32.mxu0 %v3844_v36  ;;  %5132 = vst [vmem:[%s9527_s22 + $0x40] sm:$0xff] %v3844_v36  ;;  %v3860_v43 = vmul.f32 %v7512_v11, %v11017_v2  ;;  %v3152_v33 = vsub.f32 %v11019_v49, %v11018_v19  ;;  %v11020_v36 = vld [vmem:[#allocation69_spill] sm:$0xff]  ;;  %v808_v19 = vld [vmem:[%s9018_s13 + $0x1a8] sm:$0xff]  ;;  %v11021_v49 = vld [vmem:[#allocation108_spill] sm:$0xff] }
 0x29c   : > { %11016 = vst [vmem:[#allocation14_spill] sm:$0xff] %v9690_v8  ;;  %v7516_v21 = vpop.eup %7515  ;;  %7541 = vpow2.f32 %v3360_v23  ;;  %v3509_v51 = vpop.xlane.xlu1 %3508  ;;  %6885 = vmatmul.mubr.f32.gmra.mxu0 %v3845_v35  ;;  %3582 = vadd.xlane.f32.xlu0 %v9690_v8  ;;  %v791_v4 = vld [vmem:[%s9018_s13 + $0x120] sm:$0xff]  ;;  %v11022_v7 = vld [vmem:[#allocation40_spill] sm:$0xff]  ;;  %v11024_v8 = vld [vmem:[#allocation110_spill] sm:$0xff] }
 0x29d   : > { %v9698_v13 = vpop.eup %7517  ;;  %7543 = vrcp.f32 %v3509_v51  ;;  %6940 = vmatprep.mubr.f32.mxu1 %v3860_v43  ;;  %5148 = vst [vmem:[%s9527_s22 + $0xc0] sm:$0xff] %v3860_v43  ;;  %v3847_v11 = vmul.f32 %v7516_v21, %v11020_v36  ;;  %v3483_v2 = vpop.xlane.xlu0 %3482  ;;  %v3139_v51 = vsub.f32 %v11022_v7, %v11021_v49  ;;  %v11023_v43 = vld [vmem:[#allocation70_spill] sm:$0xff]  ;;  %6973 = vmatpush3.msra.mxu0 %v792_v34  ;;  %v807_v34 = vld [vmem:[%s9018_s13 + $0x1a0] sm:$0xff] }
 0x29e   : > { %v7520_v23 = vpop.eup %7519  ;;  %7545 = vpow2.f32 %v3334_v12  ;;  %6941 = vmatmul.mubr.f32.gmra.mxu1 %v3861_v9  ;;  %v3364_v9 = vmul.f32 1.442695, %v3152_v33  ;;  %6974 = vmatprep.subr.mxu0 %v791_v4  ;;  %v3155_v7 = vsub.f32 %v11025_v60, %v11024_v8  ;;  %v11028_v60 = vld [vmem:[#allocation42_spill] sm:$0xff] }
 0x29f   : > { %v9705_v35 = vpop.eup %7521  ;;  %7547 = vrcp.f32 %v3483_v2  ;;  %3614 = vadd.xlane.f32.xlu1 %v9698_v13  ;;  %5135 = vst [vmem:[%s9527_s22 + $0x58] sm:$0xff] %v3847_v11  ;;  %v3863_v21 = vmul.f32 %v7520_v23, %v11023_v43  ;;  %v11026_v2 = vld [vmem:[#allocation71_spill] sm:$0xff]  ;;  %7028 = vmatprep.subr.mxu1 %v808_v19  ;;  %v3338_v23 = vmul.f32 1.442695, %v3139_v51  ;;  %v3138_v8 = vsub.f32 %v11028_v60, %v9370_v18  ;;  %v11029_v43 = vld [vmem:[#allocation72_spill] sm:$0xff] }
 0x2a0   : > { %v7524_v12 = vpop.eup %7523  ;;  %7549 = vpow2.f32 %v3366_v32  ;;  %v3515_v50 = vpop.xlane.xlu1 %3514  ;;  %3580 = vadd.xlane.f32.xlu0 %v9705_v35  ;;  %7029 = vmatpush3.msra.mxu1 %v808_v19  ;;  %v3370_v51 = vmul.f32 1.442695, %v3155_v7  ;;  %v11031_v18 = vld [vmem:[#allocation43_spill] sm:$0xff] }
 0x2a1   : > { %v9712_v36 = vpop.eup %7525  ;;  %7551 = vrcp.f32 %v3515_v50  ;;  %v3846_v49 = vmul.f32 %v7524_v12, %v11026_v2  ;;  %5151 = vst [vmem:[%s9527_s22 + $0xd8] sm:$0xff] %v3863_v21  ;;  %v3481_v33 = vpop.xlane.xlu0 %3480  ;;  %6975 = vmatpush3.msra.mxu0 %v791_v4  ;;  %v790_v50 = vld [vmem:[%s9018_s13 + $0x118] sm:$0xff]  ;;  %7030 = vmatprep.subr.mxu1 %v807_v34  ;;  %v3154_v2 = vsub.f32 %v11031_v18, %v9375_v38  ;;  %v3336_v7 = vmul.f32 1.442695, %v3138_v8  ;;  %v11037_v8 = vld [vmem:[#allocation45_spill] sm:$0xff] }
 0x2a2   : > { %v7528_v32 = vpop.eup %7527  ;;  %7553 = vpow2.f32 %v3332_v30  ;;  %6976 = vmatprep.subr.mxu0 %v790_v50  ;;  %v11034_v38 = vld [vmem:[#allocation44_spill] sm:$0xff]  ;;  %7031 = vmatpush3.msra.mxu1 %v807_v34 }
 0x2a3   : > { %v9720_v61 = vpop.eup %7529  ;;  %7555 = vrcp.f32 %v3481_v33  ;;  %3612 = vadd.xlane.f32.xlu1 %v9712_v36  ;;  %6887 = vmatprep.mubr.f32.mxu0 %v3846_v49  ;;  %5134 = vst [vmem:[%s9527_s22 + $0x50] sm:$0xff] %v3846_v49  ;;  %v3862_v12 = vmul.f32 %v7528_v32, %v11029_v43  ;;  %v11032_v49 = vld [vmem:[#allocation73_spill] sm:$0xff]  ;;  %v789_v33 = vld [vmem:[%s9018_s13 + $0x110] sm:$0xff] }
 0x2a4   : > { %11027 = vst [vmem:[#allocation15_spill] sm:$0xff] %v9720_v61  ;;  %v7532_v30 = vpop.eup %7531  ;;  %7557 = vpow2.f32 %v3364_v9  ;;  %v3513_v19 = vpop.xlane.xlu1 %3512  ;;  %6888 = vmatmul.mubr.f32.gmra.mxu0 %v3847_v11  ;;  %3586 = vadd.xlane.f32.xlu0 %v9720_v61  ;;  %v806_v11 = vld [vmem:[%s9018_s13 + $0x198] sm:$0xff]  ;;  %v3157_v61 = vsub.f32 %v11037_v8, %v9387_v62  ;;  %v11039_v62 = vld [vmem:[#allocation46_spill] sm:$0xff] }
 0x2a5   : > { %v9728_v4 = vpop.eup %7533  ;;  %7559 = vrcp.f32 %v3513_v19  ;;  %6943 = vmatprep.mubr.f32.mxu1 %v3862_v12  ;;  %5150 = vst [vmem:[%s9527_s22 + $0xd0] sm:$0xff] %v3862_v12  ;;  %v3849_v32 = vmul.f32 %v7532_v30, %v11032_v49  ;;  %v9736_v60 = vpop.xlane.xlu0 %3006  ;;  %v3141_v19 = vsub.f32 %v11034_v38, %v9380_v20  ;;  %v11035_v12 = vld [vmem:[#allocation74_spill] sm:$0xff]  ;;  %6977 = vmatpush3.msra.mxu0 %v790_v50  ;;  %v11038_v20 = vld [vmem:[#allocation75_spill] sm:$0xff] }
 0x2a6   : > { %11030 = vst [vmem:[#allocation16_spill] sm:$0xff] %v9728_v4  ;;  %v7536_v9 = vpop.eup %7535  ;;  %6944 = vmatmul.mubr.f32.gmra.mxu1 %v3863_v21  ;;  %7561 = vpow2.f32 %v3338_v23  ;;  %6978 = vmatprep.subr.mxu0 %v789_v33  ;;  %v3368_v23 = vmul.f32 1.442695, %v3154_v2  ;;  %v805_v50 = vld [vmem:[%s9018_s13 + $0x190] sm:$0xff]  ;;  %v3140_v2 = vsub.f32 %v11039_v62, %v9394_v56 }
 0x2a7   : > { %v9739_v43 = vpop.eup %7537  ;;  %3618 = vadd.xlane.f32.xlu1 %v9728_v4  ;;  %5137 = vst [vmem:[%s9527_s22 + $0x68] sm:$0xff] %v3849_v32  ;;  %v3865_v30 = vmul.f32 %v7536_v9, %v11035_v12  ;;  %7563 = vpow2.f32 %v3370_v51  ;;  %7032 = vmatprep.subr.mxu1 %v806_v11  ;;  %v3342_v51 = vmul.f32 1.442695, %v3141_v19  ;;  %v11042_v56 = vld [vmem:[#allocation47_spill] sm:$0xff]  ;;  %v11043_v19 = vld [vmem:[#allocation77_spill] sm:$0xff] }
 0x2a8   : > { %11033 = vst [vmem:[#allocation17_spill] sm:$0xff] %v9739_v43  ;;  %v7540_v21 = vpop.eup %7539  ;;  %v9746_v18 = vpop.xlane.xlu1 %3038  ;;  %3584 = vadd.xlane.f32.xlu0 %v9739_v43  ;;  %7033 = vmatpush3.msra.mxu1 %v806_v11  ;;  %7565 = vpow2.f32 %v3336_v7  ;;  %v3374_v11 = vmul.f32 1.442695, %v3157_v61  ;;  %v3156_v7 = vsub.f32 %v11042_v56, %v9399_v41  ;;  %v3340_v61 = vmul.f32 1.442695, %v3140_v2  ;;  %v11045_v41 = vld [vmem:[#allocation48_spill] sm:$0xff] }
 0x2a9   : > { %v9748_v49 = vpop.eup %7541  ;;  %v3848_v38 = vmul.f32 %v7540_v21, %v11038_v20  ;;  %5153 = vst [vmem:[%s9527_s22 + $0xe8] sm:$0xff] %v3865_v30  ;;  %v9756_v12 = vpop.xlane.xlu0 %3004  ;;  %6979 = vmatpush3.msra.mxu0 %v789_v33  ;;  %v11040_v21 = vld [vmem:[#allocation76_spill] sm:$0xff]  ;;  %v788_v20 = vld [vmem:[%s9018_s13 + $0x108] sm:$0xff]  ;;  %7034 = vmatprep.subr.mxu1 %v805_v50  ;;  %7567 = vpow2.f32 %v3368_v23  ;;  %v3143_v23 = vsub.f32 %v11045_v41, %v9404_v26  ;;  %v11047_v2 = vld [vmem:[#allocation49_spill] sm:$0xff] }
 0x2aa   : > { %11036 = vst [vmem:[#allocation18_spill] sm:$0xff] %v9748_v49  ;;  %v7544_v9 = vpop.eup %7543  ;;  %6980 = vmatprep.subr.mxu0 %v788_v20  ;;  %7569 = vpow2.f32 %v3342_v51  ;;  %7035 = vmatpush3.msra.mxu1 %v805_v50  ;;  %v3372_v51 = vmul.f32 1.442695, %v3156_v7  ;;  %v3159_v26 = vsub.f32 %v11047_v2, %v9411_v40  ;;  %v11048_v41 = vld [vmem:[#allocation79_spill] sm:$0xff]  ;;  %v11050_v40 = vld [vmem:[#allocation80_spill] sm:$0xff] }
 0x2ab   : > { %v9758_v34 = vpop.eup %7545  ;;  %3616 = vadd.xlane.f32.xlu1 %v9748_v49  ;;  %6890 = vmatprep.mubr.f32.mxu0 %v3848_v38  ;;  %5136 = vst [vmem:[%s9527_s22 + $0x60] sm:$0xff] %v3848_v38  ;;  %v3864_v8 = vmul.f32 %v7544_v9, %v11040_v21  ;;  %v787_v9 = vld [vmem:[%s9018_s13 + $0x100] sm:$0xff]  ;;  %7571 = vpow2.f32 %v3374_v11  ;;  %v3346_v50 = vmul.f32 1.442695, %v3143_v23  ;;  %v11049_v11 = vld [vmem:[#allocation50_spill] sm:$0xff]  ;;  %v9804_v2 = vld [vmem:[%s9018_s13 + $0x278] sm:$0xff] }
 0x2ac   : > { %v7548_v43 = vpop.eup %7547  ;;  %v9766_v4 = vpop.xlane.xlu1 %3036  ;;  %6891 = vmatmul.mubr.f32.gmra.mxu0 %v3849_v32  ;;  %3590 = vadd.xlane.f32.xlu0 %v9758_v34  ;;  %v804_v32 = vld [vmem:[%s9018_s13 + $0x188] sm:$0xff]  ;;  %7573 = vpow2.f32 %v3340_v61  ;;  %v3142_v7 = vsub.f32 %v11049_v11, %v9418_v3  ;;  %v11054_v11 = vld [vmem:[#allocation53_spill] sm:$0xff] }
 0x2ad   : > { %v9768_v33 = vpop.eup %7549  ;;  %6946 = vmatprep.mubr.f32.mxu1 %v3864_v8  ;;  %5152 = vst [vmem:[%s9527_s22 + $0xe0] sm:$0xff] %v3864_v8  ;;  %v3851_v38 = vmul.f32 %v7548_v43, %v11043_v19  ;;  %v9776_v21 = vpop.xlane.xlu0 %3010  ;;  %v11046_v43 = vld [vmem:[#allocation78_spill] sm:$0xff]  ;;  %6981 = vmatpush3.msra.mxu0 %v788_v20  ;;  %v803_v20 = vld [vmem:[%s9018_s13 + $0x180] sm:$0xff]  ;;  %7575 = vpow2.f32 %v3372_v51  ;;  %v11052_v51 = vld [vmem:[#allocation52_spill] sm:$0xff] }
 0x2ae   : > { %11041 = vst [vmem:[#allocation19_spill] sm:$0xff] %v9768_v33  ;;  %v7552_v62 = vpop.eup %7551  ;;  %6947 = vmatmul.mubr.f32.gmra.mxu1 %v3865_v30  ;;  %6982 = vmatprep.subr.mxu0 %v787_v9  ;;  %7577 = vpow2.f32 %v3346_v50 }
 0x2af   : > { %v9779_v49 = vpop.eup %7553  ;;  %3622 = vadd.xlane.f32.xlu1 %v9768_v33  ;;  %5139 = vst [vmem:[%s9527_s22 + $0x78] sm:$0xff] %v3851_v38  ;;  %v3867_v8 = vmul.f32 %v7552_v62, %v11046_v43  ;;  %7036 = vmatprep.subr.mxu1 %v804_v32 }
 0x2b0   : > { %11044 = vst [vmem:[#allocation20_spill] sm:$0xff] %v9779_v49  ;;  %v7556_v30 = vpop.eup %7555  ;;  %v9786_v56 = vpop.xlane.xlu1 %3042  ;;  %3588 = vadd.xlane.f32.xlu0 %v9779_v49  ;;  %7037 = vmatpush3.msra.mxu1 %v804_v32  ;;  %v11051_v32 = vld [vmem:[#allocation51_spill] sm:$0xff] }
 0x2b1   : > { %v9788_v19 = vpop.eup %7557  ;;  %v3850_v33 = vmul.f32 %v7556_v30, %v11048_v41  ;;  %5155 = vst [vmem:[%s9527_s22 + $0xf8] sm:$0xff] %v3867_v8  ;;  %v9796_v43 = vpop.xlane.xlu0 %3008  ;;  %6983 = vmatpush3.msra.mxu0 %v787_v9  ;;  %7038 = vmatprep.subr.mxu1 %v803_v20  ;;  %v3378_v9 = vmul.f32 1.442695, %v3159_v26  ;;  %v3158_v3 = vsub.f32 %v11051_v32, %v9425_v52 }
 0x2b2   : > { %v7560_v62 = vpop.eup %7559  ;;  %7064 = vmatprep.subr.mxu0 %v9804_v2  ;;  %v3145_v26 = vsub.f32 %v11052_v51, %v9432_v42  ;;  %7039 = vmatpush3.msra.mxu1 %v803_v20  ;;  %v11056_v20 = vld [vmem:[#allocation123_spill] sm:$0xff] }
 0x2b3   : > { %3620 = vadd.xlane.f32.xlu1 %v9788_v19  ;;  %6893 = vmatprep.mubr.f32.mxu0 %v3850_v33  ;;  %5138 = vst [vmem:[%s9527_s22 + $0x70] sm:$0xff] %v3850_v33  ;;  %v3866_v30 = vmul.f32 %v7560_v62, %v11050_v40  ;;  %v9806_v41 = vpop.eup %7561  ;;  %v9815_v33 = vld [vmem:[%s9018_s13 + $0x2f8] sm:$0xff]  ;;  %7579 = vpow2.f32 %v3378_v9  ;;  %v3161_v40 = vsub.f32 %v11054_v11, %v9439_v53  ;;  %v11059_v53 = vld [vmem:[#allocation55_spill] sm:$0xff] }
 0x2b4   : > { %v9808_v49 = vpop.xlane.xlu1 %3040  ;;  %6894 = vmatmul.mubr.f32.gmra.mxu0 %v3851_v38  ;;  %3594 = vadd.xlane.f32.xlu0 %v9806_v41  ;;  %v9817_v61 = vpop.eup %7563  ;;  %v3344_v38 = vmul.f32 1.442695, %v3142_v7  ;;  %v3350_v42 = vmul.f32 1.442695, %v3145_v26  ;;  %v3160_v11 = vsub.f32 %v11059_v53, %v9461_v1  ;;  %v11063_v1 = vld [vmem:[#allocation57_spill] sm:$0xff] }
 0x2b5   : > { %6949 = vmatprep.mubr.f32.mxu1 %v3866_v30  ;;  %5154 = vst [vmem:[%s9527_s22 + $0xf0] sm:$0xff] %v3866_v30  ;;  %v9819_v23 = vpop.xlane.xlu0 %3014  ;;  %v9825_v52 = vpop.eup %7565  ;;  %7120 = vmatprep.subr.mxu1 %v9815_v33  ;;  %v11057_v30 = vld [vmem:[#allocation54_spill] sm:$0xff]  ;;  %v3163_v53 = vsub.f32 %v11063_v1, %v9485_v54  ;;  %v11067_v54 = vld [vmem:[#allocation59_spill] sm:$0xff] }
 0x2b6   : > { %6950 = vmatmul.mubr.f32.gmra.mxu1 %v3867_v8  ;;  %11053 = vst [vmem:[#allocation21_spill] sm:$0xff] %v9825_v52  ;;  %v3376_v8 = vmul.f32 1.442695, %v3158_v3  ;;  %v9833_v50 = vpop.eup %7567  ;;  %7581 = vpow2.f32 %v3344_v38  ;;  %v3144_v32 = vsub.f32 %v11057_v30, %v11056_v20  ;;  %v3382_v3 = vmul.f32 1.442695, %v3161_v40  ;;  %v11061_v20 = vld [vmem:[#allocation56_spill] sm:$0xff] }
 0x2b7   : > { %3626 = vadd.xlane.f32.xlu1 %v9817_v61  ;;  %11055 = vst [vmem:[#allocation22_spill] sm:$0xff] %v9833_v50  ;;  %v9840_v51 = vpop.eup %7569  ;;  %v3147_v30 = vsub.f32 %v11061_v20, %v9478_v55  ;;  %v3380_v40 = vmul.f32 1.442695, %v3160_v11  ;;  %v11065_v55 = vld [vmem:[#allocation58_spill] sm:$0xff]  ;;  %v3386_v11 = vmul.f32 1.442695, %v3163_v53  ;;  %v3162_v1 = vsub.f32 %v11067_v54, %v9514_v37 }
 0x2b8   : > { %v9827_v62 = vpop.xlane.xlu1 %3046  ;;  %3592 = vadd.xlane.f32.xlu0 %v9825_v52  ;;  %11058 = vst [vmem:[#allocation23_spill] sm:$0xff] %v9840_v51  ;;  %7583 = vpow2.f32 %v3376_v8  ;;  %v9847_v52 = vpop.eup %7571  ;;  %v3348_v26 = vmul.f32 1.442695, %v3144_v32  ;;  %v3146_v20 = vsub.f32 %v11065_v55, %v9505_v0  ;;  %v11069_v0 = vld [vmem:[#allocation81_spill] sm:$0xff]  ;;  %v11071_v37 = vld [vmem:[#allocation82_spill] sm:$0xff] }
 0x2b9   : > { %v9835_v7 = vpop.xlane.xlu0 %3012  ;;  %11060 = vst [vmem:[#allocation24_spill] sm:$0xff] %v9847_v52  ;;  %7585 = vpow2.f32 %v3350_v42  ;;  %v3354_v32 = vmul.f32 1.442695, %v3147_v30  ;;  %v3165_v55 = vsub.f32 %v11069_v0, %v9736_v60  ;;  %v3384_v53 = vmul.f32 1.442695, %v3162_v1  ;;  %v11073_v60 = vld [vmem:[#allocation83_spill] sm:$0xff] }
 0x2ba   : > { %7587 = vpow2.f32 %v3382_v3  ;;  %v3352_v30 = vmul.f32 1.442695, %v3146_v20  ;;  %v3181_v54 = vsub.f32 %v11071_v37, %v9746_v18  ;;  %v3164_v0 = vsub.f32 %v11073_v60, %v9756_v12  ;;  %v11075_v18 = vld [vmem:[#allocation84_spill] sm:$0xff]  ;;  %v11077_v12 = vld [vmem:[#allocation85_spill] sm:$0xff] }
 0x2bb   : > { %3624 = vadd.xlane.f32.xlu1 %v9833_v50  ;;  %v9854_v50 = vpop.eup %7573  ;;  %7589 = vpow2.f32 %v3348_v26  ;;  %v3390_v20 = vmul.f32 1.442695, %v3165_v55  ;;  %v3180_v37 = vsub.f32 %v11075_v18, %v9766_v4  ;;  %v3167_v60 = vsub.f32 %v11077_v12, %v9776_v21  ;;  %v11079_v4 = vld [vmem:[#allocation86_spill] sm:$0xff]  ;;  %v11081_v21 = vld [vmem:[#allocation87_spill] sm:$0xff] }
 0x2bc   : > { %v9842_v9 = vpop.xlane.xlu1 %3044  ;;  %3598 = vadd.xlane.f32.xlu0 %v9840_v51  ;;  %11062 = vst [vmem:[#allocation25_spill] sm:$0xff] %v9854_v50  ;;  %v9861_v51 = vpop.eup %7575  ;;  %7591 = vpow2.f32 %v3380_v40  ;;  %v3422_v1 = vmul.f32 1.442695, %v3181_v54  ;;  %v3388_v55 = vmul.f32 1.442695, %v3164_v0  ;;  %v3183_v18 = vsub.f32 %v11079_v4, %v9786_v56  ;;  %v11083_v56 = vld [vmem:[#allocation88_spill] sm:$0xff] }
 0x2bd   : > { %v9849_v38 = vpop.xlane.xlu0 %3018  ;;  %11064 = vst [vmem:[#allocation26_spill] sm:$0xff] %v9861_v51  ;;  %7593 = vpow2.f32 %v3354_v32  ;;  %v3420_v54 = vmul.f32 1.442695, %v3180_v37  ;;  %v3394_v0 = vmul.f32 1.442695, %v3167_v60  ;;  %v3166_v12 = vsub.f32 %v11081_v21, %v9796_v43  ;;  %v11085_v43 = vld [vmem:[#allocation89_spill] sm:$0xff] }
 0x2be   : > { %7595 = vpow2.f32 %v3386_v11  ;;  %v3426_v37 = vmul.f32 1.442695, %v3183_v18  ;;  %v3182_v4 = vsub.f32 %v11083_v56, %v9808_v49  ;;  %v3169_v21 = vsub.f32 %v11085_v43, %v9819_v23  ;;  %v11087_v49 = vld [vmem:[#allocation91_spill] sm:$0xff]  ;;  %v11089_v23 = vld [vmem:[#allocation93_spill] sm:$0xff] }
 0x2bf   : > { %3630 = vadd.xlane.f32.xlu1 %v9847_v52  ;;  %v9868_v52 = vpop.eup %7577  ;;  %7597 = vpow2.f32 %v3352_v30  ;;  %v3392_v60 = vmul.f32 1.442695, %v3166_v12  ;;  %v3185_v56 = vsub.f32 %v11087_v49, %v9827_v62  ;;  %v3168_v43 = vsub.f32 %v11089_v23, %v9835_v7  ;;  %v11091_v62 = vld [vmem:[#allocation95_spill] sm:$0xff]  ;;  %v11092_v7 = vld [vmem:[#allocation97_spill] sm:$0xff] }
 0x2c0   : > { %v9856_v8 = vpop.xlane.xlu1 %3050  ;;  %3596 = vadd.xlane.f32.xlu0 %v9854_v50  ;;  %11066 = vst [vmem:[#allocation27_spill] sm:$0xff] %v9868_v52  ;;  %v9875_v50 = vpop.eup %7579  ;;  %7599 = vpow2.f32 %v3384_v53  ;;  %v3424_v18 = vmul.f32 1.442695, %v3182_v4  ;;  %v3398_v12 = vmul.f32 1.442695, %v3169_v21  ;;  %v3184_v49 = vsub.f32 %v11091_v62, %v9842_v9  ;;  %v11094_v9 = vld [vmem:[#allocation99_spill] sm:$0xff] }
 0x2c1   : > { %v9863_v42 = vpop.xlane.xlu0 %3016  ;;  %11068 = vst [vmem:[#allocation28_spill] sm:$0xff] %v9875_v50  ;;  %7601 = vpow2.f32 %v3390_v20  ;;  %v3430_v4 = vmul.f32 1.442695, %v3185_v56  ;;  %v3396_v21 = vmul.f32 1.442695, %v3168_v43  ;;  %v3171_v23 = vsub.f32 %v11092_v7, %v9849_v38  ;;  %v11096_v43 = vld [vmem:[#allocation101_spill] sm:$0xff] }
 0x2c2   : > { %7603 = vpow2.f32 %v3422_v1  ;;  %v3428_v56 = vmul.f32 1.442695, %v3184_v49  ;;  %v3187_v62 = vsub.f32 %v11094_v9, %v9856_v8  ;;  %v3170_v7 = vsub.f32 %v11096_v43, %v9863_v42  ;;  %v11098_v49 = vld [vmem:[#allocation103_spill] sm:$0xff] }
 0x2c3   : > { %3628 = vadd.xlane.f32.xlu1 %v9861_v51  ;;  %v9882_v51 = vpop.eup %7581  ;;  %7605 = vpow2.f32 %v3388_v55  ;;  %v3402_v38 = vmul.f32 1.442695, %v3171_v23  ;;  %v11101_v43 = vld [vmem:[#allocation107_spill] sm:$0xff] }
 0x2c4   : > { %v9870_v3 = vpop.xlane.xlu1 %3048  ;;  %3602 = vadd.xlane.f32.xlu0 %v9868_v52  ;;  %11070 = vst [vmem:[#allocation29_spill] sm:$0xff] %v9882_v51  ;;  %7607 = vpow2.f32 %v3420_v54  ;;  %v3434_v8 = vmul.f32 1.442695, %v3187_v62  ;;  %v3400_v42 = vmul.f32 1.442695, %v3170_v7 }
 0x2c5   : > { %v9877_v26 = vpop.xlane.xlu0 %3022  ;;  %v9889_v52 = vpop.eup %7583  ;;  %7609 = vpow2.f32 %v3394_v0  ;;  %v3186_v9 = vsub.f32 %v11098_v49, %v9870_v3  ;;  %v11103_v49 = vld [vmem:[#allocation109_spill] sm:$0xff] }
 0x2c6   : > { %11072 = vst [vmem:[#allocation30_spill] sm:$0xff] %v9889_v52  ;;  %7611 = vpow2.f32 %v3426_v37 }
 0x2c7   : > { %3634 = vadd.xlane.f32.xlu1 %v9875_v50  ;;  %v9896_v50 = vpop.eup %7585  ;;  %7613 = vpow2.f32 %v3392_v60  ;;  %v3432_v3 = vmul.f32 1.442695, %v3186_v9 }
 0x2c8   : > { %v9884_v40 = vpop.xlane.xlu1 %3054  ;;  %3600 = vadd.xlane.f32.xlu0 %v9882_v51  ;;  %11074 = vst [vmem:[#allocation60_spill] sm:$0xff] %v9896_v50  ;;  %v9903_v51 = vpop.eup %7587  ;;  %7615 = vpow2.f32 %v3424_v18 }
 0x2c9   : > { %v9891_v32 = vpop.xlane.xlu0 %3020  ;;  %11076 = vst [vmem:[#allocation90_spill] sm:$0xff] %v9903_v51  ;;  %7617 = vpow2.f32 %v3398_v12 }
 0x2cb   : > { %3632 = vadd.xlane.f32.xlu1 %v9889_v52  ;;  %v9910_v52 = vpop.eup %7589 }
 0x2cc   : > { %v9898_v11 = vpop.xlane.xlu1 %3052  ;;  %3606 = vadd.xlane.f32.xlu0 %v9896_v50  ;;  %11078 = vst [vmem:[#allocation31_spill] sm:$0xff] %v9910_v52  ;;  %v9917_v50 = vpop.eup %7591 }
 0x2cd   : > { %v9905_v30 = vpop.xlane.xlu0 %3026  ;;  %11080 = vst [vmem:[#allocation61_spill] sm:$0xff] %v9917_v50 }
 0x2cf   : > { %3638 = vadd.xlane.f32.xlu1 %v9903_v51  ;;  %v9924_v51 = vpop.eup %7593 }
 0x2d0   : > { %v9912_v53 = vpop.xlane.xlu1 %3058  ;;  %3604 = vadd.xlane.f32.xlu0 %v9910_v52  ;;  %11082 = vst [vmem:[#allocation92_spill] sm:$0xff] %v9924_v51  ;;  %v9931_v52 = vpop.eup %7595 }
 0x2d1   : > { %v9919_v20 = vpop.xlane.xlu0 %3024  ;;  %11084 = vst [vmem:[#allocation32_spill] sm:$0xff] %v9931_v52 }
 0x2d3   : > { %3636 = vadd.xlane.f32.xlu1 %v9917_v50  ;;  %v9938_v50 = vpop.eup %7597 }
 0x2d4   : > { %v9926_v1 = vpop.xlane.xlu1 %3056  ;;  %3610 = vadd.xlane.f32.xlu0 %v9924_v51  ;;  %11086 = vst [vmem:[#allocation62_spill] sm:$0xff] %v9938_v50  ;;  %v9945_v51 = vpop.eup %7599 }
 0x2d5   : > { %v9933_v55 = vpop.xlane.xlu0 %3030  ;;  %11088 = vst [vmem:[#allocation94_spill] sm:$0xff] %v9945_v51 }
 0x2d7   : > { %3642 = vadd.xlane.f32.xlu1 %v9931_v52  ;;  %v9952_v52 = vpop.eup %7601 }
 0x2d8   : > { %v9940_v54 = vpop.xlane.xlu1 %3062  ;;  %3608 = vadd.xlane.f32.xlu0 %v9938_v50  ;;  %11090 = vst [vmem:[#allocation33_spill] sm:$0xff] %v9952_v52  ;;  %v9959_v50 = vpop.eup %7603 }
 0x2d9   : > { %v9947_v0 = vpop.xlane.xlu0 %3028 }
 0x2db   : > { %3640 = vadd.xlane.f32.xlu1 %v9945_v51  ;;  %v9964_v51 = vpop.eup %7605 }
 0x2dc   : > { %v9954_v37 = vpop.xlane.xlu1 %3060  ;;  %3646 = vadd.xlane.f32.xlu0 %v9952_v52  ;;  %11093 = vst [vmem:[#allocation63_spill] sm:$0xff] %v9964_v51  ;;  %v9969_v52 = vpop.eup %7607 }
 0x2dd   : > { %v3519_v60 = vpop.xlane.xlu0 %3518  ;;  %11095 = vst [vmem:[#allocation96_spill] sm:$0xff] %v9969_v52 }
 0x2de   : > { %7619 = vrcp.f32 %v3519_v60  ;;  %v9976_v60 = vpop.eup %7609 }
 0x2df   : > { %3678 = vadd.xlane.f32.xlu1 %v9959_v50  ;;  %7621 = vpow2.f32 %v3430_v4  ;;  %11097 = vst [vmem:[#allocation34_spill] sm:$0xff] %v9976_v60 }
 0x2e0   : > { %v3551_v18 = vpop.xlane.xlu1 %3550  ;;  %3644 = vadd.xlane.f32.xlu0 %v9964_v51 }
 0x2e1   : > { %7623 = vrcp.f32 %v3551_v18  ;;  %v9971_v12 = vpop.xlane.xlu0 %3034  ;;  %v9983_v18 = vpop.eup %7611 }
 0x2e2   : > { %7625 = vpow2.f32 %v3396_v21  ;;  %11099 = vst [vmem:[#allocation64_spill] sm:$0xff] %v9983_v18  ;;  %v11100_v21 = vld [vmem:[#allocation105_spill] sm:$0xff] }
 0x2e3   : > { %3676 = vadd.xlane.f32.xlu1 %v9969_v52  ;;  %7627 = vpow2.f32 %v3428_v56  ;;  %v3173_v23 = vsub.f32 %v11100_v21, %v9877_v26  ;;  %v3189_v52 = vsub.f32 %v11101_v43, %v9884_v40  ;;  %v9990_v56 = vpop.eup %7613 }
 0x2e4   : > { %v9978_v4 = vpop.xlane.xlu1 %3066  ;;  %3650 = vadd.xlane.f32.xlu0 %v9976_v60  ;;  %7629 = vpow2.f32 %v3402_v38  ;;  %11102 = vst [vmem:[#allocation98_spill] sm:$0xff] %v9990_v56  ;;  %v3172_v60 = vsub.f32 %v11103_v49, %v9891_v32  ;;  %v9995_v26 = vpop.eup %7615  ;;  %v11108_v49 = vld [vmem:[#allocation120_spill] sm:$0xff] }
 0x2e5   : > { %v3517_v51 = vpop.xlane.xlu0 %3516  ;;  %11104 = vst [vmem:[#allocation35_spill] sm:$0xff] %v9995_v26  ;;  %v3406_v38 = vmul.f32 1.442695, %v3173_v23  ;;  %v3438_v40 = vmul.f32 1.442695, %v3189_v52  ;;  %v10000_v21 = vpop.eup %7617  ;;  %v11107_v52 = vld [vmem:[#allocation112_spill] sm:$0xff] }
 0x2e6   : > { %7631 = vrcp.f32 %v3517_v51  ;;  %11105 = vst [vmem:[#allocation65_spill] sm:$0xff] %v10000_v21  ;;  %v11106_v51 = vld [vmem:[#allocation111_spill] sm:$0xff]  ;;  %v3404_v43 = vmul.f32 1.442695, %v3172_v60  ;;  %v11109_v60 = vld [vmem:[#allocation113_spill] sm:$0xff] }
 0x2e7   : > { %3682 = vadd.xlane.f32.xlu1 %v9983_v18  ;;  %7633 = vpow2.f32 %v3434_v8  ;;  %v3188_v8 = vsub.f32 %v11106_v51, %v9898_v11  ;;  %v3191_v51 = vsub.f32 %v11109_v60, %v9912_v53 }
 0x2e8   : > { %v3549_v62 = vpop.xlane.xlu1 %3548  ;;  %3648 = vadd.xlane.f32.xlu0 %v9990_v56 }
 0x2e9   : > { %7635 = vrcp.f32 %v3549_v62  ;;  %v9997_v7 = vpop.xlane.xlu0 %3032 }
 0x2ea   : > { %7637 = vpow2.f32 %v3400_v42  ;;  %v3175_v42 = vsub.f32 %v11107_v52, %v9905_v30 }
 0x2eb   : > { %3680 = vadd.xlane.f32.xlu1 %v9995_v26  ;;  %v7620_v32 = vpop.eup %7619  ;;  %7639 = vpow2.f32 %v3432_v3  ;;  %v3436_v3 = vmul.f32 1.442695, %v3188_v8  ;;  %v3442_v8 = vmul.f32 1.442695, %v3191_v51 }
 0x2ec   : > { %v10004_v9 = vpop.xlane.xlu1 %3064  ;;  %3654 = vadd.xlane.f32.xlu0 %v10000_v21  ;;  %v10007_v23 = vpop.eup %7621  ;;  %7641 = vpow2.f32 %v3406_v38  ;;  %v3869_v26 = vmul.f32 %v7620_v32, %v11108_v49  ;;  %v11110_v38 = vld [vmem:[#allocation121_spill] sm:$0xff]  ;;  %v11111_v32 = vld [vmem:[#allocation114_spill] sm:$0xff] }
 0x2ed   : > { %v3523_v62 = vpop.xlane.xlu0 %3522  ;;  %7643 = vpow2.f32 %v3438_v40  ;;  %v3410_v40 = vmul.f32 1.442695, %v3175_v42  ;;  %v3174_v52 = vsub.f32 %v11111_v32, %v9919_v20  ;;  %v11113_v42 = vld [vmem:[#allocation116_spill] sm:$0xff] }
 0x2ee   : > { %v7624_v56 = vpop.eup %7623  ;;  %7645 = vrcp.f32 %v3523_v62  ;;  %5157 = vst [vmem:[%s9527_s22 + $0x108] sm:$0xff] %v3869_v26 }
 0x2ef   : > { %3686 = vadd.xlane.f32.xlu1 %v10007_v23  ;;  %v10013_v11 = vpop.eup %7625  ;;  %v3885_v18 = vmul.f32 %v7624_v56, %v11110_v38  ;;  %7647 = vpow2.f32 %v3404_v43  ;;  %v11112_v56 = vld [vmem:[#allocation115_spill] sm:$0xff]  ;;  %v3177_v38 = vsub.f32 %v11113_v42, %v9933_v55 }
 0x2f0   : > { %v3555_v21 = vpop.xlane.xlu1 %3554  ;;  %3652 = vadd.xlane.f32.xlu0 %v10013_v11  ;;  %v10020_v30 = vpop.eup %7627  ;;  %v3190_v43 = vsub.f32 %v11112_v56, %v9926_v1 }
 0x2f1   : > { %7649 = vrcp.f32 %v3555_v21  ;;  %v3521_v49 = vpop.xlane.xlu0 %3520  ;;  %5173 = vst [vmem:[%s9527_s22 + $0x188] sm:$0xff] %v3885_v18  ;;  %v10026_v53 = vpop.eup %7629  ;;  %v3408_v21 = vmul.f32 1.442695, %v3174_v52 }
 0x2f2   : > { %7651 = vrcp.f32 %v3521_v49  ;;  %v11114_v49 = vld [vmem:[#allocation6_spill] sm:$0xff]  ;;  %v3440_v56 = vmul.f32 1.442695, %v3190_v43 }
 0x2f3   : > { %3684 = vadd.xlane.f32.xlu1 %v10020_v30  ;;  %7653 = vpow2.f32 %v3436_v3  ;;  %v7632_v60 = vpop.eup %7631  ;;  %v11116_v43 = vld [vmem:[#allocation118_spill] sm:$0xff] }
 0x2f4   : > { %v3553_v62 = vpop.xlane.xlu1 %3552  ;;  %3658 = vadd.xlane.f32.xlu0 %v10026_v53  ;;  %v10031_v20 = vpop.eup %7633  ;;  %v3868_v3 = vmul.f32 %v7632_v60, %v11114_v49  ;;  %v833_v60 = vld [vmem:[%s9018_s13 + $0x270] sm:$0xff]  ;;  %v832_v49 = vld [vmem:[%s9018_s13 + $0x268] sm:$0xff] }
 0x2f5   : > { %7655 = vrcp.f32 %v3553_v62  ;;  %v3527_v32 = vpop.xlane.xlu0 %3526  ;;  %v11115_v62 = vld [vmem:[#allocation117_spill] sm:$0xff] }
 0x2f6   : > { %7657 = vpow2.f32 %v3410_v40  ;;  %v7636_v51 = vpop.eup %7635  ;;  %v3193_v40 = vsub.f32 %v11115_v62, %v9940_v54  ;;  %6984 = vmatprep.mubr.f32.mxu0 %v3868_v3  ;;  %5156 = vst [vmem:[%s9527_s22 + $0x100] sm:$0xff] %v3868_v3 }
 0x2f7   : > { %7659 = vrcp.f32 %v3527_v32  ;;  %3690 = vadd.xlane.f32.xlu1 %v10031_v20  ;;  %v10037_v1 = vpop.eup %7637  ;;  %v3884_v55 = vmul.f32 %v7636_v51, %v9466_v45  ;;  %6985 = vmatmul.mubr.f32.vlgmr.msra.gmra.mxu0 %v3869_v26  ;;  %v3176_v32 = vsub.f32 %v11116_v43, %v9947_v0  ;;  %v849_v26 = vld [vmem:[%s9018_s13 + $0x2f0] sm:$0xff] }
 0x2f8   : > { %7661 = vpow2.f32 %v3442_v8  ;;  %v3559_v52 = vpop.xlane.xlu1 %3558  ;;  %3656 = vadd.xlane.f32.xlu0 %v10037_v1  ;;  %v10045_v42 = vpop.eup %7639  ;;  %v3414_v8 = vmul.f32 1.442695, %v3177_v38  ;;  %7065 = vmatpush3.msra.mxu0 %v9804_v2  ;;  %v11117_v0 = vld [vmem:[#allocation119_spill] sm:$0xff] }
 0x2f9   : > { %7663 = vrcp.f32 %v3559_v52  ;;  %7040 = vmatprep.mubr.f32.mxu1 %v3884_v55  ;;  %5172 = vst [vmem:[%s9527_s22 + $0x180] sm:$0xff] %v3884_v55  ;;  %v3525_v54 = vpop.xlane.xlu0 %3524  ;;  %v10051_v45 = vpop.eup %7641  ;;  %v3192_v38 = vsub.f32 %v11117_v0, %v9954_v37  ;;  %7066 = vmatprep.subr.mxu0 %v833_v60  ;;  %v3412_v52 = vmul.f32 1.442695, %v3176_v32  ;;  %v11119_v55 = vld [vmem:[#allocation9_spill] sm:$0xff]  ;;  %v11120_v32 = vld [vmem:[#allocation8_spill] sm:$0xff] }
 0x2fa   : > { %7665 = vpow2.f32 %v3408_v21  ;;  %7041 = vmatmul.mubr.f32.vlgmr.msra.gmra.mxu1 %v3885_v18  ;;  %v10056_v3 = vpop.eup %7643  ;;  %v3446_v21 = vmul.f32 1.442695, %v3193_v40  ;;  %7067 = vmatpush3.msra.mxu0 %v833_v60  ;;  %v831_v18 = vld [vmem:[%s9018_s13 + $0x260] sm:$0xff]  ;;  %v3194_v0 = vsub.f32 %v11120_v32, %v10004_v9  ;;  %v11121_v9 = vld [vmem:[#allocation122_spill] sm:$0xff]  ;;  %v11124_v32 = vld [vmem:[#allocation11_spill] sm:$0xff] }
 0x2fb   : > { %7667 = vrcp.f32 %v3525_v54  ;;  %3688 = vadd.xlane.f32.xlu1 %v10045_v42  ;;  %7121 = vmatpush3.msra.mxu1 %v9815_v33  ;;  %v7646_v2 = vpop.eup %7645  ;;  %v848_v33 = vld [vmem:[%s9018_s13 + $0x2e8] sm:$0xff] }
 0x2fc   : > { %7669 = vpow2.f32 %v3440_v56  ;;  %v3557_v51 = vpop.xlane.xlu1 %3556  ;;  %3662 = vadd.xlane.f32.xlu0 %v10051_v45  ;;  %v10063_v62 = vpop.eup %7647  ;;  %v11118_v56 = vld [vmem:[#allocation7_spill] sm:$0xff]  ;;  %v3871_v43 = vmul.f32 %v7646_v2, %v11119_v55  ;;  %7122 = vmatprep.subr.mxu1 %v849_v26 }
 0x2fd   : > { %7671 = vrcp.f32 %v3557_v51  ;;  %v3178_v40 = vsub.f32 %v11118_v56, %v9997_v7  ;;  %v3531_v37 = vpop.xlane.xlu0 %3530  ;;  %7068 = vmatprep.subr.mxu0 %v832_v49  ;;  %7123 = vmatpush3.msra.mxu1 %v849_v26  ;;  %v3179_v56 = vsub.f32 %v11121_v9, %v9971_v12  ;;  %v11123_v12 = vld [vmem:[#allocation5_spill] sm:$0xff] }
 0x2fe   : > { %7673 = vpow2.f32 %v3414_v8  ;;  %v7650_v54 = vpop.eup %7649  ;;  %7069 = vmatpush3.msra.mxu0 %v832_v49  ;;  %v3444_v8 = vmul.f32 1.442695, %v3192_v38  ;;  %5159 = vst [vmem:[%s9527_s22 + $0x118] sm:$0xff] %v3871_v43  ;;  %7124 = vmatprep.subr.mxu1 %v848_v33 }
 0x2ff   : > { %7675 = vrcp.f32 %v3531_v37  ;;  %3694 = vadd.xlane.f32.xlu1 %v10056_v3  ;;  %v7652_v60 = vpop.eup %7651  ;;  %v3887_v7 = vmul.f32 %v7650_v54, %v9490_v47  ;;  %7070 = vmatprep.subr.mxu0 %v831_v18  ;;  %v3416_v37 = vmul.f32 1.442695, %v3178_v40  ;;  %v3195_v40 = vsub.f32 %v11123_v12, %v9978_v4 }
 0x300   : > { %7677 = vpow2.f32 %v3446_v21  ;;  %v3563_v51 = vpop.xlane.xlu1 %3562  ;;  %v10074_v2 = vpop.eup %7653  ;;  %3660 = vadd.xlane.f32.xlu0 %v10063_v62  ;;  %v3870_v49 = vmul.f32 %v7652_v60, %v9498_v59  ;;  %v847_v21 = vld [vmem:[%s9018_s13 + $0x2e0] sm:$0xff]  ;;  %7071 = vmatpush3.msra.mxu0 %v831_v18  ;;  %v11122_v59 = vld [vmem:[#allocation10_spill] sm:$0xff]  ;;  %v3448_v60 = vmul.f32 1.442695, %v3194_v0  ;;  %v846_v0 = vld [vmem:[%s9018_s13 + $0x2d8] sm:$0xff] }
 0x301   : > { %7679 = vrcp.f32 %v3563_v51  ;;  %v3529_v47 = vpop.xlane.xlu0 %3528  ;;  %5175 = vst [vmem:[%s9527_s22 + $0x198] sm:$0xff] %v3887_v7  ;;  %7125 = vmatpush3.msra.mxu1 %v848_v33 }
 0x302   : > { %v7656_v38 = vpop.eup %7655  ;;  %7681 = vpow2.f32 %v3412_v52  ;;  %6987 = vmatprep.mubr.f32.mxu0 %v3870_v49  ;;  %5158 = vst [vmem:[%s9527_s22 + $0x110] sm:$0xff] %v3870_v49  ;;  %v830_v52 = vld [vmem:[%s9018_s13 + $0x258] sm:$0xff]  ;;  %7126 = vmatprep.subr.mxu1 %v847_v21  ;;  %v829_v49 = vld [vmem:[%s9018_s13 + $0x250] sm:$0xff] }
 0x303   : > { %v10082_v26 = vpop.eup %7657  ;;  %7683 = vrcp.f32 %v3529_v47  ;;  %3692 = vadd.xlane.f32.xlu1 %v10074_v2  ;;  %v3886_v55 = vmul.f32 %v7656_v38, %v11122_v59  ;;  %6988 = vmatmul.mubr.f32.gmra.mxu0 %v3871_v43  ;;  %v3418_v38 = vmul.f32 1.442695, %v3179_v56  ;;  %v3450_v59 = vmul.f32 1.442695, %v3195_v40 }
 0x304   : > { %v7660_v54 = vpop.eup %7659  ;;  %7685 = vpow2.f32 %v3444_v8  ;;  %v3561_v18 = vpop.xlane.xlu1 %3560  ;;  %3666 = vadd.xlane.f32.xlu0 %v10082_v26  ;;  %7072 = vmatprep.subr.mxu0 %v830_v52 }
 0x305   : > { %v10090_v33 = vpop.eup %7661  ;;  %7687 = vrcp.f32 %v3561_v18  ;;  %7043 = vmatprep.mubr.f32.mxu1 %v3886_v55  ;;  %5174 = vst [vmem:[%s9527_s22 + $0x190] sm:$0xff] %v3886_v55  ;;  %v3873_v51 = vmul.f32 %v7660_v54, %v11124_v32  ;;  %v3535_v4 = vpop.xlane.xlu0 %3534  ;;  %7073 = vmatpush3.msra.mxu0 %v830_v52  ;;  %v845_v55 = vld [vmem:[%s9018_s13 + $0x2d0] sm:$0xff]  ;;  %v827_v32 = vld [vmem:[%s9018_s13 + $0x240] sm:$0xff] }
 0x306   : > { %v7664_v8 = vpop.eup %7663  ;;  %7689 = vpow2.f32 %v3416_v37  ;;  %7044 = vmatmul.mubr.f32.gmra.mxu1 %v3887_v7  ;;  %7074 = vmatprep.subr.mxu0 %v829_v49 }
 0x307   : > { %v10097_v43 = vpop.eup %7665  ;;  %7691 = vrcp.f32 %v3535_v4  ;;  %3698 = vadd.xlane.f32.xlu1 %v10090_v33  ;;  %5161 = vst [vmem:[%s9527_s22 + $0x128] sm:$0xff] %v3873_v51  ;;  %v3889_v9 = vmul.f32 %v7664_v8, %v9517_v29  ;;  %7127 = vmatpush3.msra.mxu1 %v847_v21  ;;  %v844_v8 = vld [vmem:[%s9018_s13 + $0x2c8] sm:$0xff] }
 0x308   : > { %v7668_v47 = vpop.eup %7667  ;;  %7693 = vpow2.f32 %v3448_v60  ;;  %v3567_v56 = vpop.xlane.xlu1 %3566  ;;  %3664 = vadd.xlane.f32.xlu0 %v10097_v43  ;;  %7128 = vmatprep.subr.mxu1 %v846_v0 }
 0x309   : > { %v10102_v7 = vpop.eup %7669  ;;  %7695 = vrcp.f32 %v3567_v56  ;;  %v3872_v37 = vmul.f32 %v7668_v47, %v9523_v24  ;;  %5177 = vst [vmem:[%s9527_s22 + $0x1a8] sm:$0xff] %v3889_v9  ;;  %v3533_v52 = vpop.xlane.xlu0 %3532  ;;  %7075 = vmatpush3.msra.mxu0 %v829_v49  ;;  %7129 = vmatpush3.msra.mxu1 %v846_v0  ;;  %v828_v24 = vld [vmem:[%s9018_s13 + $0x248] sm:$0xff]  ;;  %v843_v47 = vld [vmem:[%s9018_s13 + $0x2c0] sm:$0xff] }
 0x30a   : > { %v7672_v29 = vpop.eup %7671  ;;  %7697 = vpow2.f32 %v3418_v38  ;;  %7130 = vmatprep.subr.mxu1 %v845_v55  ;;  %7076 = vmatprep.subr.mxu0 %v828_v24 }
 0x30b   : > { %v10108_v21 = vpop.eup %7673  ;;  %7699 = vrcp.f32 %v3533_v52  ;;  %3696 = vadd.xlane.f32.xlu1 %v10102_v7  ;;  %6990 = vmatprep.mubr.f32.mxu0 %v3872_v37  ;;  %5160 = vst [vmem:[%s9527_s22 + $0x120] sm:$0xff] %v3872_v37  ;;  %v3888_v54 = vmul.f32 %v7672_v29, %v9532_v10 }
 0x30c   : > { %v7676_v12 = vpop.eup %7675  ;;  %7701 = vpow2.f32 %v3450_v59  ;;  %v3565_v40 = vpop.xlane.xlu1 %3564  ;;  %6991 = vmatmul.mubr.f32.gmra.mxu0 %v3873_v51  ;;  %3670 = vadd.xlane.f32.xlu0 %v10108_v21 }
 0x30d   : > { %v10114_v60 = vpop.eup %7677  ;;  %7703 = vrcp.f32 %v3565_v40  ;;  %7046 = vmatprep.mubr.f32.mxu1 %v3888_v54  ;;  %5176 = vst [vmem:[%s9527_s22 + $0x1a0] sm:$0xff] %v3888_v54  ;;  %v3875_v18 = vmul.f32 %v7676_v12, %v9538_v25  ;;  %v3539_v10 = vpop.xlane.xlu0 %3538  ;;  %7077 = vmatpush3.msra.mxu0 %v828_v24  ;;  %v825_v24 = vld [vmem:[%s9018_s13 + $0x230] sm:$0xff]  ;;  %v842_v40 = vld [vmem:[%s9018_s13 + $0x2b8] sm:$0xff] }
 0x30e   : > { %v7680_v49 = vpop.eup %7679  ;;  %7047 = vmatmul.mubr.f32.gmra.mxu1 %v3889_v9  ;;  %7705 = vrcp.f32 %v3539_v10  ;;  %7078 = vmatprep.subr.mxu0 %v827_v32 }
 0x30f   : > { %v10121_v38 = vpop.eup %7681  ;;  %3702 = vadd.xlane.f32.xlu1 %v10114_v60  ;;  %5163 = vst [vmem:[%s9527_s22 + $0x138] sm:$0xff] %v3875_v18  ;;  %v3891_v51 = vmul.f32 %v7680_v49, %v9543_v57  ;;  %7131 = vmatpush3.msra.mxu1 %v845_v55  ;;  %v826_v55 = vld [vmem:[%s9018_s13 + $0x238] sm:$0xff] }
 0x310   : > { %v7684_v4 = vpop.eup %7683  ;;  %v3571_v0 = vpop.xlane.xlu1 %3570  ;;  %3668 = vadd.xlane.f32.xlu0 %v10121_v38  ;;  %7132 = vmatprep.subr.mxu1 %v844_v8 }
 0x311   : > { %v10126_v25 = vpop.eup %7685  ;;  %7707 = vrcp.f32 %v3571_v0  ;;  %v3874_v9 = vmul.f32 %v7684_v4, %v9549_v27  ;;  %5179 = vst [vmem:[%s9527_s22 + $0x1b8] sm:$0xff] %v3891_v51  ;;  %v3537_v56 = vpop.xlane.xlu0 %3536  ;;  %7079 = vmatpush3.msra.mxu0 %v827_v32  ;;  %7133 = vmatpush3.msra.mxu1 %v844_v8  ;;  %v824_v0 = vld [vmem:[%s9018_s13 + $0x228] sm:$0xff] }
 0x312   : > { %v7688_v59 = vpop.eup %7687  ;;  %7709 = vrcp.f32 %v3537_v56  ;;  %7134 = vmatprep.subr.mxu1 %v843_v47  ;;  %7080 = vmatprep.subr.mxu0 %v826_v55 }
 0x313   : > { %v10132_v57 = vpop.eup %7689  ;;  %3700 = vadd.xlane.f32.xlu1 %v10126_v25  ;;  %6993 = vmatprep.mubr.f32.mxu0 %v3874_v9  ;;  %5162 = vst [vmem:[%s9527_s22 + $0x130] sm:$0xff] %v3874_v9  ;;  %v3890_v37 = vmul.f32 %v7688_v59, %v9557_v15  ;;  %v823_v59 = vld [vmem:[%s9018_s13 + $0x220] sm:$0xff] }
 0x314   : > { %v7692_v27 = vpop.eup %7691  ;;  %v3569_v29 = vpop.xlane.xlu1 %3568  ;;  %6994 = vmatmul.mubr.f32.gmra.mxu0 %v3875_v18  ;;  %3672 = vadd.xlane.f32.xlu0 %v10132_v57 }
 0x315   : > { %v10138_v52 = vpop.eup %7693  ;;  %7711 = vrcp.f32 %v3569_v29  ;;  %7049 = vmatprep.mubr.f32.mxu1 %v3890_v37  ;;  %5178 = vst [vmem:[%s9527_s22 + $0x1b0] sm:$0xff] %v3890_v37  ;;  %v3877_v54 = vmul.f32 %v7692_v27, %v9563_v46  ;;  %v3543_v15 = vpop.xlane.xlu0 %3542  ;;  %7081 = vmatpush3.msra.mxu0 %v826_v55  ;;  %v840_v37 = vld [vmem:[%s9018_s13 + $0x2a8] sm:$0xff] }
 0x316   : > { %v7696_v12 = vpop.eup %7695  ;;  %7050 = vmatmul.mubr.f32.gmra.mxu1 %v3891_v51  ;;  %7713 = vrcp.f32 %v3543_v15  ;;  %7082 = vmatprep.subr.mxu0 %v825_v24  ;;  %v841_v51 = vld [vmem:[%s9018_s13 + $0x2b0] sm:$0xff] }
 0x317   : > { %v10145_v32 = vpop.eup %7697  ;;  %3704 = vadd.xlane.f32.xlu1 %v10138_v52  ;;  %5165 = vst [vmem:[%s9527_s22 + $0x148] sm:$0xff] %v3877_v54  ;;  %v3893_v18 = vmul.f32 %v7696_v12, %v9568_v31  ;;  %7135 = vmatpush3.msra.mxu1 %v843_v47  ;;  %v821_v15 = vld [vmem:[%s9018_s13 + $0x210] sm:$0xff] }
 0x318   : > { %v7700_v49 = vpop.eup %7699  ;;  %v3575_v46 = vpop.xlane.xlu1 %3574  ;;  %3674 = vadd.xlane.f32.xlu0 %v10145_v32  ;;  %7136 = vmatprep.subr.mxu1 %v842_v40 }
 0x319   : > { %v10150_v10 = vpop.eup %7701  ;;  %7715 = vrcp.f32 %v3575_v46  ;;  %v3876_v8 = vmul.f32 %v7700_v49, %v9575_v16  ;;  %5181 = vst [vmem:[%s9527_s22 + $0x1c8] sm:$0xff] %v3893_v18  ;;  %v3541_v31 = vpop.xlane.xlu0 %3540  ;;  %7083 = vmatpush3.msra.mxu0 %v825_v24  ;;  %7137 = vmatpush3.msra.mxu1 %v842_v40 }
 0x31a   : > { %v7704_v4 = vpop.eup %7703  ;;  %7717 = vrcp.f32 %v3541_v31  ;;  %7138 = vmatprep.subr.mxu1 %v841_v51  ;;  %7084 = vmatprep.subr.mxu0 %v824_v0 }
 0x31b   : > { %3706 = vadd.xlane.f32.xlu1 %v10150_v10  ;;  %6996 = vmatprep.mubr.f32.mxu0 %v3876_v8  ;;  %5164 = vst [vmem:[%s9527_s22 + $0x140] sm:$0xff] %v3876_v8  ;;  %v3892_v9 = vmul.f32 %v7704_v4, %v9586_v5  ;;  %v7706_v16 = vpop.eup %7705  ;;  %v822_v5 = vld [vmem:[%s9018_s13 + $0x218] sm:$0xff]  ;;  %v820_v8 = vld [vmem:[%s9018_s13 + $0x208] sm:$0xff]  ;;  %v837_v4 = vld [vmem:[%s9018_s13 + $0x290] sm:$0xff] }
 0x31c   : > { %v3573_v47 = vpop.xlane.xlu1 %3572  ;;  %6997 = vmatmul.mubr.f32.gmra.mxu0 %v3877_v54  ;;  %v3879_v56 = vmul.f32 %v7706_v16, %v9594_v39  ;;  %7139 = vmatpush3.msra.mxu1 %v841_v51  ;;  %v839_v54 = vld [vmem:[%s9018_s13 + $0x2a0] sm:$0xff]  ;;  %v836_v16 = vld [vmem:[%s9018_s13 + $0x288] sm:$0xff] }
 0x31d   : > { %7719 = vrcp.f32 %v3573_v47  ;;  %7052 = vmatprep.mubr.f32.mxu1 %v3892_v9  ;;  %5180 = vst [vmem:[%s9527_s22 + $0x1c0] sm:$0xff] %v3892_v9  ;;  %v3547_v27 = vpop.xlane.xlu0 %3546  ;;  %7085 = vmatpush3.msra.mxu0 %v824_v0  ;;  %v819_v0 = vld [vmem:[%s9018_s13 + $0x200] sm:$0xff] }
 0x31e   : > { %v7708_v55 = vpop.eup %7707  ;;  %7053 = vmatmul.mubr.f32.gmra.mxu1 %v3893_v18  ;;  %7721 = vrcp.f32 %v3547_v27  ;;  %5167 = vst [vmem:[%s9527_s22 + $0x158] sm:$0xff] %v3879_v56  ;;  %7086 = vmatprep.subr.mxu0 %v823_v59  ;;  %v10188_v27 = vld [vmem:[%s9018_s13 + $0x378] sm:$0xff] }
 0x31f   : > { %v3895_v29 = vmul.f32 %v7708_v55, %v9602_v28  ;;  %v7710_v24 = vpop.eup %7709  ;;  %7140 = vmatprep.subr.mxu1 %v840_v37  ;;  %7087 = vmatpush3.msra.mxu0 %v823_v59  ;;  %v838_v28 = vld [vmem:[%s9018_s13 + $0x298] sm:$0xff] }
 0x320   : > { %v3579_v12 = vpop.xlane.xlu1 %3578  ;;  %v3878_v39 = vmul.f32 %v7710_v24, %v9611_v17  ;;  %7141 = vmatpush3.msra.mxu1 %v840_v37  ;;  %7088 = vmatprep.subr.mxu0 %v822_v5 }
 0x321   : > { %7723 = vrcp.f32 %v3579_v12  ;;  %5183 = vst [vmem:[%s9527_s22 + $0x1d8] sm:$0xff] %v3895_v29  ;;  %v3545_v18 = vpop.xlane.xlu0 %3544  ;;  %7142 = vmatprep.subr.mxu1 %v839_v54  ;;  %7089 = vmatpush3.msra.mxu0 %v822_v5 }
 0x322   : > { %v7712_v40 = vpop.eup %7711  ;;  %7725 = vrcp.f32 %v3545_v18  ;;  %6999 = vmatprep.mubr.f32.mxu0 %v3878_v39  ;;  %5166 = vst [vmem:[%s9527_s22 + $0x150] sm:$0xff] %v3878_v39  ;;  %7143 = vmatpush3.msra.mxu1 %v839_v54 }
 0x323   : > { %v3894_v49 = vmul.f32 %v7712_v40, %v9618_v58  ;;  %v7714_v17 = vpop.eup %7713  ;;  %7000 = vmatmul.mubr.f32.gmra.mxu0 %v3879_v56  ;;  %7090 = vmatprep.subr.mxu0 %v821_v15  ;;  %v835_v56 = vld [vmem:[%s9018_s13 + $0x280] sm:$0xff]  ;;  %v11125_v40 = vld [vmem:[#allocation12_spill] sm:$0xff] }
 0x324   : > { %v3577_v46 = vpop.xlane.xlu1 %3576  ;;  %v3881_v51 = vmul.f32 %v7714_v17, %v9626_v22  ;;  %7144 = vmatprep.subr.mxu1 %v838_v28  ;;  %7091 = vmatpush3.msra.mxu0 %v821_v15 }
 0x325   : > { %7727 = vrcp.f32 %v3577_v46  ;;  %7055 = vmatprep.mubr.f32.mxu1 %v3894_v49  ;;  %5182 = vst [vmem:[%s9527_s22 + $0x1d0] sm:$0xff] %v3894_v49  ;;  %v3583_v58 = vpop.xlane.xlu0 %3582  ;;  %7145 = vmatpush3.msra.mxu1 %v838_v28  ;;  %v11126_v49 = vld [vmem:[#allocation13_spill] sm:$0xff] }
 0x326   : > { %v7716_v31 = vpop.eup %7715  ;;  %7056 = vmatmul.mubr.f32.gmra.mxu1 %v3895_v29  ;;  %7729 = vrcp.f32 %v3583_v58  ;;  %5169 = vst [vmem:[%s9527_s22 + $0x168] sm:$0xff] %v3881_v51  ;;  %7092 = vmatprep.subr.mxu0 %v820_v8  ;;  %v10191_v29 = vld [vmem:[%s9018_s13 + $0x3f8] sm:$0xff] }
 0x327   : > { %v3897_v9 = vmul.f32 %v7716_v31, %v9634_v48  ;;  %v7718_v47 = vpop.eup %7717  ;;  %7146 = vmatprep.subr.mxu1 %v837_v4  ;;  %7093 = vmatpush3.msra.mxu0 %v820_v8  ;;  %v11127_v8 = vld [vmem:[#allocation14_spill] sm:$0xff] }
 0x328   : > { %v3615_v59 = vpop.xlane.xlu1 %3614  ;;  %v3880_v22 = vmul.f32 %v7718_v47, %v9643_v44  ;;  %7147 = vmatpush3.msra.mxu1 %v837_v4  ;;  %7094 = vmatprep.subr.mxu0 %v819_v0 }
 0x329   : > { %7731 = vrcp.f32 %v3615_v59  ;;  %5185 = vst [vmem:[%s9527_s22 + $0x1e8] sm:$0xff] %v3897_v9  ;;  %v3581_v55 = vpop.xlane.xlu0 %3580  ;;  %7148 = vmatprep.subr.mxu1 %v836_v16  ;;  %7095 = vmatpush3.msra.mxu0 %v819_v0 }
 0x32a   : > { %v7720_v37 = vpop.eup %7719  ;;  %7733 = vrcp.f32 %v3581_v55  ;;  %7002 = vmatprep.mubr.f32.mxu0 %v3880_v22  ;;  %5168 = vst [vmem:[%s9527_s22 + $0x160] sm:$0xff] %v3880_v22  ;;  %7149 = vmatpush3.msra.mxu1 %v836_v16  ;;  %v865_v55 = vld [vmem:[%s9018_s13 + $0x370] sm:$0xff] }
 0x32b   : > { %v3896_v48 = vmul.f32 %v7720_v37, %v9650_v14  ;;  %v7722_v44 = vpop.eup %7721  ;;  %7003 = vmatmul.mubr.f32.gmra.mxu0 %v3881_v51  ;;  %7150 = vmatprep.subr.mxu1 %v835_v56 }
 0x32c   : > { %v3613_v5 = vpop.xlane.xlu1 %3612  ;;  %v3883_v54 = vmul.f32 %v7722_v44, %v9658_v6  ;;  %7151 = vmatpush3.msra.mxu1 %v835_v56  ;;  %7176 = vmatprep.subr.mxu0 %v10188_v27 }
 0x32d   : > { %7735 = vrcp.f32 %v3613_v5  ;;  %7058 = vmatprep.mubr.f32.mxu1 %v3896_v48  ;;  %5184 = vst [vmem:[%s9527_s22 + $0x1e0] sm:$0xff] %v3896_v48  ;;  %v3587_v14 = vpop.xlane.xlu0 %3586  ;;  %7232 = vmatprep.subr.mxu1 %v10191_v29  ;;  %v11128_v5 = vld [vmem:[#allocation15_spill] sm:$0xff] }
 0x32e   : > { %v7724_v24 = vpop.eup %7723  ;;  %7059 = vmatmul.mubr.f32.gmra.mxu1 %v3897_v9  ;;  %7737 = vrcp.f32 %v3587_v14  ;;  %5171 = vst [vmem:[%s9527_s22 + $0x178] sm:$0xff] %v3883_v54 }
 0x32f   : > { %v3899_v12 = vmul.f32 %v7724_v24, %v9666_v63  ;;  %v7726_v39 = vpop.eup %7725  ;;  %v864_v24 = vld [vmem:[%s9018_s13 + $0x368] sm:$0xff] }
 0x330   : > { %v3619_v15 = vpop.xlane.xlu1 %3618  ;;  %v3882_v18 = vmul.f32 %v7726_v39, %v11125_v40  ;;  %v11129_v39 = vld [vmem:[#allocation16_spill] sm:$0xff]  ;;  %v863_v40 = vld [vmem:[%s9018_s13 + $0x360] sm:$0xff] }
 0x331   : > { %7739 = vrcp.f32 %v3619_v15  ;;  %5187 = vst [vmem:[%s9527_s22 + $0x1f8] sm:$0xff] %v3899_v12  ;;  %v3585_v28 = vpop.xlane.xlu0 %3584 }
 0x332   : > { %v7728_v6 = vpop.eup %7727  ;;  %7741 = vrcp.f32 %v3585_v28  ;;  %7005 = vmatprep.mubr.f32.mxu0 %v3882_v18  ;;  %5170 = vst [vmem:[%s9527_s22 + $0x170] sm:$0xff] %v3882_v18  ;;  %v880_v18 = vld [vmem:[%s9018_s13 + $0x3e8] sm:$0xff]  ;;  %v11130_v28 = vld [vmem:[#allocation17_spill] sm:$0xff] }
 0x333   : > { %v3898_v17 = vmul.f32 %v7728_v6, %v11126_v49  ;;  %v7730_v46 = vpop.eup %7729  ;;  %7006 = vmatmul.mubr.f32.gmra.mxu0 %v3883_v54 }
 0x334   : > { %v3617_v63 = vpop.xlane.xlu1 %3616  ;;  %v3901_v51 = vmul.f32 %v7730_v46, %v11127_v8 }
 0x335   : > { %7743 = vrcp.f32 %v3617_v63  ;;  %7061 = vmatprep.mubr.f32.mxu1 %v3898_v17  ;;  %5186 = vst [vmem:[%s9527_s22 + $0x1f0] sm:$0xff] %v3898_v17  ;;  %v3591_v31 = vpop.xlane.xlu0 %3590  ;;  %v11131_v63 = vld [vmem:[#allocation18_spill] sm:$0xff] }
 0x336   : > { %v7732_v4 = vpop.eup %7731  ;;  %7062 = vmatmul.mubr.f32.gmra.mxu1 %v3899_v12  ;;  %7745 = vrcp.f32 %v3591_v31  ;;  %5189 = vst [vmem:[%s9527_s22 + $0x208] sm:$0xff] %v3901_v51 }
 0x337   : > { %v3917_v58 = vmul.f32 %v7732_v4, %v9698_v13  ;;  %v7734_v0 = vpop.eup %7733  ;;  %v6874_v16 = vpop.f32.mrf.mxu0 }
 0x338   : > { %v3623_v9 = vpop.xlane.xlu1 %3622  ;;  %v3900_v47 = vmul.f32 %v7734_v0, %v9705_v35  ;;  %5253 = vst.msk [vmem:[%s10209_s29 + $0x8] sm:$0xff] %vm883_vm0, %v6874_v16  ;;  %v878_v16 = vld [vmem:[%s9018_s13 + $0x3d8] sm:$0xff] }
 0x339   : > { %7747 = vrcp.f32 %v3623_v9  ;;  %5205 = vst [vmem:[%s9527_s22 + $0x288] sm:$0xff] %v3917_v58  ;;  %v3589_v22 = vpop.xlane.xlu0 %3588  ;;  %v4030_v37 = vpop.f32.mrf.mxu0  ;;  %v861_v9 = vld [vmem:[%s9018_s13 + $0x350] sm:$0xff] }
 0x33a   : > { %v7736_v59 = vpop.eup %7735  ;;  %v6930_v56 = vpop.f32.mrf.mxu1  ;;  %7749 = vrcp.f32 %v3589_v22  ;;  %7096 = vmatprep.mubr.f32.mxu0 %v3900_v47  ;;  %5188 = vst [vmem:[%s9527_s22 + $0x200] sm:$0xff] %v3900_v47  ;;  %5252 = vst.msk [vmem:[%s10209_s29] sm:$0xff] %vm883_vm0, %v4030_v37  ;;  %v11132_v37 = vld [vmem:[#allocation19_spill] sm:$0xff] }
 0x33b   : > { %v3916_v13 = vmul.f32 %v7736_v59, %v9712_v36  ;;  %v7738_v48 = vpop.eup %7737  ;;  %5269 = vst.msk [vmem:[%s10209_s29 + $0x88] sm:$0xff] %vm883_vm0, %v6930_v56  ;;  %7097 = vmatmul.mubr.f32.vlgmr.msra.gmra.mxu0 %v3901_v51  ;;  %v881_v36 = vld [vmem:[%s9018_s13 + $0x3f0] sm:$0xff]  ;;  %v862_v51 = vld [vmem:[%s9018_s13 + $0x358] sm:$0xff] }
 0x33c   : > { %v3621_v35 = vpop.xlane.xlu1 %3620  ;;  %v4175_v44 = vpop.f32.mrf.mxu1  ;;  %v3903_v54 = vmul.f32 %v7738_v48, %v11128_v5  ;;  %7177 = vmatpush3.msra.mxu0 %v10188_v27  ;;  %v11133_v5 = vld [vmem:[#allocation20_spill] sm:$0xff] }
 0x33d   : > { %7751 = vrcp.f32 %v3621_v35  ;;  %7152 = vmatprep.mubr.f32.mxu1 %v3916_v13  ;;  %5204 = vst [vmem:[%s9527_s22 + $0x280] sm:$0xff] %v3916_v13  ;;  %5268 = vst.msk [vmem:[%s10209_s29 + $0x80] sm:$0xff] %vm883_vm0, %v4175_v44  ;;  %v3595_v12 = vpop.xlane.xlu0 %3594  ;;  %7178 = vmatprep.subr.mxu0 %v865_v55  ;;  %v877_v13 = vld [vmem:[%s9018_s13 + $0x3d0] sm:$0xff] }
 0x33e   : > { %v7740_v14 = vpop.eup %7739  ;;  %7153 = vmatmul.mubr.f32.vlgmr.msra.gmra.mxu1 %v3917_v58  ;;  %7753 = vrcp.f32 %v3595_v12  ;;  %5191 = vst [vmem:[%s9527_s22 + $0x218] sm:$0xff] %v3903_v54  ;;  %7179 = vmatpush3.msra.mxu0 %v865_v55  ;;  %v860_v55 = vld [vmem:[%s9018_s13 + $0x348] sm:$0xff] }
 0x33f   : > { %v3919_v15 = vmul.f32 %v7740_v14, %v11129_v39  ;;  %7233 = vmatpush3.msra.mxu1 %v10191_v29  ;;  %v7742_v27 = vpop.eup %7741  ;;  %7180 = vmatprep.subr.mxu0 %v864_v24  ;;  %v879_v29 = vld [vmem:[%s9018_s13 + $0x3e0] sm:$0xff]  ;;  %v876_v39 = vld [vmem:[%s9018_s13 + $0x3c8] sm:$0xff] }
 0x340   : > { %v3627_v6 = vpop.xlane.xlu1 %3626  ;;  %7234 = vmatprep.subr.mxu1 %v881_v36  ;;  %v3902_v49 = vmul.f32 %v7742_v27, %v11130_v28  ;;  %7181 = vmatpush3.msra.mxu0 %v864_v24  ;;  %v859_v14 = vld [vmem:[%s9018_s13 + $0x340] sm:$0xff] }
 0x341   : > { %7755 = vrcp.f32 %v3627_v6  ;;  %5207 = vst [vmem:[%s9527_s22 + $0x298] sm:$0xff] %v3919_v15  ;;  %7235 = vmatpush3.msra.mxu1 %v881_v36  ;;  %v3593_v46 = vpop.xlane.xlu0 %3592  ;;  %7182 = vmatprep.subr.mxu0 %v863_v40  ;;  %v858_v6 = vld [vmem:[%s9018_s13 + $0x338] sm:$0xff] }
 0x342   : > { %v7744_v17 = vpop.eup %7743  ;;  %7236 = vmatprep.subr.mxu1 %v880_v18  ;;  %7757 = vrcp.f32 %v3593_v46  ;;  %7099 = vmatprep.mubr.f32.mxu0 %v3902_v49  ;;  %5190 = vst [vmem:[%s9527_s22 + $0x210] sm:$0xff] %v3902_v49 }
 0x343   : > { %v3918_v8 = vmul.f32 %v7744_v17, %v11131_v63  ;;  %7183 = vmatpush3.msra.mxu0 %v863_v40  ;;  %v7746_v4 = vpop.eup %7745  ;;  %v6877_v58 = vpop.f32.mrf.mxu0  ;;  %7237 = vmatpush3.msra.mxu1 %v880_v18  ;;  %v874_v63 = vld [vmem:[%s9018_s13 + $0x3b8] sm:$0xff] }
 0x344   : > { %v3625_v31 = vpop.xlane.xlu1 %3624  ;;  %7100 = vmatmul.mubr.f32.gmra.mxu0 %v3903_v54  ;;  %5255 = vst.msk [vmem:[%s10209_s29 + $0x18] sm:$0xff] %vm883_vm0, %v6877_v58  ;;  %v3905_v0 = vmul.f32 %v7746_v4, %v9758_v34  ;;  %7238 = vmatprep.subr.mxu1 %v879_v29 }
 0x345   : > { %7759 = vrcp.f32 %v3625_v31  ;;  %7155 = vmatprep.mubr.f32.mxu1 %v3918_v8  ;;  %5206 = vst [vmem:[%s9527_s22 + $0x290] sm:$0xff] %v3918_v8  ;;  %v3599_v22 = vpop.xlane.xlu0 %3598  ;;  %7184 = vmatprep.subr.mxu0 %v862_v51  ;;  %v4040_v56 = vpop.f32.mrf.mxu0  ;;  %v11134_v31 = vld [vmem:[#allocation21_spill] sm:$0xff] }
 0x346   : > { %v7748_v47 = vpop.eup %7747  ;;  %v6933_v59 = vpop.f32.mrf.mxu1  ;;  %7156 = vmatmul.mubr.f32.gmra.mxu1 %v3919_v15  ;;  %7761 = vrcp.f32 %v3599_v22  ;;  %5193 = vst [vmem:[%s9527_s22 + $0x228] sm:$0xff] %v3905_v0  ;;  %7185 = vmatpush3.msra.mxu0 %v862_v51  ;;  %5254 = vst.msk [vmem:[%s10209_s29 + $0x10] sm:$0xff] %vm883_vm0, %v4040_v56 }
 0x347   : > { %5271 = vst.msk [vmem:[%s10209_s29 + $0x98] sm:$0xff] %vm883_vm0, %v6933_v59  ;;  %v3921_v34 = vmul.f32 %v7748_v47, %v11132_v37  ;;  %7239 = vmatpush3.msra.mxu1 %v879_v29  ;;  %v7750_v48 = vpop.eup %7749  ;;  %7186 = vmatprep.subr.mxu0 %v861_v9  ;;  %v857_v29 = vld [vmem:[%s9018_s13 + $0x330] sm:$0xff]  ;;  %v856_v59 = vld [vmem:[%s9018_s13 + $0x328] sm:$0xff] }
 0x348   : > { %v4185_v35 = vpop.f32.mrf.mxu1  ;;  %v3631_v44 = vpop.xlane.xlu1 %3630  ;;  %7240 = vmatprep.subr.mxu1 %v878_v16  ;;  %v3904_v54 = vmul.f32 %v7750_v48, %v11133_v5  ;;  %7187 = vmatpush3.msra.mxu0 %v861_v9  ;;  %v873_v9 = vld [vmem:[%s9018_s13 + $0x3b0] sm:$0xff]  ;;  %v872_v48 = vld [vmem:[%s9018_s13 + $0x3a8] sm:$0xff] }
 0x349   : > { %5270 = vst.msk [vmem:[%s10209_s29 + $0x90] sm:$0xff] %vm883_vm0, %v4185_v35  ;;  %7763 = vrcp.f32 %v3631_v44  ;;  %5209 = vst [vmem:[%s9527_s22 + $0x2a8] sm:$0xff] %v3921_v34  ;;  %7241 = vmatpush3.msra.mxu1 %v878_v16  ;;  %v3597_v24 = vpop.xlane.xlu0 %3596  ;;  %7188 = vmatprep.subr.mxu0 %v860_v55  ;;  %v11135_v16 = vld [vmem:[#allocation22_spill] sm:$0xff] }
 0x34a   : > { %v7752_v36 = vpop.eup %7751  ;;  %7242 = vmatprep.subr.mxu1 %v877_v13  ;;  %7765 = vrcp.f32 %v3597_v24  ;;  %7102 = vmatprep.mubr.f32.mxu0 %v3904_v54  ;;  %5192 = vst [vmem:[%s9527_s22 + $0x220] sm:$0xff] %v3904_v54 }
 0x34b   : > { %v3920_v12 = vmul.f32 %v7752_v36, %v9788_v19  ;;  %7189 = vmatpush3.msra.mxu0 %v860_v55  ;;  %v7754_v15 = vpop.eup %7753  ;;  %7243 = vmatpush3.msra.mxu1 %v877_v13  ;;  %v875_v19 = vld [vmem:[%s9018_s13 + $0x3c0] sm:$0xff]  ;;  %v11137_v36 = vld [vmem:[#allocation24_spill] sm:$0xff] }
 0x34c   : > { %v3629_v40 = vpop.xlane.xlu1 %3628  ;;  %v6880_v18 = vpop.f32.mrf.mxu0  ;;  %7103 = vmatmul.mubr.f32.gmra.mxu0 %v3905_v0  ;;  %v3907_v27 = vmul.f32 %v7754_v15, %v9806_v41  ;;  %7190 = vmatprep.subr.mxu0 %v859_v14  ;;  %v855_v55 = vld [vmem:[%s9018_s13 + $0x320] sm:$0xff] }
 0x34d   : > { %7767 = vrcp.f32 %v3629_v40  ;;  %5257 = vst.msk [vmem:[%s10209_s29 + $0x28] sm:$0xff] %vm883_vm0, %v6880_v18  ;;  %7158 = vmatprep.mubr.f32.mxu1 %v3920_v12  ;;  %5208 = vst [vmem:[%s9527_s22 + $0x2a0] sm:$0xff] %v3920_v12  ;;  %v3603_v17 = vpop.xlane.xlu0 %3602  ;;  %7244 = vmatprep.subr.mxu1 %v876_v39  ;;  %v854_v12 = vld [vmem:[%s9018_s13 + $0x318] sm:$0xff]  ;;  %v11138_v18 = vld [vmem:[#allocation25_spill] sm:$0xff] }
 0x34e   : > { %v7756_v28 = vpop.eup %7755  ;;  %v6936_v49 = vpop.f32.mrf.mxu1  ;;  %7159 = vmatmul.mubr.f32.gmra.mxu1 %v3921_v34  ;;  %7769 = vrcp.f32 %v3603_v17  ;;  %5195 = vst [vmem:[%s9527_s22 + $0x238] sm:$0xff] %v3907_v27  ;;  %7191 = vmatpush3.msra.mxu0 %v859_v14  ;;  %v11136_v34 = vld [vmem:[#allocation23_spill] sm:$0xff]  ;;  %v871_v14 = vld [vmem:[%s9018_s13 + $0x3a0] sm:$0xff] }
 0x34f   : > { %5273 = vst.msk [vmem:[%s10209_s29 + $0xa8] sm:$0xff] %vm883_vm0, %v6936_v49  ;;  %v4050_v46 = vpop.f32.mrf.mxu0  ;;  %v3923_v41 = vmul.f32 %v7756_v28, %v9817_v61  ;;  %7245 = vmatpush3.msra.mxu1 %v876_v39  ;;  %v7758_v8 = vpop.eup %7757  ;;  %7192 = vmatprep.subr.mxu0 %v858_v6  ;;  %v853_v28 = vld [vmem:[%s9018_s13 + $0x310] sm:$0xff]  ;;  %v11139_v49 = vld [vmem:[#allocation26_spill] sm:$0xff] }
 0x350   : > { %5256 = vst.msk [vmem:[%s10209_s29 + $0x20] sm:$0xff] %vm883_vm0, %v4050_v46  ;;  %v4195_v51 = vpop.f32.mrf.mxu1  ;;  %v3635_v4 = vpop.xlane.xlu1 %3634  ;;  %7246 = vmatprep.subr.mxu1 %v875_v19  ;;  %v3906_v58 = vmul.f32 %v7758_v8, %v11134_v31  ;;  %7193 = vmatpush3.msra.mxu0 %v858_v6  ;;  %v870_v46 = vld [vmem:[%s9018_s13 + $0x398] sm:$0xff]  ;;  %v11140_v8 = vld [vmem:[#allocation27_spill] sm:$0xff]  ;;  %v852_v31 = vld [vmem:[%s9018_s13 + $0x308] sm:$0xff] }
 0x351   : > { %5272 = vst.msk [vmem:[%s10209_s29 + $0xa0] sm:$0xff] %vm883_vm0, %v4195_v51  ;;  %7771 = vrcp.f32 %v3635_v4  ;;  %5211 = vst [vmem:[%s9527_s22 + $0x2b8] sm:$0xff] %v3923_v41  ;;  %7247 = vmatpush3.msra.mxu1 %v875_v19  ;;  %v3601_v0 = vpop.xlane.xlu0 %3600  ;;  %7194 = vmatprep.subr.mxu0 %v857_v29  ;;  %v869_v4 = vld [vmem:[%s9018_s13 + $0x390] sm:$0xff] }
 0x352   : > { %v7760_v61 = vpop.eup %7759  ;;  %7248 = vmatprep.subr.mxu1 %v874_v63  ;;  %7773 = vrcp.f32 %v3601_v0  ;;  %7105 = vmatprep.mubr.f32.mxu0 %v3906_v58  ;;  %5194 = vst [vmem:[%s9527_s22 + $0x230] sm:$0xff] %v3906_v58 }
 0x353   : > { %v3922_v47 = vmul.f32 %v7760_v61, %v11135_v16  ;;  %7195 = vmatpush3.msra.mxu0 %v857_v29  ;;  %v7762_v22 = vpop.eup %7761  ;;  %7249 = vmatpush3.msra.mxu1 %v874_v63  ;;  %v11141_v16 = vld [vmem:[#allocation28_spill] sm:$0xff] }
 0x354   : > { %v3633_v56 = vpop.xlane.xlu1 %3632  ;;  %v6883_v37 = vpop.f32.mrf.mxu0  ;;  %7106 = vmatmul.mubr.f32.gmra.mxu0 %v3907_v27  ;;  %v3909_v13 = vmul.f32 %v7762_v22, %v11136_v34  ;;  %7250 = vmatprep.subr.mxu1 %v873_v9  ;;  %v868_v22 = vld [vmem:[%s9018_s13 + $0x388] sm:$0xff] }
 0x355   : > { %7775 = vrcp.f32 %v3633_v56  ;;  %5259 = vst.msk [vmem:[%s10209_s29 + $0x38] sm:$0xff] %vm883_vm0, %v6883_v37  ;;  %7161 = vmatprep.mubr.f32.mxu1 %v3922_v47  ;;  %5210 = vst [vmem:[%s9527_s22 + $0x2b0] sm:$0xff] %v3922_v47  ;;  %v3607_v5 = vpop.xlane.xlu0 %3606  ;;  %7196 = vmatprep.subr.mxu0 %v856_v59 }
 0x356   : > { %v7764_v35 = vpop.eup %7763  ;;  %v6939_v44 = vpop.f32.mrf.mxu1  ;;  %7162 = vmatmul.mubr.f32.gmra.mxu1 %v3923_v41  ;;  %7777 = vrcp.f32 %v3607_v5  ;;  %5197 = vst [vmem:[%s9527_s22 + $0x248] sm:$0xff] %v3909_v13  ;;  %7197 = vmatpush3.msra.mxu0 %v856_v59  ;;  %v851_v59 = vld [vmem:[%s9018_s13 + $0x300] sm:$0xff]  ;;  %v11143_v5 = vld [vmem:[#allocation30_spill] sm:$0xff] }
 0x357   : > { %5275 = vst.msk [vmem:[%s10209_s29 + $0xb8] sm:$0xff] %vm883_vm0, %v6939_v44  ;;  %v4060_v54 = vpop.f32.mrf.mxu0  ;;  %v3925_v24 = vmul.f32 %v7764_v35, %v11137_v36  ;;  %7251 = vmatpush3.msra.mxu1 %v873_v9  ;;  %v7766_v39 = vpop.eup %7765  ;;  %7198 = vmatprep.subr.mxu0 %v855_v55  ;;  %v867_v44 = vld [vmem:[%s9018_s13 + $0x380] sm:$0xff] }
 0x358   : > { %5258 = vst.msk [vmem:[%s10209_s29 + $0x30] sm:$0xff] %vm883_vm0, %v4060_v54  ;;  %v4205_v15 = vpop.f32.mrf.mxu1  ;;  %v3639_v40 = vpop.xlane.xlu1 %3638  ;;  %7252 = vmatprep.subr.mxu1 %v872_v48  ;;  %v3908_v27 = vmul.f32 %v7766_v39, %v11138_v18  ;;  %7199 = vmatpush3.msra.mxu0 %v855_v55 }
 0x359   : > { %5274 = vst.msk [vmem:[%s10209_s29 + $0xb0] sm:$0xff] %vm883_vm0, %v4205_v15  ;;  %7779 = vrcp.f32 %v3639_v40  ;;  %5213 = vst [vmem:[%s9527_s22 + $0x2c8] sm:$0xff] %v3925_v24  ;;  %7253 = vmatpush3.msra.mxu1 %v872_v48  ;;  %v3605_v6 = vpop.xlane.xlu0 %3604  ;;  %7200 = vmatprep.subr.mxu0 %v854_v12 }
 0x35a   : > { %v7768_v19 = vpop.eup %7767  ;;  %7254 = vmatprep.subr.mxu1 %v871_v14  ;;  %7781 = vrcp.f32 %v3605_v6  ;;  %7108 = vmatprep.mubr.f32.mxu0 %v3908_v27  ;;  %5196 = vst [vmem:[%s9527_s22 + $0x240] sm:$0xff] %v3908_v27 }
 0x35b   : > { %v3924_v17 = vmul.f32 %v7768_v19, %v11139_v49  ;;  %7201 = vmatpush3.msra.mxu0 %v854_v12  ;;  %v7770_v41 = vpop.eup %7769  ;;  %7255 = vmatpush3.msra.mxu1 %v871_v14  ;;  %v11144_v12 = vld [vmem:[#allocation60_spill] sm:$0xff]  ;;  %v11145_v19 = vld [vmem:[#allocation90_spill] sm:$0xff] }
 0x35c   : > { %v3637_v29 = vpop.xlane.xlu1 %3636  ;;  %v6886_v63 = vpop.f32.mrf.mxu0  ;;  %7109 = vmatmul.mubr.f32.gmra.mxu0 %v3909_v13  ;;  %v3911_v51 = vmul.f32 %v7770_v41, %v11140_v8  ;;  %7202 = vmatprep.subr.mxu0 %v853_v28  ;;  %v11142_v13 = vld [vmem:[#allocation29_spill] sm:$0xff] }
 0x35d   : > { %7783 = vrcp.f32 %v3637_v29  ;;  %5261 = vst.msk [vmem:[%s10209_s29 + $0x48] sm:$0xff] %vm883_vm0, %v6886_v63  ;;  %7164 = vmatprep.mubr.f32.mxu1 %v3924_v17  ;;  %5212 = vst [vmem:[%s9527_s22 + $0x2c0] sm:$0xff] %v3924_v17  ;;  %v3611_v0 = vpop.xlane.xlu0 %3610  ;;  %7256 = vmatprep.subr.mxu1 %v870_v46  ;;  %v11147_v8 = vld [vmem:[#allocation61_spill] sm:$0xff] }
 0x35e   : > { %v7772_v58 = vpop.eup %7771  ;;  %v6942_v61 = vpop.f32.mrf.mxu1  ;;  %7165 = vmatmul.mubr.f32.gmra.mxu1 %v3925_v24  ;;  %7785 = vrcp.f32 %v3611_v0  ;;  %5199 = vst [vmem:[%s9527_s22 + $0x258] sm:$0xff] %v3911_v51  ;;  %7203 = vmatpush3.msra.mxu0 %v853_v28 }
 0x35f   : > { %5277 = vst.msk [vmem:[%s10209_s29 + $0xc8] sm:$0xff] %vm883_vm0, %v6942_v61  ;;  %v4070_v9 = vpop.f32.mrf.mxu0  ;;  %v3927_v47 = vmul.f32 %v7772_v58, %v11141_v16  ;;  %7257 = vmatpush3.msra.mxu1 %v870_v46  ;;  %v7774_v56 = vpop.eup %7773  ;;  %7204 = vmatprep.subr.mxu0 %v852_v31  ;;  %v11146_v46 = vld [vmem:[#allocation31_spill] sm:$0xff]  ;;  %v11148_v61 = vld [vmem:[#allocation92_spill] sm:$0xff] }
 0x360   : > { %5260 = vst.msk [vmem:[%s10209_s29 + $0x40] sm:$0xff] %vm883_vm0, %v4070_v9  ;;  %v4215_v37 = vpop.f32.mrf.mxu1  ;;  %v3643_v34 = vpop.xlane.xlu1 %3642  ;;  %7258 = vmatprep.subr.mxu1 %v869_v4  ;;  %v3910_v55 = vmul.f32 %v7774_v56, %v11142_v13  ;;  %7205 = vmatpush3.msra.mxu0 %v852_v31 }
 0x361   : > { %5276 = vst.msk [vmem:[%s10209_s29 + $0xc0] sm:$0xff] %vm883_vm0, %v4215_v37  ;;  %7787 = vrcp.f32 %v3643_v34  ;;  %5215 = vst [vmem:[%s9527_s22 + $0x2d8] sm:$0xff] %v3927_v47  ;;  %7259 = vmatpush3.msra.mxu1 %v869_v4  ;;  %v3609_v35 = vpop.xlane.xlu0 %3608  ;;  %7206 = vmatprep.subr.mxu0 %v851_v59 }
 0x362   : > { %v7776_v48 = vpop.eup %7775  ;;  %7260 = vmatprep.subr.mxu1 %v868_v22  ;;  %7789 = vrcp.f32 %v3609_v35  ;;  %7111 = vmatprep.mubr.f32.mxu0 %v3910_v55  ;;  %5198 = vst [vmem:[%s9527_s22 + $0x250] sm:$0xff] %v3910_v55  ;;  %v11150_v55 = vld [vmem:[#allocation62_spill] sm:$0xff] }
 0x363   : > { %v3926_v54 = vmul.f32 %v7776_v48, %v11143_v5  ;;  %7207 = vmatpush3.msra.mxu0 %v851_v59  ;;  %v7778_v36 = vpop.eup %7777  ;;  %7261 = vmatpush3.msra.mxu1 %v868_v22  ;;  %v11149_v22 = vld [vmem:[#allocation32_spill] sm:$0xff]  ;;  %v11151_v5 = vld [vmem:[#allocation94_spill] sm:$0xff] }
 0x364   : > { %v3641_v24 = vpop.xlane.xlu1 %3640  ;;  %v6889_v14 = vpop.f32.mrf.mxu0  ;;  %7112 = vmatmul.mubr.f32.gmra.mxu0 %v3911_v51  ;;  %v3913_v39 = vmul.f32 %v7778_v36, %v11144_v12  ;;  %7262 = vmatprep.subr.mxu1 %v867_v44  ;;  %v11152_v12 = vld [vmem:[#allocation33_spill] sm:$0xff] }
 0x365   : > { %7791 = vrcp.f32 %v3641_v24  ;;  %5263 = vst.msk [vmem:[%s10209_s29 + $0x58] sm:$0xff] %vm883_vm0, %v6889_v14  ;;  %7167 = vmatprep.mubr.f32.mxu1 %v3926_v54  ;;  %5214 = vst [vmem:[%s9527_s22 + $0x2d0] sm:$0xff] %v3926_v54  ;;  %v3647_v18 = vpop.xlane.xlu0 %3646  ;;  %7263 = vmatpush3.msra.mxu1 %v867_v44 }
 0x366   : > { %v7780_v15 = vpop.eup %7779  ;;  %v6945_v40 = vpop.f32.mrf.mxu1  ;;  %7168 = vmatmul.mubr.f32.gmra.mxu1 %v3927_v47  ;;  %7793 = vrcp.f32 %v3647_v18  ;;  %5201 = vst [vmem:[%s9527_s22 + $0x268] sm:$0xff] %v3913_v39 }
 0x367   : > { %5279 = vst.msk [vmem:[%s10209_s29 + $0xd8] sm:$0xff] %vm883_vm0, %v6945_v40  ;;  %v4080_v27 = vpop.f32.mrf.mxu0  ;;  %v3929_v6 = vmul.f32 %v7780_v15, %v11145_v19  ;;  %v7782_v28 = vpop.eup %7781 }
 0x368   : > { %5262 = vst.msk [vmem:[%s10209_s29 + $0x50] sm:$0xff] %vm883_vm0, %v4080_v27  ;;  %v4225_v49 = vpop.f32.mrf.mxu1  ;;  %v3679_v17 = vpop.xlane.xlu1 %3678  ;;  %v3912_v41 = vmul.f32 %v7782_v28, %v11146_v46 }
 0x369   : > { %5278 = vst.msk [vmem:[%s10209_s29 + $0xd0] sm:$0xff] %vm883_vm0, %v4225_v49  ;;  %7795 = vrcp.f32 %v3679_v17  ;;  %5217 = vst [vmem:[%s9527_s22 + $0x2e8] sm:$0xff] %v3929_v6  ;;  %v3645_v63 = vpop.xlane.xlu0 %3644  ;;  %v11153_v17 = vld [vmem:[#allocation63_spill] sm:$0xff] }
 0x36a   : > { %v7784_v29 = vpop.eup %7783  ;;  %7797 = vrcp.f32 %v3645_v63  ;;  %7114 = vmatprep.mubr.f32.mxu0 %v3912_v41  ;;  %5200 = vst [vmem:[%s9527_s22 + $0x260] sm:$0xff] %v3912_v41 }
 0x36b   : > { %v3928_v51 = vmul.f32 %v7784_v29, %v11147_v8  ;;  %v7786_v4 = vpop.eup %7785  ;;  %7115 = vmatmul.mubr.f32.gmra.mxu0 %v3913_v39 }
 0x36c   : > { %v3677_v31 = vpop.xlane.xlu1 %3676  ;;  %v6892_v58 = vpop.f32.mrf.mxu0  ;;  %v3915_v0 = vmul.f32 %v7786_v4, %v11148_v61  ;;  %v11155_v4 = vld [vmem:[#allocation34_spill] sm:$0xff] }
 0x36d   : > { %7799 = vrcp.f32 %v3677_v31  ;;  %5265 = vst.msk [vmem:[%s10209_s29 + $0x68] sm:$0xff] %vm883_vm0, %v6892_v58  ;;  %7170 = vmatprep.mubr.f32.mxu1 %v3928_v51  ;;  %5216 = vst [vmem:[%s9527_s22 + $0x2e0] sm:$0xff] %v3928_v51  ;;  %v3651_v47 = vpop.xlane.xlu0 %3650 }
 0x36e   : > { %v7788_v9 = vpop.eup %7787  ;;  %v6948_v16 = vpop.f32.mrf.mxu1  ;;  %7171 = vmatmul.mubr.f32.gmra.mxu1 %v3929_v6  ;;  %7801 = vrcp.f32 %v3651_v47  ;;  %5203 = vst [vmem:[%s9527_s22 + $0x278] sm:$0xff] %v3915_v0 }
 0x36f   : > { %5281 = vst.msk [vmem:[%s10209_s29 + $0xe8] sm:$0xff] %vm883_vm0, %v6948_v16  ;;  %v4090_v59 = vpop.f32.mrf.mxu0  ;;  %v3931_v56 = vmul.f32 %v7788_v9, %v11149_v22  ;;  %v7790_v37 = vpop.eup %7789 }
 0x370   : > { %5264 = vst.msk [vmem:[%s10209_s29 + $0x60] sm:$0xff] %vm883_vm0, %v4090_v59  ;;  %v4235_v34 = vpop.f32.mrf.mxu1  ;;  %v3683_v13 = vpop.xlane.xlu1 %3682  ;;  %v3914_v48 = vmul.f32 %v7790_v37, %v11150_v55  ;;  %v11157_v59 = vld [vmem:[#allocation98_spill] sm:$0xff] }
 0x371   : > { %5280 = vst.msk [vmem:[%s10209_s29 + $0xe0] sm:$0xff] %vm883_vm0, %v4235_v34  ;;  %7803 = vrcp.f32 %v3683_v13  ;;  %5219 = vst [vmem:[%s9527_s22 + $0x2f8] sm:$0xff] %v3931_v56  ;;  %v3649_v44 = vpop.xlane.xlu0 %3648  ;;  %v11158_v34 = vld [vmem:[#allocation35_spill] sm:$0xff] }
 0x372   : > { %v7792_v35 = vpop.eup %7791  ;;  %7805 = vrcp.f32 %v3649_v44  ;;  %7117 = vmatprep.mubr.f32.mxu0 %v3914_v48  ;;  %5202 = vst [vmem:[%s9527_s22 + $0x270] sm:$0xff] %v3914_v48 }
 0x373   : > { %v3930_v54 = vmul.f32 %v7792_v35, %v11151_v5  ;;  %v7794_v36 = vpop.eup %7793  ;;  %7118 = vmatmul.mubr.f32.gmra.mxu0 %v3915_v0  ;;  %v11156_v0 = vld [vmem:[#allocation64_spill] sm:$0xff]  ;;  %v11159_v35 = vld [vmem:[#allocation65_spill] sm:$0xff] }
 0x374   : > { %v3681_v24 = vpop.xlane.xlu1 %3680  ;;  %v6895_v14 = vpop.f32.mrf.mxu0  ;;  %v3933_v39 = vmul.f32 %v7794_v36, %v11152_v12 }
 0x375   : > { %7807 = vrcp.f32 %v3681_v24  ;;  %5267 = vst.msk [vmem:[%s10209_s29 + $0x78] sm:$0xff] %vm883_vm0, %v6895_v14  ;;  %7173 = vmatprep.mubr.f32.mxu1 %v3930_v54  ;;  %5218 = vst [vmem:[%s9527_s22 + $0x2f0] sm:$0xff] %v3930_v54  ;;  %v3655_v18 = vpop.xlane.xlu0 %3654 }
 0x376   : > { %v7796_v15 = vpop.eup %7795  ;;  %v6951_v40 = vpop.f32.mrf.mxu1  ;;  %7174 = vmatmul.mubr.f32.gmra.mxu1 %v3931_v56  ;;  %5221 = vst [vmem:[%s9527_s22 + $0x308] sm:$0xff] %v3933_v39  ;;  %7809 = vrcp.f32 %v3655_v18 }
 0x377   : > { %v3949_v27 = vmul.f32 %v7796_v15, %v9959_v50  ;;  %5283 = vst.msk [vmem:[%s10209_s29 + $0xf8] sm:$0xff] %vm883_vm0, %v6951_v40  ;;  %v4100_v19 = vpop.f32.mrf.mxu0  ;;  %v7798_v6 = vpop.eup %7797  ;;  %v11154_v50 = vld [vmem:[#allocation96_spill] sm:$0xff] }
 0x378   : > { %5266 = vst.msk [vmem:[%s10209_s29 + $0x70] sm:$0xff] %vm883_vm0, %v4100_v19  ;;  %v4245_v28 = vpop.f32.mrf.mxu1  ;;  %v3687_v49 = vpop.xlane.xlu1 %3686  ;;  %v3932_v46 = vmul.f32 %v7798_v6, %v11153_v17 }
 0x379   : > { %5237 = vst [vmem:[%s9527_s22 + $0x388] sm:$0xff] %v3949_v27  ;;  %5282 = vst.msk [vmem:[%s10209_s29 + $0xf0] sm:$0xff] %vm883_vm0, %v4245_v28  ;;  %7811 = vrcp.f32 %v3687_v49  ;;  %v3653_v29 = vpop.xlane.xlu0 %3652 }
 0x37a   : > { %v7800_v41 = vpop.eup %7799  ;;  %7813 = vrcp.f32 %v3653_v29  ;;  %7208 = vmatprep.mubr.f32.mxu0 %v3932_v46  ;;  %5220 = vst [vmem:[%s9527_s22 + $0x300] sm:$0xff] %v3932_v46 }
 0x37b   : > { %v3948_v63 = vmul.f32 %v7800_v41, %v11154_v50  ;;  %v7802_v8 = vpop.eup %7801  ;;  %7209 = vmatmul.mubr.f32.vlgmr.msra.gmra.mxu0 %v3933_v39 }
 0x37c   : > { %v3685_v51 = vpop.xlane.xlu1 %3684  ;;  %v3935_v31 = vmul.f32 %v7802_v8, %v11155_v4 }
 0x37d   : > { %7815 = vrcp.f32 %v3685_v51  ;;  %7264 = vmatprep.mubr.f32.mxu1 %v3948_v63  ;;  %5236 = vst [vmem:[%s9527_s22 + $0x380] sm:$0xff] %v3948_v63  ;;  %v3659_v61 = vpop.xlane.xlu0 %3658 }
 0x37e   : > { %v7804_v58 = vpop.eup %7803  ;;  %7265 = vmatmul.mubr.f32.vlgmr.msra.gmra.mxu1 %v3949_v27  ;;  %7817 = vrcp.f32 %v3659_v61  ;;  %5223 = vst [vmem:[%s9527_s22 + $0x318] sm:$0xff] %v3935_v31 }
 0x37f   : > { %v3951_v9 = vmul.f32 %v7804_v58, %v11156_v0  ;;  %v7806_v16 = vpop.eup %7805 }
 0x380   : > { %v3691_v47 = vpop.xlane.xlu1 %3690  ;;  %v3934_v22 = vmul.f32 %v7806_v16, %v11157_v59 }
 0x381   : > { %7819 = vrcp.f32 %v3691_v47  ;;  %5239 = vst [vmem:[%s9527_s22 + $0x398] sm:$0xff] %v3951_v9  ;;  %v3657_v37 = vpop.xlane.xlu0 %3656 }
 0x382   : > { %v7808_v56 = vpop.eup %7807  ;;  %7821 = vrcp.f32 %v3657_v37  ;;  %7211 = vmatprep.mubr.f32.mxu0 %v3934_v22  ;;  %5222 = vst [vmem:[%s9527_s22 + $0x310] sm:$0xff] %v3934_v22 }
 0x383   : > { %v3950_v13 = vmul.f32 %v7808_v56, %v11158_v34  ;;  %v7810_v55 = vpop.eup %7809  ;;  %7212 = vmatmul.mubr.f32.gmra.mxu0 %v3935_v31 }
 0x384   : > { %v3689_v48 = vpop.xlane.xlu1 %3688  ;;  %v3937_v44 = vmul.f32 %v7810_v55, %v11159_v35 }
 0x385   : > { %7823 = vrcp.f32 %v3689_v48  ;;  %7267 = vmatprep.mubr.f32.mxu1 %v3950_v13  ;;  %5238 = vst [vmem:[%s9527_s22 + $0x390] sm:$0xff] %v3950_v13  ;;  %v3663_v54 = vpop.xlane.xlu0 %3662 }
 0x386   : > { %v7812_v5 = vpop.eup %7811  ;;  %7268 = vmatmul.mubr.f32.gmra.mxu1 %v3951_v9  ;;  %7825 = vrcp.f32 %v3663_v54  ;;  %5225 = vst [vmem:[%s9527_s22 + $0x328] sm:$0xff] %v3937_v44 }
 0x387   : > { %v3953_v36 = vmul.f32 %v7812_v5, %v10007_v23  ;;  %v7814_v24 = vpop.eup %7813 }
 0x388   : > { %v3695_v14 = vpop.xlane.xlu1 %3694  ;;  %v3936_v12 = vmul.f32 %v7814_v24, %v10013_v11 }
 0x389   : > { %7827 = vrcp.f32 %v3695_v14  ;;  %5241 = vst [vmem:[%s9527_s22 + $0x3a8] sm:$0xff] %v3953_v36  ;;  %v3661_v15 = vpop.xlane.xlu0 %3660 }
 0x38a   : > { %v7816_v39 = vpop.eup %7815  ;;  %7829 = vrcp.f32 %v3661_v15  ;;  %7214 = vmatprep.mubr.f32.mxu0 %v3936_v12  ;;  %5224 = vst [vmem:[%s9527_s22 + $0x320] sm:$0xff] %v3936_v12 }
 0x38b   : > { %v3952_v40 = vmul.f32 %v7816_v39, %v10020_v30  ;;  %v7818_v18 = vpop.eup %7817  ;;  %7215 = vmatmul.mubr.f32.gmra.mxu0 %v3937_v44 }
 0x38c   : > { %v3693_v27 = vpop.xlane.xlu1 %3692  ;;  %v3939_v23 = vmul.f32 %v7818_v18, %v10026_v53 }
 0x38d   : > { %7831 = vrcp.f32 %v3693_v27  ;;  %7270 = vmatprep.mubr.f32.mxu1 %v3952_v40  ;;  %5240 = vst [vmem:[%s9527_s22 + $0x3a0] sm:$0xff] %v3952_v40  ;;  %v3667_v19 = vpop.xlane.xlu0 %3666 }
 0x38e   : > { %v7820_v11 = vpop.eup %7819  ;;  %7271 = vmatmul.mubr.f32.gmra.mxu1 %v3953_v36  ;;  %7833 = vrcp.f32 %v3667_v19  ;;  %5227 = vst [vmem:[%s9527_s22 + $0x338] sm:$0xff] %v3939_v23 }
 0x38f   : > { %v3955_v6 = vmul.f32 %v7820_v11, %v10031_v20  ;;  %v7822_v28 = vpop.eup %7821 }
 0x390   : > { %v3699_v30 = vpop.xlane.xlu1 %3698  ;;  %v3938_v49 = vmul.f32 %v7822_v28, %v10037_v1 }
 0x391   : > { %7835 = vrcp.f32 %v3699_v30  ;;  %5243 = vst [vmem:[%s9527_s22 + $0x3b8] sm:$0xff] %v3955_v6  ;;  %v3665_v46 = vpop.xlane.xlu0 %3664 }
 0x392   : > { %v7824_v17 = vpop.eup %7823  ;;  %7837 = vrcp.f32 %v3665_v46  ;;  %7217 = vmatprep.mubr.f32.mxu0 %v3938_v49  ;;  %5226 = vst [vmem:[%s9527_s22 + $0x330] sm:$0xff] %v3938_v49 }
 0x393   : > { %v3954_v53 = vmul.f32 %v7824_v17, %v10045_v42  ;;  %v7826_v41 = vpop.eup %7825  ;;  %7218 = vmatmul.mubr.f32.gmra.mxu0 %v3939_v23 }
 0x394   : > { %v3697_v29 = vpop.xlane.xlu1 %3696  ;;  %v3941_v20 = vmul.f32 %v7826_v41, %v10051_v45 }
 0x395   : > { %7839 = vrcp.f32 %v3697_v29  ;;  %7273 = vmatprep.mubr.f32.mxu1 %v3954_v53  ;;  %5242 = vst [vmem:[%s9527_s22 + $0x3b0] sm:$0xff] %v3954_v53  ;;  %v3671_v50 = vpop.xlane.xlu0 %3670 }
 0x396   : > { %v7828_v1 = vpop.eup %7827  ;;  %7274 = vmatmul.mubr.f32.gmra.mxu1 %v3955_v6  ;;  %7841 = vrcp.f32 %v3671_v50  ;;  %5229 = vst [vmem:[%s9527_s22 + $0x348] sm:$0xff] %v3941_v20 }
 0x397   : > { %v3957_v63 = vmul.f32 %v7828_v1, %v10056_v3  ;;  %v7830_v8 = vpop.eup %7829 }
 0x398   : > { %v3703_v42 = vpop.xlane.xlu1 %3702  ;;  %v3940_v51 = vmul.f32 %v7830_v8, %v10063_v62 }
 0x399   : > { %7843 = vrcp.f32 %v3703_v42  ;;  %5245 = vst [vmem:[%s9527_s22 + $0x3c8] sm:$0xff] %v3957_v63  ;;  %v3669_v31 = vpop.xlane.xlu0 %3668 }
 0x39a   : > { %v7832_v4 = vpop.eup %7831  ;;  %7845 = vrcp.f32 %v3669_v31  ;;  %7220 = vmatprep.mubr.f32.mxu0 %v3940_v51  ;;  %5228 = vst [vmem:[%s9527_s22 + $0x340] sm:$0xff] %v3940_v51 }
 0x39b   : > { %v3956_v45 = vmul.f32 %v7832_v4, %v10074_v2  ;;  %v7834_v58 = vpop.eup %7833  ;;  %7221 = vmatmul.mubr.f32.gmra.mxu0 %v3941_v20 }
 0x39c   : > { %v3701_v61 = vpop.xlane.xlu1 %3700  ;;  %v3943_v3 = vmul.f32 %v7834_v58, %v10082_v26 }
 0x39d   : > { %7847 = vrcp.f32 %v3701_v61  ;;  %7276 = vmatprep.mubr.f32.mxu1 %v3956_v45  ;;  %5244 = vst [vmem:[%s9527_s22 + $0x3c0] sm:$0xff] %v3956_v45  ;;  %v3673_v0 = vpop.xlane.xlu0 %3672 }
 0x39e   : > { %v7836_v62 = vpop.eup %7835  ;;  %7277 = vmatmul.mubr.f32.gmra.mxu1 %v3957_v63  ;;  %7849 = vrcp.f32 %v3673_v0  ;;  %5231 = vst [vmem:[%s9527_s22 + $0x358] sm:$0xff] %v3943_v3 }
 0x39f   : > { %v3959_v9 = vmul.f32 %v7836_v62, %v10090_v33  ;;  %v7838_v16 = vpop.eup %7837 }
 0x3a0   : > { %v3705_v2 = vpop.xlane.xlu1 %3704  ;;  %v3942_v47 = vmul.f32 %v7838_v16, %v10097_v43 }
 0x3a1   : > { %7851 = vrcp.f32 %v3705_v2  ;;  %5247 = vst [vmem:[%s9527_s22 + $0x3d8] sm:$0xff] %v3959_v9  ;;  %v3675_v22 = vpop.xlane.xlu0 %3674 }
 0x3a2   : > { %v7840_v59 = vpop.eup %7839  ;;  %7853 = vrcp.f32 %v3675_v22  ;;  %7223 = vmatprep.mubr.f32.mxu0 %v3942_v47  ;;  %5230 = vst [vmem:[%s9527_s22 + $0x350] sm:$0xff] %v3942_v47 }
 0x3a3   : > { %v3958_v26 = vmul.f32 %v7840_v59, %v10102_v7  ;;  %v7842_v56 = vpop.eup %7841  ;;  %7224 = vmatmul.mubr.f32.gmra.mxu0 %v3943_v3 }
 0x3a4   : > { %v3707_v37 = vpop.xlane.xlu1 %3706  ;;  %v3945_v33 = vmul.f32 %v7842_v56, %v10108_v21 }
 0x3a5   : > { %7855 = vrcp.f32 %v3707_v37  ;;  %7279 = vmatprep.mubr.f32.mxu1 %v3958_v26  ;;  %5246 = vst [vmem:[%s9527_s22 + $0x3d0] sm:$0xff] %v3958_v26 }
 0x3a6   : > { %v7844_v43 = vpop.eup %7843  ;;  %7280 = vmatmul.mubr.f32.gmra.mxu1 %v3959_v9  ;;  %5233 = vst [vmem:[%s9527_s22 + $0x368] sm:$0xff] %v3945_v33 }
 0x3a7   : > { %v3961_v34 = vmul.f32 %v7844_v43, %v10114_v60  ;;  %v7846_v13 = vpop.eup %7845 }
 0x3a8   : > { %v3944_v55 = vmul.f32 %v7846_v13, %v10121_v38 }
 0x3a9   : > { %5249 = vst [vmem:[%s9527_s22 + $0x3e8] sm:$0xff] %v3961_v34 }
 0x3aa   : > { %v7848_v7 = vpop.eup %7847  ;;  %7226 = vmatprep.mubr.f32.mxu0 %v3944_v55  ;;  %5232 = vst [vmem:[%s9527_s22 + $0x360] sm:$0xff] %v3944_v55 }
 0x3ab   : > { %v3960_v48 = vmul.f32 %v7848_v7, %v10126_v25  ;;  %v7850_v35 = vpop.eup %7849  ;;  %7227 = vmatmul.mubr.f32.gmra.mxu0 %v3945_v33 }
 0x3ac   : > { %v3946_v21 = vmul.f32 %v7850_v35, %v10132_v57 }
 0x3ad   : > { %7282 = vmatprep.mubr.f32.mxu1 %v3960_v48  ;;  %5248 = vst [vmem:[%s9527_s22 + $0x3e0] sm:$0xff] %v3960_v48 }
 0x3ae   : > { %v7852_v60 = vpop.eup %7851  ;;  %7283 = vmatmul.mubr.f32.gmra.mxu1 %v3961_v34  ;;  %7229 = vmatprep.mubr.f32.mxu0 %v3946_v21  ;;  %5234 = vst [vmem:[%s9527_s22 + $0x370] sm:$0xff] %v3946_v21 }
 0x3af   : > { %v3962_v38 = vmul.f32 %v7852_v60, %v10138_v52  ;;  %v7854_v44 = vpop.eup %7853 }
 0x3b0   : > { %v3947_v25 = vmul.f32 %v7854_v44, %v10145_v32 }
 0x3b1   : > { %7285 = vmatprep.mubr.f32.mxu1 %v3962_v38  ;;  %5250 = vst [vmem:[%s9527_s22 + $0x3f0] sm:$0xff] %v3962_v38 }
 0x3b2   : > { %v7856_v5 = vpop.eup %7855  ;;  %7230 = vmatmul.mubr.f32.gmra.mxu0 %v3947_v25  ;;  %5235 = vst [vmem:[%s9527_s22 + $0x378] sm:$0xff] %v3947_v25 }
 0x3b3   : > { %v3963_v57 = vmul.f32 %v7856_v5, %v10150_v10 }
 0x3b5   : > { %7286 = vmatmul.mubr.f32.gmra.mxu1 %v3963_v57  ;;  %5251 = vst [vmem:[%s9527_s22 + $0x3f8] sm:$0xff] %v3963_v57 }
 0x3b7   : > { %v6986_v54 = vpop.f32.mrf.mxu0 }
 0x3b8   : > { %5285 = vst.msk [vmem:[%s10209_s29 + $0x108] sm:$0xff] %vm883_vm0, %v6986_v54 }
 0x3b9   : > { %v4320_v52 = vpop.f32.mrf.mxu0 }
 0x3ba   : > { %v7042_v36 = vpop.f32.mrf.mxu1  ;;  %5284 = vst.msk [vmem:[%s10209_s29 + $0x100] sm:$0xff] %vm883_vm0, %v4320_v52 }
 0x3bb   : > { %5301 = vst.msk [vmem:[%s10209_s29 + $0x188] sm:$0xff] %vm883_vm0, %v7042_v36 }
 0x3bc   : > { %v4465_v32 = vpop.f32.mrf.mxu1 }
 0x3bd   : > { %5300 = vst.msk [vmem:[%s10209_s29 + $0x180] sm:$0xff] %vm883_vm0, %v4465_v32 }
 0x3c3   : > { %v6989_v10 = vpop.f32.mrf.mxu0 }
 0x3c4   : > { %5287 = vst.msk [vmem:[%s10209_s29 + $0x118] sm:$0xff] %vm883_vm0, %v6989_v10 }
 0x3c5   : > { %v4330_v24 = vpop.f32.mrf.mxu0 }
 0x3c6   : > { %v7045_v14 = vpop.f32.mrf.mxu1  ;;  %5286 = vst.msk [vmem:[%s10209_s29 + $0x110] sm:$0xff] %vm883_vm0, %v4330_v24 }
 0x3c7   : > { %5303 = vst.msk [vmem:[%s10209_s29 + $0x198] sm:$0xff] %vm883_vm0, %v7045_v14 }
 0x3c8   : > { %v4475_v12 = vpop.f32.mrf.mxu1 }
 0x3c9   : > { %5302 = vst.msk [vmem:[%s10209_s29 + $0x190] sm:$0xff] %vm883_vm0, %v4475_v12 }
 0x3cc   : > { %v6992_v39 = vpop.f32.mrf.mxu0 }
 0x3cd   : > { %5289 = vst.msk [vmem:[%s10209_s29 + $0x128] sm:$0xff] %vm883_vm0, %v6992_v39 }
 0x3ce   : > { %v4340_v15 = vpop.f32.mrf.mxu0  ;;  %v7048_v40 = vpop.f32.mrf.mxu1 }
 0x3cf   : > { %5288 = vst.msk [vmem:[%s10209_s29 + $0x120] sm:$0xff] %vm883_vm0, %v4340_v15  ;;  %5305 = vst.msk [vmem:[%s10209_s29 + $0x1a8] sm:$0xff] %vm883_vm0, %v7048_v40 }
 0x3d0   : > { %v4485_v18 = vpop.f32.mrf.mxu1 }
 0x3d1   : > { %5304 = vst.msk [vmem:[%s10209_s29 + $0x1a0] sm:$0xff] %vm883_vm0, %v4485_v18 }
 0x3d4   : > { %v6995_v27 = vpop.f32.mrf.mxu0 }
 0x3d5   : > { %5291 = vst.msk [vmem:[%s10209_s29 + $0x138] sm:$0xff] %vm883_vm0, %v6995_v27 }
 0x3d6   : > { %v4350_v23 = vpop.f32.mrf.mxu0  ;;  %v7051_v11 = vpop.f32.mrf.mxu1 }
 0x3d7   : > { %5290 = vst.msk [vmem:[%s10209_s29 + $0x130] sm:$0xff] %vm883_vm0, %v4350_v23  ;;  %5307 = vst.msk [vmem:[%s10209_s29 + $0x1b8] sm:$0xff] %vm883_vm0, %v7051_v11 }
 0x3d8   : > { %v4495_v19 = vpop.f32.mrf.mxu1 }
 0x3d9   : > { %5306 = vst.msk [vmem:[%s10209_s29 + $0x1b0] sm:$0xff] %vm883_vm0, %v4495_v19 }
 0x3dc   : > { %v6998_v6 = vpop.f32.mrf.mxu0 }
 0x3dd   : > { %5293 = vst.msk [vmem:[%s10209_s29 + $0x148] sm:$0xff] %vm883_vm0, %v6998_v6 }
 0x3de   : > { %v4360_v28 = vpop.f32.mrf.mxu0  ;;  %v7054_v30 = vpop.f32.mrf.mxu1 }
 0x3df   : > { %5292 = vst.msk [vmem:[%s10209_s29 + $0x140] sm:$0xff] %vm883_vm0, %v4360_v28  ;;  %5309 = vst.msk [vmem:[%s10209_s29 + $0x1c8] sm:$0xff] %vm883_vm0, %v7054_v30 }
 0x3e0   : > { %v4505_v49 = vpop.f32.mrf.mxu1 }
 0x3e1   : > { %5308 = vst.msk [vmem:[%s10209_s29 + $0x1c0] sm:$0xff] %vm883_vm0, %v4505_v49 }
 0x3e3   : > { %v7001_v17 = vpop.f32.mrf.mxu0 }
 0x3e4   : > { %5295 = vst.msk [vmem:[%s10209_s29 + $0x158] sm:$0xff] %vm883_vm0, %v7001_v17 }
 0x3e5   : > { %v4370_v46 = vpop.f32.mrf.mxu0 }
 0x3e6   : > { %v7057_v53 = vpop.f32.mrf.mxu1  ;;  %5294 = vst.msk [vmem:[%s10209_s29 + $0x150] sm:$0xff] %vm883_vm0, %v4370_v46 }
 0x3e7   : > { %5311 = vst.msk [vmem:[%s10209_s29 + $0x1d8] sm:$0xff] %vm883_vm0, %v7057_v53 }
 0x3e8   : > { %v4515_v41 = vpop.f32.mrf.mxu1 }
 0x3e9   : > { %5310 = vst.msk [vmem:[%s10209_s29 + $0x1d0] sm:$0xff] %vm883_vm0, %v4515_v41 }
 0x3eb   : > { %v7004_v29 = vpop.f32.mrf.mxu0 }
 0x3ec   : > { %5297 = vst.msk [vmem:[%s10209_s29 + $0x168] sm:$0xff] %vm883_vm0, %v7004_v29 }
 0x3ed   : > { %v4380_v20 = vpop.f32.mrf.mxu0 }
 0x3ee   : > { %v7060_v1 = vpop.f32.mrf.mxu1  ;;  %5296 = vst.msk [vmem:[%s10209_s29 + $0x160] sm:$0xff] %vm883_vm0, %v4380_v20 }
 0x3ef   : > { %5313 = vst.msk [vmem:[%s10209_s29 + $0x1e8] sm:$0xff] %vm883_vm0, %v7060_v1 }
 0x3f0   : > { %v4525_v50 = vpop.f32.mrf.mxu1 }
 0x3f1   : > { %5312 = vst.msk [vmem:[%s10209_s29 + $0x1e0] sm:$0xff] %vm883_vm0, %v4525_v50 }
 0x3f3   : > { %v7007_v63 = vpop.f32.mrf.mxu0 }
 0x3f4   : > { %5299 = vst.msk [vmem:[%s10209_s29 + $0x178] sm:$0xff] %vm883_vm0, %v7007_v63 }
 0x3f5   : > { %v4390_v8 = vpop.f32.mrf.mxu0 }
 0x3f6   : > { %v7063_v42 = vpop.f32.mrf.mxu1  ;;  %5298 = vst.msk [vmem:[%s10209_s29 + $0x170] sm:$0xff] %vm883_vm0, %v4390_v8 }
 0x3f7   : > { %5315 = vst.msk [vmem:[%s10209_s29 + $0x1f8] sm:$0xff] %vm883_vm0, %v7063_v42 }
 0x3f8   : > { %v4535_v51 = vpop.f32.mrf.mxu1 }
 0x3f9   : > { %5314 = vst.msk [vmem:[%s10209_s29 + $0x1f0] sm:$0xff] %vm883_vm0, %v4535_v51 }
 0x3fa   : > { %7870 = shalt.err (!%p7867_p5)
}
 0x3fb   : > { %s7871_s13 = scalar_lea.hbm %s10501_s8, 16384  ;;  %s7875_s22 = scalar_lea.hbm %s10686_s4, 32768 }
 0x3fc   : > { %p7872_p6 = scmp.ne.s32.totalorder %s10501_s8, %s7871_s13  ;;  %p7876_p10 = scmp.lt.s32.totalorder %s10501_s8, %s10686_s4 }
 0x3fd   : > { %p7877_p11 = scmp.lt.s32.totalorder %s7875_s22, %s7871_s13 }
 0x3fe   : > { %p7873_p7 = pnand %p7872_p6, %p8003_p4 }
 0x3ff   : > { %p7878_p12 = por %p7877_p11, %p7876_p10 }
 0x400   : > { %p7874_p9 = pneg %p7873_p7 }
 0x402   : > { %p7879_p13 = pnand %p7878_p12, %p7874_p9 }
 0x404   : > { %7882 = shalt.err (!%p7879_p13)
}
 0x405   : > { %s7936_s30 = smov 128   ;;  %s7937_s6 = smov 8   ;;  %v7098_v4 = vpop.f32.mrf.mxu0  ;;  %v7154_v45 = vpop.f32.mrf.mxu1 }
 0x406   : > { %7288 = dma.vmem_to_hbm [thread:$0]  (%p8003_p4), %s10505_s5, 16384, %s10501_s8, %s10509_s9, %s7936_s30, %s7936_s30, %s7937_s6  }
 0x407   : > { %5317 = vst.msk [vmem:[%s10209_s29 + $0x208] sm:$0xff] %vm883_vm0, %v7098_v4  ;;  %v4610_v31 = vpop.f32.mrf.mxu0  ;;  %5333 = vst.msk [vmem:[%s10209_s29 + $0x288] sm:$0xff] %vm883_vm0, %v7154_v45  ;;  %v4755_v58 = vpop.f32.mrf.mxu1 }
 0x408   : > { %5316 = vst.msk [vmem:[%s10209_s29 + $0x200] sm:$0xff] %vm883_vm0, %v4610_v31  ;;  %5332 = vst.msk [vmem:[%s10209_s29 + $0x280] sm:$0xff] %vm883_vm0, %v4755_v58 }
 0x409   : > { %v7101_v61 = vpop.f32.mrf.mxu0  ;;  %v7157_v62 = vpop.f32.mrf.mxu1 }
 0x40a   : > { %5319 = vst.msk [vmem:[%s10209_s29 + $0x218] sm:$0xff] %vm883_vm0, %v7101_v61  ;;  %5335 = vst.msk [vmem:[%s10209_s29 + $0x298] sm:$0xff] %vm883_vm0, %v7157_v62 }
 0x40b   : > { %v4620_v3 = vpop.f32.mrf.mxu0  ;;  %v4765_v0 = vpop.f32.mrf.mxu1 }
 0x40c   : > { %5318 = vst.msk [vmem:[%s10209_s29 + $0x210] sm:$0xff] %vm883_vm0, %v4620_v3  ;;  %5334 = vst.msk [vmem:[%s10209_s29 + $0x290] sm:$0xff] %vm883_vm0, %v4765_v0 }
 0x40d   : > { %v7104_v9 = vpop.f32.mrf.mxu0 }
 0x40e   : > { %5321 = vst.msk [vmem:[%s10209_s29 + $0x228] sm:$0xff] %vm883_vm0, %v7104_v9  ;;  %v7160_v2 = vpop.f32.mrf.mxu1 }
 0x40f   : > { %v4630_v16 = vpop.f32.mrf.mxu0  ;;  %5337 = vst.msk [vmem:[%s10209_s29 + $0x2a8] sm:$0xff] %vm883_vm0, %v7160_v2 }
 0x410   : > { %5320 = vst.msk [vmem:[%s10209_s29 + $0x220] sm:$0xff] %vm883_vm0, %v4630_v16  ;;  %v4775_v47 = vpop.f32.mrf.mxu1 }
 0x411   : > { %5336 = vst.msk [vmem:[%s10209_s29 + $0x2a0] sm:$0xff] %vm883_vm0, %v4775_v47 }
 0x414   : > { %v7107_v59 = vpop.f32.mrf.mxu0 }
 0x415   : > { %5323 = vst.msk [vmem:[%s10209_s29 + $0x238] sm:$0xff] %vm883_vm0, %v7107_v59 }
 0x416   : > { %v4640_v22 = vpop.f32.mrf.mxu0  ;;  %v7163_v26 = vpop.f32.mrf.mxu1 }
 0x417   : > { %5322 = vst.msk [vmem:[%s10209_s29 + $0x230] sm:$0xff] %vm883_vm0, %v4640_v22  ;;  %5339 = vst.msk [vmem:[%s10209_s29 + $0x2b8] sm:$0xff] %vm883_vm0, %v7163_v26 }
 0x418   : > { %v4785_v56 = vpop.f32.mrf.mxu1 }
 0x419   : > { %5338 = vst.msk [vmem:[%s10209_s29 + $0x2b0] sm:$0xff] %vm883_vm0, %v4785_v56 }
 0x41c   : > { %v7110_v37 = vpop.f32.mrf.mxu0 }
 0x41d   : > { %5325 = vst.msk [vmem:[%s10209_s29 + $0x248] sm:$0xff] %vm883_vm0, %v7110_v37 }
 0x41e   : > { %v4650_v33 = vpop.f32.mrf.mxu0  ;;  %v7166_v43 = vpop.f32.mrf.mxu1 }
 0x41f   : > { %5324 = vst.msk [vmem:[%s10209_s29 + $0x240] sm:$0xff] %vm883_vm0, %v4650_v33  ;;  %5341 = vst.msk [vmem:[%s10209_s29 + $0x2c8] sm:$0xff] %vm883_vm0, %v7166_v43 }
 0x420   : > { %v4795_v34 = vpop.f32.mrf.mxu1 }
 0x421   : > { %5340 = vst.msk [vmem:[%s10209_s29 + $0x2c0] sm:$0xff] %vm883_vm0, %v4795_v34 }
 0x424   : > { %v7113_v13 = vpop.f32.mrf.mxu0 }
 0x425   : > { %5327 = vst.msk [vmem:[%s10209_s29 + $0x258] sm:$0xff] %vm883_vm0, %v7113_v13 }
 0x426   : > { %v4660_v55 = vpop.f32.mrf.mxu0  ;;  %v7169_v7 = vpop.f32.mrf.mxu1 }
 0x427   : > { %5326 = vst.msk [vmem:[%s10209_s29 + $0x250] sm:$0xff] %vm883_vm0, %v4660_v55  ;;  %5343 = vst.msk [vmem:[%s10209_s29 + $0x2d8] sm:$0xff] %vm883_vm0, %v7169_v7 }
 0x428   : > { %v4805_v48 = vpop.f32.mrf.mxu1 }
 0x429   : > { %5342 = vst.msk [vmem:[%s10209_s29 + $0x2d0] sm:$0xff] %vm883_vm0, %v4805_v48 }
 0x42b   : > { %v7116_v35 = vpop.f32.mrf.mxu0 }
 0x42c   : > { %5329 = vst.msk [vmem:[%s10209_s29 + $0x268] sm:$0xff] %vm883_vm0, %v7116_v35 }
 0x42d   : > { %v4670_v21 = vpop.f32.mrf.mxu0 }
 0x42e   : > { %v7172_v60 = vpop.f32.mrf.mxu1  ;;  %5328 = vst.msk [vmem:[%s10209_s29 + $0x260] sm:$0xff] %vm883_vm0, %v4670_v21 }
 0x42f   : > { %5345 = vst.msk [vmem:[%s10209_s29 + $0x2e8] sm:$0xff] %vm883_vm0, %v7172_v60 }
 0x430   : > { %v4815_v38 = vpop.f32.mrf.mxu1 }
 0x431   : > { %5344 = vst.msk [vmem:[%s10209_s29 + $0x2e0] sm:$0xff] %vm883_vm0, %v4815_v38 }
 0x433   : > { %v7119_v44 = vpop.f32.mrf.mxu0 }
 0x434   : > { %5331 = vst.msk [vmem:[%s10209_s29 + $0x278] sm:$0xff] %vm883_vm0, %v7119_v44 }
 0x435   : > { %v4680_v25 = vpop.f32.mrf.mxu0 }
 0x436   : > { %v7175_v5 = vpop.f32.mrf.mxu1  ;;  %5330 = vst.msk [vmem:[%s10209_s29 + $0x270] sm:$0xff] %vm883_vm0, %v4680_v25 }
 0x437   : > { %5347 = vst.msk [vmem:[%s10209_s29 + $0x2f8] sm:$0xff] %vm883_vm0, %v7175_v5 }
 0x438   : > { %v4825_v57 = vpop.f32.mrf.mxu1 }
 0x439   : > { %5346 = vst.msk [vmem:[%s10209_s29 + $0x2f0] sm:$0xff] %vm883_vm0, %v4825_v57 }
 0x43b   : > { %v7210_v54 = vpop.f32.mrf.mxu0 }
 0x43c   : > { %5349 = vst.msk [vmem:[%s10209_s29 + $0x308] sm:$0xff] %vm883_vm0, %v7210_v54 }
 0x43d   : > { %v4900_v52 = vpop.f32.mrf.mxu0 }
 0x43e   : > { %v7266_v36 = vpop.f32.mrf.mxu1  ;;  %5348 = vst.msk [vmem:[%s10209_s29 + $0x300] sm:$0xff] %vm883_vm0, %v4900_v52 }
 0x43f   : > { %5365 = vst.msk [vmem:[%s10209_s29 + $0x388] sm:$0xff] %vm883_vm0, %v7266_v36 }
 0x440   : > { %v5045_v32 = vpop.f32.mrf.mxu1 }
 0x441   : > { %5364 = vst.msk [vmem:[%s10209_s29 + $0x380] sm:$0xff] %vm883_vm0, %v5045_v32 }
 0x443   : > { %v7213_v10 = vpop.f32.mrf.mxu0 }
 0x444   : > { %5351 = vst.msk [vmem:[%s10209_s29 + $0x318] sm:$0xff] %vm883_vm0, %v7213_v10 }
 0x445   : > { %v4910_v24 = vpop.f32.mrf.mxu0 }
 0x446   : > { %v7269_v14 = vpop.f32.mrf.mxu1  ;;  %5350 = vst.msk [vmem:[%s10209_s29 + $0x310] sm:$0xff] %vm883_vm0, %v4910_v24 }
 0x447   : > { %5367 = vst.msk [vmem:[%s10209_s29 + $0x398] sm:$0xff] %vm883_vm0, %v7269_v14 }
 0x448   : > { %v5055_v12 = vpop.f32.mrf.mxu1 }
 0x449   : > { %5366 = vst.msk [vmem:[%s10209_s29 + $0x390] sm:$0xff] %vm883_vm0, %v5055_v12 }
 0x44b   : > { %v7216_v39 = vpop.f32.mrf.mxu0 }
 0x44c   : > { %5353 = vst.msk [vmem:[%s10209_s29 + $0x328] sm:$0xff] %vm883_vm0, %v7216_v39 }
 0x44d   : > { %v4920_v15 = vpop.f32.mrf.mxu0 }
 0x44e   : > { %v7272_v40 = vpop.f32.mrf.mxu1  ;;  %5352 = vst.msk [vmem:[%s10209_s29 + $0x320] sm:$0xff] %vm883_vm0, %v4920_v15 }
 0x44f   : > { %5369 = vst.msk [vmem:[%s10209_s29 + $0x3a8] sm:$0xff] %vm883_vm0, %v7272_v40 }
 0x450   : > { %v5065_v18 = vpop.f32.mrf.mxu1 }
 0x451   : > { %5368 = vst.msk [vmem:[%s10209_s29 + $0x3a0] sm:$0xff] %vm883_vm0, %v5065_v18 }
 0x453   : > { %v7219_v27 = vpop.f32.mrf.mxu0 }
 0x454   : > { %5355 = vst.msk [vmem:[%s10209_s29 + $0x338] sm:$0xff] %vm883_vm0, %v7219_v27 }
 0x455   : > { %v4930_v23 = vpop.f32.mrf.mxu0 }
 0x456   : > { %v7275_v11 = vpop.f32.mrf.mxu1  ;;  %5354 = vst.msk [vmem:[%s10209_s29 + $0x330] sm:$0xff] %vm883_vm0, %v4930_v23 }
 0x457   : > { %5371 = vst.msk [vmem:[%s10209_s29 + $0x3b8] sm:$0xff] %vm883_vm0, %v7275_v11 }
 0x458   : > { %v5075_v19 = vpop.f32.mrf.mxu1 }
 0x459   : > { %5370 = vst.msk [vmem:[%s10209_s29 + $0x3b0] sm:$0xff] %vm883_vm0, %v5075_v19 }
 0x45b   : > { %v7222_v6 = vpop.f32.mrf.mxu0 }
 0x45c   : > { %5357 = vst.msk [vmem:[%s10209_s29 + $0x348] sm:$0xff] %vm883_vm0, %v7222_v6 }
 0x45d   : > { %v4940_v28 = vpop.f32.mrf.mxu0 }
 0x45e   : > { %v7278_v30 = vpop.f32.mrf.mxu1  ;;  %5356 = vst.msk [vmem:[%s10209_s29 + $0x340] sm:$0xff] %vm883_vm0, %v4940_v28 }
 0x45f   : > { %5373 = vst.msk [vmem:[%s10209_s29 + $0x3c8] sm:$0xff] %vm883_vm0, %v7278_v30 }
 0x460   : > { %v5085_v49 = vpop.f32.mrf.mxu1 }
 0x461   : > { %5372 = vst.msk [vmem:[%s10209_s29 + $0x3c0] sm:$0xff] %vm883_vm0, %v5085_v49 }
 0x463   : > { %v7225_v17 = vpop.f32.mrf.mxu0 }
 0x464   : > { %5359 = vst.msk [vmem:[%s10209_s29 + $0x358] sm:$0xff] %vm883_vm0, %v7225_v17 }
 0x465   : > { %v4950_v46 = vpop.f32.mrf.mxu0 }
 0x466   : > { %v7281_v53 = vpop.f32.mrf.mxu1  ;;  %5358 = vst.msk [vmem:[%s10209_s29 + $0x350] sm:$0xff] %vm883_vm0, %v4950_v46 }
 0x467   : > { %5375 = vst.msk [vmem:[%s10209_s29 + $0x3d8] sm:$0xff] %vm883_vm0, %v7281_v53 }
 0x468   : > { %v5095_v41 = vpop.f32.mrf.mxu1 }
 0x469   : > { %5374 = vst.msk [vmem:[%s10209_s29 + $0x3d0] sm:$0xff] %vm883_vm0, %v5095_v41 }
 0x46b   : > { %v7228_v29 = vpop.f32.mrf.mxu0 }
 0x46c   : > { %5361 = vst.msk [vmem:[%s10209_s29 + $0x368] sm:$0xff] %vm883_vm0, %v7228_v29 }
 0x46d   : > { %v4960_v20 = vpop.f32.mrf.mxu0 }
 0x46e   : > { %v7284_v1 = vpop.f32.mrf.mxu1  ;;  %5360 = vst.msk [vmem:[%s10209_s29 + $0x360] sm:$0xff] %vm883_vm0, %v4960_v20 }
 0x46f   : > { %5377 = vst.msk [vmem:[%s10209_s29 + $0x3e8] sm:$0xff] %vm883_vm0, %v7284_v1 }
 0x470   : > { %v5105_v50 = vpop.f32.mrf.mxu1 }
 0x471   : > { %5376 = vst.msk [vmem:[%s10209_s29 + $0x3e0] sm:$0xff] %vm883_vm0, %v5105_v50 }
 0x472   : > { %v7231_v63 = vpop.f32.mrf.mxu0 }
 0x473   : > { %5363 = vst.msk [vmem:[%s10209_s29 + $0x378] sm:$0xff] %vm883_vm0, %v7231_v63 }
 0x474   : > { %v4970_v8 = vpop.f32.mrf.mxu0 }
 0x475   : > { %v7287_v42 = vpop.f32.mrf.mxu1  ;;  %5362 = vst.msk [vmem:[%s10209_s29 + $0x370] sm:$0xff] %vm883_vm0, %v4970_v8 }
 0x476   : > { %5379 = vst.msk [vmem:[%s10209_s29 + $0x3f8] sm:$0xff] %vm883_vm0, %v7287_v42 }
 0x477   : > { %v5115_v51 = vpop.f32.mrf.mxu1 }
 0x478   : > { %5378 = vst.msk [vmem:[%s10209_s29 + $0x3f0] sm:$0xff] %vm883_vm0, %v5115_v51 }
 0x479 PF: > { %p7294_p4 = scmp.ge.s32.totalorder %s7933_s20, 2  ;;  %s5450_s25 = sand.u32 1, %s7913_s15  }
 0x47a   : > { %s5451_s5 = scalar_lea.sflag [#allocation3], %s5450_s25 }
 0x47b   : > { %p7291_p0 = pnand %p7294_p4, %p8010_p8 }
 0x47d   : > { %p7292_p1 = pneg %p7291_p0 }
 0x47f   : > { %7908 = dma.done.wait (%p7292_p1), %s5451_s5, 16384  }
 0x480   : > { %7910 = vsyncadd (%p7292_p1), %s5451_s5, 4294950912  ;;  %s18_s20 = sadd.s32 1, %s7933_s20   ;;  %s11160_s15 = smov %s7917_s16 }
 0x481   : > { %p15_p2 = scmp.ge.s32.totalorder %s18_s20, 4   ;;  %s11161_s16 = smov %s7921_s17 }
 0x482   : > { %s11162_s17 = smov %s8016_s28  ;;  %s11163_s18 = smov %s7929_s19 }
 0x483   : > { %s11164_s19 = smov %s11166_s23  ;;  %17 = sbr.rel (!%p15_p2) target bundleno = 4 (0x4), region = 85 }
 0x488   :  { %5456 = vsyncpa [#allocation3], 1 }
 0x489   :  { %5458 = vsyncpa [#allocation3 + $0x1], 1 }

</bundles_post_ra>
